<compile_context>
chip_gen: v6e
topology: v6e:2x2x1
jax: 0.10.0
libtpu: 0.0.40
codegen_flags: <defaults>
</compile_context>

<pallas_src>
import math
import functools

import jax
import jax.numpy as jnp
from jax import lax
from jax.experimental import pallas as pl
from jax.experimental.pallas import tpu as pltpu

# ---------------- config (MambaConfig(d_model=128, n_layers=3) defaults) ----------------
D_MODEL = 128                      # hidden_dim
N_LAYERS = 3
D_STATE = 16                       # N
EXPAND = 2
D_INNER = EXPAND * D_MODEL         # 256
D_CONV = 4
DT_RANK = math.ceil(D_MODEL / 16)  # 8
RMS_EPS = 1e-5
VOCAB = 37                         # len(char_list) -> input_dim == output_dim
VPAD = 128                         # lane-dense padded vocab for the decoder output
MAX_LEN_POS = 256                  # RelativePositionEncoding(256, hidden_dim)


def _sigmoid(a):
    return 1.0 / (1.0 + jnp.exp(-a))


def _softplus(a):
    # numerically stable softplus (matches F.softplus semantics)
    return jnp.log1p(jnp.exp(-jnp.abs(a))) + jnp.maximum(a, 0.0)


# ---------------------------------------------------------------------------------------
# Fused Pallas kernel: 3 x (RMSNorm -> MambaBlock -> +x) followed by the decoder Linear,
# for one batch element (grid iterates over the batch, "parallel").
# ---------------------------------------------------------------------------------------
def fused_mamba_kernel(x_ref, rmsw_ref, win_ref, convw_ref, convb_ref,
                       wxp_ref, wdt_ref, dtb_ref, aneg_ref, dvec_ref,
                       wout_ref, decw_ref, decb_ref,
                       o_ref,
                       y_scr,
                       *, n_layers, Lp, ED, N, R, d_conv):
    f32 = jnp.float32
    bf16 = jnp.bfloat16
    M = Lp                                   # tokens handled by this grid step (1 batch elem)

    x = x_ref[...]                           # (M, D) residual stream, f32, live across layers

    for l in range(n_layers):
        # ---------------- RMSNorm ----------------
        ms = jnp.mean(x * x, axis=-1, keepdims=True)
        xn = x * lax.rsqrt(ms + RMS_EPS) * rmsw_ref[l]

        # ---------------- in_proj (bf16 MXU, f32 accumulate) ----------------
        xz = lax.dot_general(xn.astype(bf16), win_ref[l],
                             (((1,), (1,)), ((), ())), preferred_element_type=f32)
        xr = xz[:, :ED]                      # (M, ED)
        z = xz[:, ED:]                       # (M, ED)

        # ---------------- causal depthwise conv1d + SiLU (no VMEM round trip) ----------
        convw = convw_ref[l]                 # (d_conv, ED): convw[k, c] == torch w[c, 0, k]
        acc = xr * convw[d_conv - 1:d_conv, :] + convb_ref[l]
        for s in range(1, d_conv):           # out[t] += w[d_conv-1-s] * x[t - s]
            shifted = jnp.concatenate(
                [jnp.zeros((s, ED), f32), xr[:M - s, :]], axis=0)
            acc = acc + shifted * convw[d_conv - 1 - s:d_conv - s, :]
        xc = acc * _sigmoid(acc)             # (M, ED)
        xc_bf = xc.astype(bf16)

        # ---------------- x_proj ----------------
        wxp = wxp_ref[l]                     # (R + 2N, ED)
        # delta low-rank, time-major: (M, R)
        d_lr = lax.dot_general(xc_bf, wxp[:R, :],
                               (((1,), (1,)), ((), ())), preferred_element_type=f32)
        # B^T / C^T state-major: (2N, M) -- weight as LHS, so no transposes are needed
        bcT = lax.dot_general(wxp[R:R + 2 * N, :], xc_bf,
                              (((1,), (1,)), ((), ())), preferred_element_type=f32)
        bT = bcT[:N, :]                      # (N, M): bT[n, t] == B[t, n]
        cT = bcT[N:2 * N, :]                 # (N, M): cT[n, t] == C[t, n]

        # ---------------- dt_proj + softplus ----------------
        delta = lax.dot_general(d_lr.astype(bf16), wdt_ref[l],
                                (((1,), (1,)), ((), ())), preferred_element_type=f32)
        delta = _softplus(delta + dtb_ref[l])    # (M, ED)
        dx = delta * xc                          # (M, ED)

        a_l = aneg_ref[l]                        # (N, ED) == (-exp(A_log))^T

        # ---------------- fused selective scan (statically unrolled over time) --------
        # h is (N, ED) = a handful of vregs carried in registers; per step:
        #   dA_t  = exp(delta[t] * A)            (EUP, off the dependent chain)
        #   h     = dA_t * h + B[t, :] * (delta[t]*x[t])
        #   y[t]  = sum_n C[t, n] * h[n, :]      (XLU sublane reduce)
        # exp stays in f32: the decay factors compound over up to Lp steps.
        h = jnp.zeros((N, ED), f32)
        for t in range(Lp):
            db = jnp.broadcast_to(delta[t:t + 1, :], (N, ED))
            dA_t = jnp.exp(db * a_l)
            dxb = jnp.broadcast_to(dx[t:t + 1, :], (N, ED))
            h = dA_t * h + bT[:, t:t + 1] * dxb
            y_scr[t:t + 1, :] = jnp.sum(cT[:, t:t + 1] * h, axis=0, keepdims=True)

        # ---------------- y = scan + D*x ; gate ; out_proj ; residual ----------------
        y = y_scr[...] + dvec_ref[l] * xc
        g = y * (z * _sigmoid(z))
        out = lax.dot_general(g.astype(bf16), wout_ref[l],
                              (((1,), (1,)), ((), ())), preferred_element_type=f32)
        x = x + out

    # ---------------- decoder (lane-dense: vocab padded to 128 columns) ----------------
    logits = lax.dot_general(x.astype(bf16), decw_ref[...],
                             (((1,), (1,)), ((), ())), preferred_element_type=f32)
    o_ref[...] = logits + decb_ref[...]


def _full_spec(shape):
    if len(shape) == 2:
        return pl.BlockSpec(shape, lambda i: (0, 0))
    return pl.BlockSpec(shape, lambda i: (0, 0, 0))


def _fused_forward(x2d, params, *, B, Lp):
    weights = [params['rms_w'], params['w_in'], params['conv_w'], params['conv_b'],
               params['w_xproj'], params['w_dt'], params['dt_b'], params['a_neg'],
               params['d_vec'], params['w_out'], params['dec_w'], params['dec_b']]
    in_specs = [pl.BlockSpec((Lp, D_MODEL), lambda i: (i, 0))]
    in_specs += [_full_spec(w.shape) for w in weights]

    kernel = functools.partial(
        fused_mamba_kernel, n_layers=N_LAYERS, Lp=Lp,
        ED=D_INNER, N=D_STATE, R=DT_RANK, d_conv=D_CONV)

    return pl.pallas_call(
        kernel,
        out_shape=jax.ShapeDtypeStruct((B * Lp, VPAD), jnp.float32),
        grid=(B,),
        in_specs=in_specs,
        out_specs=pl.BlockSpec((Lp, VPAD), lambda i: (i, 0)),
        scratch_shapes=[pltpu.VMEM((Lp, D_INNER), jnp.float32)],   # y staging only
        compiler_params=pltpu.CompilerParams(
            dimension_semantics=("parallel",),
            vmem_limit_bytes=32 * 1024 * 1024),
    )(x2d, *weights)


# ---------------------------------------------------------------------------------------
# Plain-JAX glue: embedding + relative position encoding (gathers), padding, slicing.
# ---------------------------------------------------------------------------------------
def _rel_pos_encoding(pos_emb_w, L):
    # pe[t] = mean_j pos_emb_w[j - t + MAX_LEN_POS - 1], j = 0..L-1
    # computed as a cumsum window mean (no (L, L, D) gather materialization).
    D = pos_emb_w.shape[1]
    csum = jnp.concatenate([jnp.zeros((1, D), pos_emb_w.dtype),
                            jnp.cumsum(pos_emb_w, axis=0)], axis=0)
    start = (MAX_LEN_POS - 1) - jnp.arange(L)
    return (csum[start + L] - csum[start]) / L


def mamba_model_forward(params, src):
    B, L = src.shape
    Lp = ((L + 7) // 8) * 8                                        # pad seq to sublane multiple
    x = params['emb'][src].astype(jnp.float32) * math.sqrt(D_MODEL)
    x = x + _rel_pos_encoding(params['pos_emb'], L)[None]
    if Lp != L:
        x = jnp.pad(x, ((0, 0), (0, Lp - L), (0, 0)))              # causal model: pad rows inert
    logits = _fused_forward(x.reshape(B * Lp, D_MODEL), params, B=B, Lp=Lp)
    return logits.reshape(B, Lp, VPAD)[:, :L, :VOCAB]


# ---------------------------------------------------------------------------------------
# Deterministic parameter init (shapes follow the PyTorch module's __init__)
# ---------------------------------------------------------------------------------------
def init_params(key):
    D, ED, N, R = D_MODEL, D_INNER, D_STATE, DT_RANK
    counter = [0]

    def nk():
        counter[0] += 1
        return jax.random.fold_in(key, counter[0])

    def nrm(shape, scale=0.02):
        return (scale * jax.random.normal(nk(), shape)).astype(jnp.float32)

    dec_w = jnp.zeros((VPAD, D), jnp.float32).at[:VOCAB].set(nrm((VOCAB, D)))
    params = {
        'emb': jax.random.normal(nk(), (VOCAB, D), jnp.float32),
        'pos_emb': nrm((2 * MAX_LEN_POS - 1, D)),
        'dec_w': dec_w.astype(jnp.bfloat16),          # vocab padded to 128 lanes (sliced outside)
        'dec_b': jnp.zeros((1, VPAD), jnp.float32),
    }

    dt_std = R ** -0.5
    stacks = {name: [] for name in
              ('rms_w', 'w_in', 'conv_w', 'conv_b', 'w_xproj', 'w_dt',
               'dt_b', 'a_neg', 'd_vec', 'w_out')}
    for _ in range(N_LAYERS):
        # dt bias init exactly as in the module (inverse softplus of sampled dt)
        u = jax.random.uniform(nk(), (ED,), jnp.float32)
        dt = jnp.exp(u * (math.log(0.1) - math.log(0.001)) + math.log(0.001))
        dt = jnp.maximum(dt, 1e-4)
        inv_dt = dt + jnp.log(-jnp.expm1(-dt))
        # A_log = log(arange(1..N)) repeated over ED => A = -exp(A_log); stored transposed (N, ED)
        a_neg = -jnp.broadcast_to(jnp.arange(1, N + 1, dtype=jnp.float32)[:, None], (N, ED))

        stacks['rms_w'].append(jnp.ones((1, D), jnp.float32))
        stacks['w_in'].append(nrm((2 * ED, D)).astype(jnp.bfloat16))          # in_proj.weight
        stacks['conv_w'].append(nrm((D_CONV, ED), 0.1))                       # conv1d.weight (ED,1,4)->(4,ED)
        stacks['conv_b'].append(nrm((1, ED), 0.1))                            # conv1d.bias
        stacks['w_xproj'].append(nrm((R + 2 * N, ED)).astype(jnp.bfloat16))   # x_proj.weight
        stacks['w_dt'].append(jax.random.uniform(nk(), (ED, R), jnp.float32,
                                                 -dt_std, dt_std).astype(jnp.bfloat16))
        stacks['dt_b'].append(inv_dt.reshape(1, ED).astype(jnp.float32))
        stacks['a_neg'].append(a_neg.astype(jnp.float32))
        stacks['d_vec'].append(jnp.ones((1, ED), jnp.float32))
        stacks['w_out'].append(nrm((D, ED)).astype(jnp.bfloat16))             # out_proj.weight
    for name, vals in stacks.items():
        params[name] = jnp.stack(vals)
    return params


if __name__ == "__main__":
    key = jax.random.PRNGKey(0)
    params = init_params(key)
    src = jax.random.randint(jax.random.fold_in(key, 123), (2, 8), 0, VOCAB)  # (B=2, L=8) token ids

    fwd = jax.jit(mamba_model_forward)
    logits = jax.block_until_ready(fwd(params, src))

    assert logits.shape == (2, 8, VOCAB), logits.shape
    assert bool(jnp.all(jnp.isfinite(logits)))
    print("KERNEL_OK")
</pallas_src>

<mosaic_0001>
module attributes {stable_mosaic.version = 11 : i64} {
  func.func @fused_mamba_kernel(%arg0: i32, %arg1: memref<8x128xf32, #tpu.memory_space<vmem>>, %arg2: memref<3x1x128xf32, #tpu.memory_space<vmem>>, %arg3: memref<3x512x128xbf16, #tpu.memory_space<vmem>>, %arg4: memref<3x4x256xf32, #tpu.memory_space<vmem>>, %arg5: memref<3x1x256xf32, #tpu.memory_space<vmem>>, %arg6: memref<3x40x256xbf16, #tpu.memory_space<vmem>>, %arg7: memref<3x256x8xbf16, #tpu.memory_space<vmem>>, %arg8: memref<3x1x256xf32, #tpu.memory_space<vmem>>, %arg9: memref<3x16x256xf32, #tpu.memory_space<vmem>>, %arg10: memref<3x1x256xf32, #tpu.memory_space<vmem>>, %arg11: memref<3x128x256xbf16, #tpu.memory_space<vmem>>, %arg12: memref<128x128xbf16, #tpu.memory_space<vmem>>, %arg13: memref<1x128xf32, #tpu.memory_space<vmem>>, %arg14: memref<8x128xf32, #tpu.memory_space<vmem>>, %arg15: memref<8x256xf32, #tpu.memory_space<vmem>>) attributes {dimension_semantics = [#tpu.dimension_semantics<parallel>], iteration_bounds = array<i64: 2>, scalar_prefetch = 0 : i64, scratch_operands = 1 : i64, tpu.core_type = #tpu.core_type<tc>, window_params = [{transform_indices = @transform_0, window_bounds = array<i64: 8, 128>}, {pipeline_mode = #tpu.pipeline_mode<synchronous>, transform_indices = @transform_1, window_bounds = array<i64: 3, 1, 128>}, {pipeline_mode = #tpu.pipeline_mode<synchronous>, transform_indices = @transform_2, window_bounds = array<i64: 3, 512, 128>}, {pipeline_mode = #tpu.pipeline_mode<synchronous>, transform_indices = @transform_3, window_bounds = array<i64: 3, 4, 256>}, {pipeline_mode = #tpu.pipeline_mode<synchronous>, transform_indices = @transform_4, window_bounds = array<i64: 3, 1, 256>}, {pipeline_mode = #tpu.pipeline_mode<synchronous>, transform_indices = @transform_5, window_bounds = array<i64: 3, 40, 256>}, {pipeline_mode = #tpu.pipeline_mode<synchronous>, transform_indices = @transform_6, window_bounds = array<i64: 3, 256, 8>}, {pipeline_mode = #tpu.pipeline_mode<synchronous>, transform_indices = @transform_7, window_bounds = array<i64: 3, 1, 256>}, {pipeline_mode = #tpu.pipeline_mode<synchronous>, transform_indices = @transform_8, window_bounds = array<i64: 3, 16, 256>}, {pipeline_mode = #tpu.pipeline_mode<synchronous>, transform_indices = @transform_9, window_bounds = array<i64: 3, 1, 256>}, {pipeline_mode = #tpu.pipeline_mode<synchronous>, transform_indices = @transform_10, window_bounds = array<i64: 3, 128, 256>}, {pipeline_mode = #tpu.pipeline_mode<synchronous>, transform_indices = @transform_11, window_bounds = array<i64: 128, 128>}, {pipeline_mode = #tpu.pipeline_mode<synchronous>, transform_indices = @transform_12, window_bounds = array<i64: 1, 128>}, {transform_indices = @transform_13, window_bounds = array<i64: 8, 128>}]} {
    %c0 = arith.constant 0 : index
    %c0_0 = arith.constant 0 : index
    %0 = vector.load %arg1[%c0, %c0_0] : memref<8x128xf32, #tpu.memory_space<vmem>>, vector<8x128xf32>
    %1 = arith.mulf %0, %0 : vector<8x128xf32>
    %cst = arith.constant dense<0.000000e+00> : vector<8xf32>
    %2 = vector.multi_reduction <add>, %1, %cst [1] : vector<8x128xf32> to vector<8xf32>
    %3 = vector.shape_cast %2 : vector<8xf32> to vector<8x1xf32>
    %cst_1 = arith.constant 1.280000e+02 : f32
    %4 = vector.broadcast %cst_1 : f32 to vector<8x1xf32>
    %5 = arith.divf %3, %4 : vector<8x1xf32>
    %cst_2 = arith.constant 9.99999974E-6 : f32
    %6 = vector.broadcast %cst_2 : f32 to vector<8x1xf32>
    %7 = arith.addf %5, %6 : vector<8x1xf32>
    %8 = math.rsqrt %7 : vector<8x1xf32>
    %9 = vector.broadcast %8 : vector<8x1xf32> to vector<8x128xf32>
    %10 = arith.mulf %0, %9 : vector<8x128xf32>
    %c0_3 = arith.constant 0 : index
    %c0_4 = arith.constant 0 : index
    %c0_5 = arith.constant 0 : index
    %11 = vector.load %arg2[%c0_3, %c0_4, %c0_5] : memref<3x1x128xf32, #tpu.memory_space<vmem>>, vector<1x1x128xf32>
    %12 = vector.shape_cast %11 : vector<1x1x128xf32> to vector<1x128xf32>
    %13 = vector.broadcast %12 : vector<1x128xf32> to vector<8x128xf32>
    %14 = arith.mulf %10, %13 : vector<8x128xf32>
    %15 = arith.truncf %14 : vector<8x128xf32> to vector<8x128xbf16>
    %c0_6 = arith.constant 0 : index
    %c0_7 = arith.constant 0 : index
    %c0_8 = arith.constant 0 : index
    %16 = vector.load %arg3[%c0_6, %c0_7, %c0_8] : memref<3x512x128xbf16, #tpu.memory_space<vmem>>, vector<1x512x128xbf16>
    %17 = vector.shape_cast %16 : vector<1x512x128xbf16> to vector<512x128xbf16>
    %cst_9 = arith.constant dense<0.000000e+00> : vector<8x512xf32>
    %18 = tpu.matmul %15, %17, %cst_9 {dimension_numbers = #tpu.dot_dimension_numbers<[1], [1], [0], [0], [0, 0, 1, 0], [], []>} : vector<8x128xbf16>, vector<512x128xbf16>, vector<8x512xf32> -> vector<8x512xf32>
    %19 = vector.extract_strided_slice %18 {offsets = [0, 0], sizes = [8, 256], strides = [1, 1]} : vector<8x512xf32> to vector<8x256xf32>
    %20 = vector.extract_strided_slice %18 {offsets = [0, 256], sizes = [8, 256], strides = [1, 1]} : vector<8x512xf32> to vector<8x256xf32>
    %c0_10 = arith.constant 0 : index
    %c0_11 = arith.constant 0 : index
    %c0_12 = arith.constant 0 : index
    %21 = vector.load %arg4[%c0_10, %c0_11, %c0_12] : memref<3x4x256xf32, #tpu.memory_space<vmem>>, vector<1x4x256xf32>
    %22 = vector.shape_cast %21 : vector<1x4x256xf32> to vector<4x256xf32>
    %23 = vector.extract_strided_slice %22 {offsets = [3, 0], sizes = [1, 256], strides = [1, 1]} : vector<4x256xf32> to vector<1x256xf32>
    %24 = vector.broadcast %23 : vector<1x256xf32> to vector<8x256xf32>
    %25 = arith.mulf %19, %24 : vector<8x256xf32>
    %c0_13 = arith.constant 0 : index
    %c0_14 = arith.constant 0 : index
    %c0_15 = arith.constant 0 : index
    %26 = vector.load %arg5[%c0_13, %c0_14, %c0_15] : memref<3x1x256xf32, #tpu.memory_space<vmem>>, vector<1x1x256xf32>
    %27 = vector.shape_cast %26 : vector<1x1x256xf32> to vector<1x256xf32>
    %28 = vector.broadcast %27 : vector<1x256xf32> to vector<8x256xf32>
    %29 = arith.addf %25, %28 : vector<8x256xf32>
    %cst_16 = arith.constant 0.000000e+00 : f32
    %30 = vector.broadcast %cst_16 : f32 to vector<1x256xf32>
    %31 = vector.extract_strided_slice %19 {offsets = [0, 0], sizes = [7, 256], strides = [1, 1]} : vector<8x256xf32> to vector<7x256xf32>
    %32 = tpu.concatenate %30, %31 in 0 : vector<1x256xf32>, vector<7x256xf32> -> vector<8x256xf32>
    %33 = vector.extract_strided_slice %22 {offsets = [2, 0], sizes = [1, 256], strides = [1, 1]} : vector<4x256xf32> to vector<1x256xf32>
    %34 = vector.broadcast %33 : vector<1x256xf32> to vector<8x256xf32>
    %35 = arith.mulf %32, %34 : vector<8x256xf32>
    %36 = arith.addf %29, %35 : vector<8x256xf32>
    %cst_17 = arith.constant 0.000000e+00 : f32
    %37 = vector.broadcast %cst_17 : f32 to vector<2x256xf32>
    %38 = vector.extract_strided_slice %19 {offsets = [0, 0], sizes = [6, 256], strides = [1, 1]} : vector<8x256xf32> to vector<6x256xf32>
    %39 = tpu.concatenate %37, %38 in 0 : vector<2x256xf32>, vector<6x256xf32> -> vector<8x256xf32>
    %40 = vector.extract_strided_slice %22 {offsets = [1, 0], sizes = [1, 256], strides = [1, 1]} : vector<4x256xf32> to vector<1x256xf32>
    %41 = vector.broadcast %40 : vector<1x256xf32> to vector<8x256xf32>
    %42 = arith.mulf %39, %41 : vector<8x256xf32>
    %43 = arith.addf %36, %42 : vector<8x256xf32>
    %cst_18 = arith.constant 0.000000e+00 : f32
    %44 = vector.broadcast %cst_18 : f32 to vector<3x256xf32>
    %45 = vector.extract_strided_slice %19 {offsets = [0, 0], sizes = [5, 256], strides = [1, 1]} : vector<8x256xf32> to vector<5x256xf32>
    %46 = tpu.concatenate %44, %45 in 0 : vector<3x256xf32>, vector<5x256xf32> -> vector<8x256xf32>
    %47 = vector.extract_strided_slice %22 {offsets = [0, 0], sizes = [1, 256], strides = [1, 1]} : vector<4x256xf32> to vector<1x256xf32>
    %48 = vector.broadcast %47 : vector<1x256xf32> to vector<8x256xf32>
    %49 = arith.mulf %46, %48 : vector<8x256xf32>
    %50 = arith.addf %43, %49 : vector<8x256xf32>
    %cst_19 = arith.constant 0.000000e+00 : f32
    %51 = vector.broadcast %cst_19 : f32 to vector<8x256xf32>
    %52 = arith.subf %51, %50 : vector<8x256xf32>
    %53 = math.exp %52 : vector<8x256xf32>
    %cst_20 = arith.constant 1.000000e+00 : f32
    %54 = vector.broadcast %cst_20 : f32 to vector<8x256xf32>
    %55 = arith.addf %54, %53 : vector<8x256xf32>
    %cst_21 = arith.constant 1.000000e+00 : f32
    %56 = vector.broadcast %cst_21 : f32 to vector<8x256xf32>
    %57 = arith.divf %56, %55 : vector<8x256xf32>
    %58 = arith.mulf %50, %57 : vector<8x256xf32>
    %59 = arith.truncf %58 : vector<8x256xf32> to vector<8x256xbf16>
    %c0_22 = arith.constant 0 : index
    %c0_23 = arith.constant 0 : index
    %c0_24 = arith.constant 0 : index
    %60 = vector.load %arg6[%c0_22, %c0_23, %c0_24] : memref<3x40x256xbf16, #tpu.memory_space<vmem>>, vector<1x40x256xbf16>
    %61 = vector.shape_cast %60 : vector<1x40x256xbf16> to vector<40x256xbf16>
    %62 = vector.extract_strided_slice %61 {offsets = [0, 0], sizes = [8, 256], strides = [1, 1]} : vector<40x256xbf16> to vector<8x256xbf16>
    %cst_25 = arith.constant dense<0.000000e+00> : vector<8x8xf32>
    %63 = tpu.matmul %59, %62, %cst_25 {dimension_numbers = #tpu.dot_dimension_numbers<[1], [1], [0], [0], [0, 0, 1, 0], [], []>} : vector<8x256xbf16>, vector<8x256xbf16>, vector<8x8xf32> -> vector<8x8xf32>
    %64 = vector.extract_strided_slice %61 {offsets = [8, 0], sizes = [32, 256], strides = [1, 1]} : vector<40x256xbf16> to vector<32x256xbf16>
    %cst_26 = arith.constant dense<0.000000e+00> : vector<32x8xf32>
    %65 = tpu.matmul %64, %59, %cst_26 {dimension_numbers = #tpu.dot_dimension_numbers<[1], [1], [0], [0], [0, 0, 1, 0], [], []>} : vector<32x256xbf16>, vector<8x256xbf16>, vector<32x8xf32> -> vector<32x8xf32>
    %66 = vector.extract_strided_slice %65 {offsets = [0, 0], sizes = [16, 8], strides = [1, 1]} : vector<32x8xf32> to vector<16x8xf32>
    %67 = vector.extract_strided_slice %65 {offsets = [16, 0], sizes = [16, 8], strides = [1, 1]} : vector<32x8xf32> to vector<16x8xf32>
    %68 = arith.truncf %63 : vector<8x8xf32> to vector<8x8xbf16>
    %c0_27 = arith.constant 0 : index
    %c0_28 = arith.constant 0 : index
    %c0_29 = arith.constant 0 : index
    %69 = vector.load %arg7[%c0_27, %c0_28, %c0_29] : memref<3x256x8xbf16, #tpu.memory_space<vmem>>, vector<1x256x8xbf16>
    %70 = vector.shape_cast %69 : vector<1x256x8xbf16> to vector<256x8xbf16>
    %cst_30 = arith.constant dense<0.000000e+00> : vector<8x256xf32>
    %71 = tpu.matmul %68, %70, %cst_30 {dimension_numbers = #tpu.dot_dimension_numbers<[1], [1], [0], [0], [0, 0, 1, 0], [], []>} : vector<8x8xbf16>, vector<256x8xbf16>, vector<8x256xf32> -> vector<8x256xf32>
    %c0_31 = arith.constant 0 : index
    %c0_32 = arith.constant 0 : index
    %c0_33 = arith.constant 0 : index
    %72 = vector.load %arg8[%c0_31, %c0_32, %c0_33] : memref<3x1x256xf32, #tpu.memory_space<vmem>>, vector<1x1x256xf32>
    %73 = vector.shape_cast %72 : vector<1x1x256xf32> to vector<1x256xf32>
    %74 = vector.broadcast %73 : vector<1x256xf32> to vector<8x256xf32>
    %75 = arith.addf %71, %74 : vector<8x256xf32>
    %76 = math.absf %75 : vector<8x256xf32>
    %cst_34 = arith.constant 0.000000e+00 : f32
    %77 = vector.broadcast %cst_34 : f32 to vector<8x256xf32>
    %78 = arith.subf %77, %76 : vector<8x256xf32>
    %79 = math.exp %78 : vector<8x256xf32>
    %80 = math.log1p %79 : vector<8x256xf32>
    %cst_35 = arith.constant 0.000000e+00 : f32
    %81 = vector.broadcast %cst_35 : f32 to vector<8x256xf32>
    %82 = arith.maximumf %75, %81 : vector<8x256xf32>
    %83 = arith.addf %80, %82 : vector<8x256xf32>
    %84 = arith.mulf %83, %58 : vector<8x256xf32>
    %c0_36 = arith.constant 0 : index
    %c0_37 = arith.constant 0 : index
    %c0_38 = arith.constant 0 : index
    %85 = vector.load %arg9[%c0_36, %c0_37, %c0_38] : memref<3x16x256xf32, #tpu.memory_space<vmem>>, vector<1x16x256xf32>
    %86 = vector.shape_cast %85 : vector<1x16x256xf32> to vector<16x256xf32>
    %cst_39 = arith.constant 0.000000e+00 : f32
    %87 = vector.broadcast %cst_39 : f32 to vector<16x256xf32>
    %88 = vector.extract_strided_slice %83 {offsets = [0, 0], sizes = [1, 256], strides = [1, 1]} : vector<8x256xf32> to vector<1x256xf32>
    %89 = vector.shape_cast %88 : vector<1x256xf32> to vector<1x256xf32>
    %90 = vector.broadcast %89 : vector<1x256xf32> to vector<16x256xf32>
    %91 = arith.mulf %90, %86 : vector<16x256xf32>
    %92 = math.exp %91 : vector<16x256xf32>
    %93 = vector.extract_strided_slice %84 {offsets = [0, 0], sizes = [1, 256], strides = [1, 1]} : vector<8x256xf32> to vector<1x256xf32>
    %94 = vector.shape_cast %93 : vector<1x256xf32> to vector<1x256xf32>
    %95 = vector.broadcast %94 : vector<1x256xf32> to vector<16x256xf32>
    %96 = arith.mulf %92, %87 : vector<16x256xf32>
    %97 = vector.extract_strided_slice %66 {offsets = [0, 0], sizes = [16, 1], strides = [1, 1]} : vector<16x8xf32> to vector<16x1xf32>
    %98 = vector.broadcast %97 : vector<16x1xf32> to vector<16x256xf32>
    %99 = arith.mulf %98, %95 : vector<16x256xf32>
    %100 = arith.addf %96, %99 : vector<16x256xf32>
    %101 = vector.extract_strided_slice %67 {offsets = [0, 0], sizes = [16, 1], strides = [1, 1]} : vector<16x8xf32> to vector<16x1xf32>
    %102 = vector.broadcast %101 : vector<16x1xf32> to vector<16x256xf32>
    %103 = arith.mulf %102, %100 : vector<16x256xf32>
    %cst_40 = arith.constant dense<0.000000e+00> : vector<256xf32>
    %104 = vector.multi_reduction <add>, %103, %cst_40 [0] : vector<16x256xf32> to vector<256xf32>
    %105 = vector.shape_cast %104 : vector<256xf32> to vector<1x256xf32>
    %c0_41 = arith.constant 0 : index
    %c0_42 = arith.constant 0 : index
    %106 = vector.load %arg15[%c0_41, %c0_42] : memref<8x256xf32, #tpu.memory_space<vmem>>, vector<1x256xf32>
    tpu.vector_store %arg15[%c0_41, %c0_42], %105 {strides = array<i32>} : memref<8x256xf32, #tpu.memory_space<vmem>>, vector<1x256xf32>,
    %107 = vector.extract_strided_slice %83 {offsets = [1, 0], sizes = [1, 256], strides = [1, 1]} : vector<8x256xf32> to vector<1x256xf32>
    %108 = vector.shape_cast %107 : vector<1x256xf32> to vector<1x256xf32>
    %109 = vector.broadcast %108 : vector<1x256xf32> to vector<16x256xf32>
    %110 = arith.mulf %109, %86 : vector<16x256xf32>
    %111 = math.exp %110 : vector<16x256xf32>
    %112 = vector.extract_strided_slice %84 {offsets = [1, 0], sizes = [1, 256], strides = [1, 1]} : vector<8x256xf32> to vector<1x256xf32>
    %113 = vector.shape_cast %112 : vector<1x256xf32> to vector<1x256xf32>
    %114 = vector.broadcast %113 : vector<1x256xf32> to vector<16x256xf32>
    %115 = arith.mulf %111, %100 : vector<16x256xf32>
    %116 = vector.extract_strided_slice %66 {offsets = [0, 1], sizes = [16, 1], strides = [1, 1]} : vector<16x8xf32> to vector<16x1xf32>
    %117 = vector.broadcast %116 : vector<16x1xf32> to vector<16x256xf32>
    %118 = arith.mulf %117, %114 : vector<16x256xf32>
    %119 = arith.addf %115, %118 : vector<16x256xf32>
    %120 = vector.extract_strided_slice %67 {offsets = [0, 1], sizes = [16, 1], strides = [1, 1]} : vector<16x8xf32> to vector<16x1xf32>
    %121 = vector.broadcast %120 : vector<16x1xf32> to vector<16x256xf32>
    %122 = arith.mulf %121, %119 : vector<16x256xf32>
    %cst_43 = arith.constant dense<0.000000e+00> : vector<256xf32>
    %123 = vector.multi_reduction <add>, %122, %cst_43 [0] : vector<16x256xf32> to vector<256xf32>
    %124 = vector.shape_cast %123 : vector<256xf32> to vector<1x256xf32>
    %c1 = arith.constant 1 : index
    %c0_44 = arith.constant 0 : index
    %125 = vector.load %arg15[%c1, %c0_44] : memref<8x256xf32, #tpu.memory_space<vmem>>, vector<1x256xf32>
    tpu.vector_store %arg15[%c1, %c0_44], %124 {strides = array<i32>} : memref<8x256xf32, #tpu.memory_space<vmem>>, vector<1x256xf32>,
    %126 = vector.extract_strided_slice %83 {offsets = [2, 0], sizes = [1, 256], strides = [1, 1]} : vector<8x256xf32> to vector<1x256xf32>
    %127 = vector.shape_cast %126 : vector<1x256xf32> to vector<1x256xf32>
    %128 = vector.broadcast %127 : vector<1x256xf32> to vector<16x256xf32>
    %129 = arith.mulf %128, %86 : vector<16x256xf32>
    %130 = math.exp %129 : vector<16x256xf32>
    %131 = vector.extract_strided_slice %84 {offsets = [2, 0], sizes = [1, 256], strides = [1, 1]} : vector<8x256xf32> to vector<1x256xf32>
    %132 = vector.shape_cast %131 : vector<1x256xf32> to vector<1x256xf32>
    %133 = vector.broadcast %132 : vector<1x256xf32> to vector<16x256xf32>
    %134 = arith.mulf %130, %119 : vector<16x256xf32>
    %135 = vector.extract_strided_slice %66 {offsets = [0, 2], sizes = [16, 1], strides = [1, 1]} : vector<16x8xf32> to vector<16x1xf32>
    %136 = vector.broadcast %135 : vector<16x1xf32> to vector<16x256xf32>
    %137 = arith.mulf %136, %133 : vector<16x256xf32>
    %138 = arith.addf %134, %137 : vector<16x256xf32>
    %139 = vector.extract_strided_slice %67 {offsets = [0, 2], sizes = [16, 1], strides = [1, 1]} : vector<16x8xf32> to vector<16x1xf32>
    %140 = vector.broadcast %139 : vector<16x1xf32> to vector<16x256xf32>
    %141 = arith.mulf %140, %138 : vector<16x256xf32>
    %cst_45 = arith.constant dense<0.000000e+00> : vector<256xf32>
    %142 = vector.multi_reduction <add>, %141, %cst_45 [0] : vector<16x256xf32> to vector<256xf32>
    %143 = vector.shape_cast %142 : vector<256xf32> to vector<1x256xf32>
    %c2 = arith.constant 2 : index
    %c0_46 = arith.constant 0 : index
    %144 = vector.load %arg15[%c2, %c0_46] : memref<8x256xf32, #tpu.memory_space<vmem>>, vector<1x256xf32>
    tpu.vector_store %arg15[%c2, %c0_46], %143 {strides = array<i32>} : memref<8x256xf32, #tpu.memory_space<vmem>>, vector<1x256xf32>,
    %145 = vector.extract_strided_slice %83 {offsets = [3, 0], sizes = [1, 256], strides = [1, 1]} : vector<8x256xf32> to vector<1x256xf32>
    %146 = vector.shape_cast %145 : vector<1x256xf32> to vector<1x256xf32>
    %147 = vector.broadcast %146 : vector<1x256xf32> to vector<16x256xf32>
    %148 = arith.mulf %147, %86 : vector<16x256xf32>
    %149 = math.exp %148 : vector<16x256xf32>
    %150 = vector.extract_strided_slice %84 {offsets = [3, 0], sizes = [1, 256], strides = [1, 1]} : vector<8x256xf32> to vector<1x256xf32>
    %151 = vector.shape_cast %150 : vector<1x256xf32> to vector<1x256xf32>
    %152 = vector.broadcast %151 : vector<1x256xf32> to vector<16x256xf32>
    %153 = arith.mulf %149, %138 : vector<16x256xf32>
    %154 = vector.extract_strided_slice %66 {offsets = [0, 3], sizes = [16, 1], strides = [1, 1]} : vector<16x8xf32> to vector<16x1xf32>
    %155 = vector.broadcast %154 : vector<16x1xf32> to vector<16x256xf32>
    %156 = arith.mulf %155, %152 : vector<16x256xf32>
    %157 = arith.addf %153, %156 : vector<16x256xf32>
    %158 = vector.extract_strided_slice %67 {offsets = [0, 3], sizes = [16, 1], strides = [1, 1]} : vector<16x8xf32> to vector<16x1xf32>
    %159 = vector.broadcast %158 : vector<16x1xf32> to vector<16x256xf32>
    %160 = arith.mulf %159, %157 : vector<16x256xf32>
    %cst_47 = arith.constant dense<0.000000e+00> : vector<256xf32>
    %161 = vector.multi_reduction <add>, %160, %cst_47 [0] : vector<16x256xf32> to vector<256xf32>
    %162 = vector.shape_cast %161 : vector<256xf32> to vector<1x256xf32>
    %c3 = arith.constant 3 : index
    %c0_48 = arith.constant 0 : index
    %163 = vector.load %arg15[%c3, %c0_48] : memref<8x256xf32, #tpu.memory_space<vmem>>, vector<1x256xf32>
    tpu.vector_store %arg15[%c3, %c0_48], %162 {strides = array<i32>} : memref<8x256xf32, #tpu.memory_space<vmem>>, vector<1x256xf32>,
    %164 = vector.extract_strided_slice %83 {offsets = [4, 0], sizes = [1, 256], strides = [1, 1]} : vector<8x256xf32> to vector<1x256xf32>
    %165 = vector.shape_cast %164 : vector<1x256xf32> to vector<1x256xf32>
    %166 = vector.broadcast %165 : vector<1x256xf32> to vector<16x256xf32>
    %167 = arith.mulf %166, %86 : vector<16x256xf32>
    %168 = math.exp %167 : vector<16x256xf32>
    %169 = vector.extract_strided_slice %84 {offsets = [4, 0], sizes = [1, 256], strides = [1, 1]} : vector<8x256xf32> to vector<1x256xf32>
    %170 = vector.shape_cast %169 : vector<1x256xf32> to vector<1x256xf32>
    %171 = vector.broadcast %170 : vector<1x256xf32> to vector<16x256xf32>
    %172 = arith.mulf %168, %157 : vector<16x256xf32>
    %173 = vector.extract_strided_slice %66 {offsets = [0, 4], sizes = [16, 1], strides = [1, 1]} : vector<16x8xf32> to vector<16x1xf32>
    %174 = vector.broadcast %173 : vector<16x1xf32> to vector<16x256xf32>
    %175 = arith.mulf %174, %171 : vector<16x256xf32>
    %176 = arith.addf %172, %175 : vector<16x256xf32>
    %177 = vector.extract_strided_slice %67 {offsets = [0, 4], sizes = [16, 1], strides = [1, 1]} : vector<16x8xf32> to vector<16x1xf32>
    %178 = vector.broadcast %177 : vector<16x1xf32> to vector<16x256xf32>
    %179 = arith.mulf %178, %176 : vector<16x256xf32>
    %cst_49 = arith.constant dense<0.000000e+00> : vector<256xf32>
    %180 = vector.multi_reduction <add>, %179, %cst_49 [0] : vector<16x256xf32> to vector<256xf32>
    %181 = vector.shape_cast %180 : vector<256xf32> to vector<1x256xf32>
    %c4 = arith.constant 4 : index
    %c0_50 = arith.constant 0 : index
    %182 = vector.load %arg15[%c4, %c0_50] : memref<8x256xf32, #tpu.memory_space<vmem>>, vector<1x256xf32>
    tpu.vector_store %arg15[%c4, %c0_50], %181 {strides = array<i32>} : memref<8x256xf32, #tpu.memory_space<vmem>>, vector<1x256xf32>,
    %183 = vector.extract_strided_slice %83 {offsets = [5, 0], sizes = [1, 256], strides = [1, 1]} : vector<8x256xf32> to vector<1x256xf32>
    %184 = vector.shape_cast %183 : vector<1x256xf32> to vector<1x256xf32>
    %185 = vector.broadcast %184 : vector<1x256xf32> to vector<16x256xf32>
    %186 = arith.mulf %185, %86 : vector<16x256xf32>
    %187 = math.exp %186 : vector<16x256xf32>
    %188 = vector.extract_strided_slice %84 {offsets = [5, 0], sizes = [1, 256], strides = [1, 1]} : vector<8x256xf32> to vector<1x256xf32>
    %189 = vector.shape_cast %188 : vector<1x256xf32> to vector<1x256xf32>
    %190 = vector.broadcast %189 : vector<1x256xf32> to vector<16x256xf32>
    %191 = arith.mulf %187, %176 : vector<16x256xf32>
    %192 = vector.extract_strided_slice %66 {offsets = [0, 5], sizes = [16, 1], strides = [1, 1]} : vector<16x8xf32> to vector<16x1xf32>
    %193 = vector.broadcast %192 : vector<16x1xf32> to vector<16x256xf32>
    %194 = arith.mulf %193, %190 : vector<16x256xf32>
    %195 = arith.addf %191, %194 : vector<16x256xf32>
    %196 = vector.extract_strided_slice %67 {offsets = [0, 5], sizes = [16, 1], strides = [1, 1]} : vector<16x8xf32> to vector<16x1xf32>
    %197 = vector.broadcast %196 : vector<16x1xf32> to vector<16x256xf32>
    %198 = arith.mulf %197, %195 : vector<16x256xf32>
    %cst_51 = arith.constant dense<0.000000e+00> : vector<256xf32>
    %199 = vector.multi_reduction <add>, %198, %cst_51 [0] : vector<16x256xf32> to vector<256xf32>
    %200 = vector.shape_cast %199 : vector<256xf32> to vector<1x256xf32>
    %c5 = arith.constant 5 : index
    %c0_52 = arith.constant 0 : index
    %201 = vector.load %arg15[%c5, %c0_52] : memref<8x256xf32, #tpu.memory_space<vmem>>, vector<1x256xf32>
    tpu.vector_store %arg15[%c5, %c0_52], %200 {strides = array<i32>} : memref<8x256xf32, #tpu.memory_space<vmem>>, vector<1x256xf32>,
    %202 = vector.extract_strided_slice %83 {offsets = [6, 0], sizes = [1, 256], strides = [1, 1]} : vector<8x256xf32> to vector<1x256xf32>
    %203 = vector.shape_cast %202 : vector<1x256xf32> to vector<1x256xf32>
    %204 = vector.broadcast %203 : vector<1x256xf32> to vector<16x256xf32>
    %205 = arith.mulf %204, %86 : vector<16x256xf32>
    %206 = math.exp %205 : vector<16x256xf32>
    %207 = vector.extract_strided_slice %84 {offsets = [6, 0], sizes = [1, 256], strides = [1, 1]} : vector<8x256xf32> to vector<1x256xf32>
    %208 = vector.shape_cast %207 : vector<1x256xf32> to vector<1x256xf32>
    %209 = vector.broadcast %208 : vector<1x256xf32> to vector<16x256xf32>
    %210 = arith.mulf %206, %195 : vector<16x256xf32>
    %211 = vector.extract_strided_slice %66 {offsets = [0, 6], sizes = [16, 1], strides = [1, 1]} : vector<16x8xf32> to vector<16x1xf32>
    %212 = vector.broadcast %211 : vector<16x1xf32> to vector<16x256xf32>
    %213 = arith.mulf %212, %209 : vector<16x256xf32>
    %214 = arith.addf %210, %213 : vector<16x256xf32>
    %215 = vector.extract_strided_slice %67 {offsets = [0, 6], sizes = [16, 1], strides = [1, 1]} : vector<16x8xf32> to vector<16x1xf32>
    %216 = vector.broadcast %215 : vector<16x1xf32> to vector<16x256xf32>
    %217 = arith.mulf %216, %214 : vector<16x256xf32>
    %cst_53 = arith.constant dense<0.000000e+00> : vector<256xf32>
    %218 = vector.multi_reduction <add>, %217, %cst_53 [0] : vector<16x256xf32> to vector<256xf32>
    %219 = vector.shape_cast %218 : vector<256xf32> to vector<1x256xf32>
    %c6 = arith.constant 6 : index
    %c0_54 = arith.constant 0 : index
    %220 = vector.load %arg15[%c6, %c0_54] : memref<8x256xf32, #tpu.memory_space<vmem>>, vector<1x256xf32>
    tpu.vector_store %arg15[%c6, %c0_54], %219 {strides = array<i32>} : memref<8x256xf32, #tpu.memory_space<vmem>>, vector<1x256xf32>,
    %221 = vector.extract_strided_slice %83 {offsets = [7, 0], sizes = [1, 256], strides = [1, 1]} : vector<8x256xf32> to vector<1x256xf32>
    %222 = vector.shape_cast %221 : vector<1x256xf32> to vector<1x256xf32>
    %223 = vector.broadcast %222 : vector<1x256xf32> to vector<16x256xf32>
    %224 = arith.mulf %223, %86 : vector<16x256xf32>
    %225 = math.exp %224 : vector<16x256xf32>
    %226 = vector.extract_strided_slice %84 {offsets = [7, 0], sizes = [1, 256], strides = [1, 1]} : vector<8x256xf32> to vector<1x256xf32>
    %227 = vector.shape_cast %226 : vector<1x256xf32> to vector<1x256xf32>
    %228 = vector.broadcast %227 : vector<1x256xf32> to vector<16x256xf32>
    %229 = arith.mulf %225, %214 : vector<16x256xf32>
    %230 = vector.extract_strided_slice %66 {offsets = [0, 7], sizes = [16, 1], strides = [1, 1]} : vector<16x8xf32> to vector<16x1xf32>
    %231 = vector.broadcast %230 : vector<16x1xf32> to vector<16x256xf32>
    %232 = arith.mulf %231, %228 : vector<16x256xf32>
    %233 = arith.addf %229, %232 : vector<16x256xf32>
    %234 = vector.extract_strided_slice %67 {offsets = [0, 7], sizes = [16, 1], strides = [1, 1]} : vector<16x8xf32> to vector<16x1xf32>
    %235 = vector.broadcast %234 : vector<16x1xf32> to vector<16x256xf32>
    %236 = arith.mulf %235, %233 : vector<16x256xf32>
    %cst_55 = arith.constant dense<0.000000e+00> : vector<256xf32>
    %237 = vector.multi_reduction <add>, %236, %cst_55 [0] : vector<16x256xf32> to vector<256xf32>
    %238 = vector.shape_cast %237 : vector<256xf32> to vector<1x256xf32>
    %c7 = arith.constant 7 : index
    %c0_56 = arith.constant 0 : index
    %239 = vector.load %arg15[%c7, %c0_56] : memref<8x256xf32, #tpu.memory_space<vmem>>, vector<1x256xf32>
    tpu.vector_store %arg15[%c7, %c0_56], %238 {strides = array<i32>} : memref<8x256xf32, #tpu.memory_space<vmem>>, vector<1x256xf32>,
    %c0_57 = arith.constant 0 : index
    %c0_58 = arith.constant 0 : index
    %240 = vector.load %arg15[%c0_57, %c0_58] : memref<8x256xf32, #tpu.memory_space<vmem>>, vector<8x256xf32>
    %c0_59 = arith.constant 0 : index
    %c0_60 = arith.constant 0 : index
    %c0_61 = arith.constant 0 : index
    %241 = vector.load %arg10[%c0_59, %c0_60, %c0_61] : memref<3x1x256xf32, #tpu.memory_space<vmem>>, vector<1x1x256xf32>
    %242 = vector.shape_cast %241 : vector<1x1x256xf32> to vector<1x256xf32>
    %243 = vector.broadcast %242 : vector<1x256xf32> to vector<8x256xf32>
    %244 = arith.mulf %243, %58 : vector<8x256xf32>
    %245 = arith.addf %240, %244 : vector<8x256xf32>
    %cst_62 = arith.constant 0.000000e+00 : f32
    %246 = vector.broadcast %cst_62 : f32 to vector<8x256xf32>
    %247 = arith.subf %246, %20 : vector<8x256xf32>
    %248 = math.exp %247 : vector<8x256xf32>
    %cst_63 = arith.constant 1.000000e+00 : f32
    %249 = vector.broadcast %cst_63 : f32 to vector<8x256xf32>
    %250 = arith.addf %249, %248 : vector<8x256xf32>
    %cst_64 = arith.constant 1.000000e+00 : f32
    %251 = vector.broadcast %cst_64 : f32 to vector<8x256xf32>
    %252 = arith.divf %251, %250 : vector<8x256xf32>
    %253 = arith.mulf %20, %252 : vector<8x256xf32>
    %254 = arith.mulf %245, %253 : vector<8x256xf32>
    %255 = arith.truncf %254 : vector<8x256xf32> to vector<8x256xbf16>
    %c0_65 = arith.constant 0 : index
    %c0_66 = arith.constant 0 : index
    %c0_67 = arith.constant 0 : index
    %256 = vector.load %arg11[%c0_65, %c0_66, %c0_67] : memref<3x128x256xbf16, #tpu.memory_space<vmem>>, vector<1x128x256xbf16>
    %257 = vector.shape_cast %256 : vector<1x128x256xbf16> to vector<128x256xbf16>
    %cst_68 = arith.constant dense<0.000000e+00> : vector<8x128xf32>
    %258 = tpu.matmul %255, %257, %cst_68 {dimension_numbers = #tpu.dot_dimension_numbers<[1], [1], [0], [0], [0, 0, 1, 0], [], []>} : vector<8x256xbf16>, vector<128x256xbf16>, vector<8x128xf32> -> vector<8x128xf32>
    %259 = arith.addf %0, %258 : vector<8x128xf32>
    %260 = arith.mulf %259, %259 : vector<8x128xf32>
    %cst_69 = arith.constant dense<0.000000e+00> : vector<8xf32>
    %261 = vector.multi_reduction <add>, %260, %cst_69 [1] : vector<8x128xf32> to vector<8xf32>
    %262 = vector.shape_cast %261 : vector<8xf32> to vector<8x1xf32>
    %cst_70 = arith.constant 1.280000e+02 : f32
    %263 = vector.broadcast %cst_70 : f32 to vector<8x1xf32>
    %264 = arith.divf %262, %263 : vector<8x1xf32>
    %cst_71 = arith.constant 9.99999974E-6 : f32
    %265 = vector.broadcast %cst_71 : f32 to vector<8x1xf32>
    %266 = arith.addf %264, %265 : vector<8x1xf32>
    %267 = math.rsqrt %266 : vector<8x1xf32>
    %268 = vector.broadcast %267 : vector<8x1xf32> to vector<8x128xf32>
    %269 = arith.mulf %259, %268 : vector<8x128xf32>
    %c1_72 = arith.constant 1 : index
    %c0_73 = arith.constant 0 : index
    %c0_74 = arith.constant 0 : index
    %270 = vector.load %arg2[%c1_72, %c0_73, %c0_74] : memref<3x1x128xf32, #tpu.memory_space<vmem>>, vector<1x1x128xf32>
    %271 = vector.shape_cast %270 : vector<1x1x128xf32> to vector<1x128xf32>
    %272 = vector.broadcast %271 : vector<1x128xf32> to vector<8x128xf32>
    %273 = arith.mulf %269, %272 : vector<8x128xf32>
    %274 = arith.truncf %273 : vector<8x128xf32> to vector<8x128xbf16>
    %c1_75 = arith.constant 1 : index
    %c0_76 = arith.constant 0 : index
    %c0_77 = arith.constant 0 : index
    %275 = vector.load %arg3[%c1_75, %c0_76, %c0_77] : memref<3x512x128xbf16, #tpu.memory_space<vmem>>, vector<1x512x128xbf16>
    %276 = vector.shape_cast %275 : vector<1x512x128xbf16> to vector<512x128xbf16>
    %cst_78 = arith.constant dense<0.000000e+00> : vector<8x512xf32>
    %277 = tpu.matmul %274, %276, %cst_78 {dimension_numbers = #tpu.dot_dimension_numbers<[1], [1], [0], [0], [0, 0, 1, 0], [], []>} : vector<8x128xbf16>, vector<512x128xbf16>, vector<8x512xf32> -> vector<8x512xf32>
    %278 = vector.extract_strided_slice %277 {offsets = [0, 0], sizes = [8, 256], strides = [1, 1]} : vector<8x512xf32> to vector<8x256xf32>
    %279 = vector.extract_strided_slice %277 {offsets = [0, 256], sizes = [8, 256], strides = [1, 1]} : vector<8x512xf32> to vector<8x256xf32>
    %c1_79 = arith.constant 1 : index
    %c0_80 = arith.constant 0 : index
    %c0_81 = arith.constant 0 : index
    %280 = vector.load %arg4[%c1_79, %c0_80, %c0_81] : memref<3x4x256xf32, #tpu.memory_space<vmem>>, vector<1x4x256xf32>
    %281 = vector.shape_cast %280 : vector<1x4x256xf32> to vector<4x256xf32>
    %282 = vector.extract_strided_slice %281 {offsets = [3, 0], sizes = [1, 256], strides = [1, 1]} : vector<4x256xf32> to vector<1x256xf32>
    %283 = vector.broadcast %282 : vector<1x256xf32> to vector<8x256xf32>
    %284 = arith.mulf %278, %283 : vector<8x256xf32>
    %c1_82 = arith.constant 1 : index
    %c0_83 = arith.constant 0 : index
    %c0_84 = arith.constant 0 : index
    %285 = vector.load %arg5[%c1_82, %c0_83, %c0_84] : memref<3x1x256xf32, #tpu.memory_space<vmem>>, vector<1x1x256xf32>
    %286 = vector.shape_cast %285 : vector<1x1x256xf32> to vector<1x256xf32>
    %287 = vector.broadcast %286 : vector<1x256xf32> to vector<8x256xf32>
    %288 = arith.addf %284, %287 : vector<8x256xf32>
    %cst_85 = arith.constant 0.000000e+00 : f32
    %289 = vector.broadcast %cst_85 : f32 to vector<1x256xf32>
    %290 = vector.extract_strided_slice %278 {offsets = [0, 0], sizes = [7, 256], strides = [1, 1]} : vector<8x256xf32> to vector<7x256xf32>
    %291 = tpu.concatenate %289, %290 in 0 : vector<1x256xf32>, vector<7x256xf32> -> vector<8x256xf32>
    %292 = vector.extract_strided_slice %281 {offsets = [2, 0], sizes = [1, 256], strides = [1, 1]} : vector<4x256xf32> to vector<1x256xf32>
    %293 = vector.broadcast %292 : vector<1x256xf32> to vector<8x256xf32>
    %294 = arith.mulf %291, %293 : vector<8x256xf32>
    %295 = arith.addf %288, %294 : vector<8x256xf32>
    %cst_86 = arith.constant 0.000000e+00 : f32
    %296 = vector.broadcast %cst_86 : f32 to vector<2x256xf32>
    %297 = vector.extract_strided_slice %278 {offsets = [0, 0], sizes = [6, 256], strides = [1, 1]} : vector<8x256xf32> to vector<6x256xf32>
    %298 = tpu.concatenate %296, %297 in 0 : vector<2x256xf32>, vector<6x256xf32> -> vector<8x256xf32>
    %299 = vector.extract_strided_slice %281 {offsets = [1, 0], sizes = [1, 256], strides = [1, 1]} : vector<4x256xf32> to vector<1x256xf32>
    %300 = vector.broadcast %299 : vector<1x256xf32> to vector<8x256xf32>
    %301 = arith.mulf %298, %300 : vector<8x256xf32>
    %302 = arith.addf %295, %301 : vector<8x256xf32>
    %cst_87 = arith.constant 0.000000e+00 : f32
    %303 = vector.broadcast %cst_87 : f32 to vector<3x256xf32>
    %304 = vector.extract_strided_slice %278 {offsets = [0, 0], sizes = [5, 256], strides = [1, 1]} : vector<8x256xf32> to vector<5x256xf32>
    %305 = tpu.concatenate %303, %304 in 0 : vector<3x256xf32>, vector<5x256xf32> -> vector<8x256xf32>
    %306 = vector.extract_strided_slice %281 {offsets = [0, 0], sizes = [1, 256], strides = [1, 1]} : vector<4x256xf32> to vector<1x256xf32>
    %307 = vector.broadcast %306 : vector<1x256xf32> to vector<8x256xf32>
    %308 = arith.mulf %305, %307 : vector<8x256xf32>
    %309 = arith.addf %302, %308 : vector<8x256xf32>
    %cst_88 = arith.constant 0.000000e+00 : f32
    %310 = vector.broadcast %cst_88 : f32 to vector<8x256xf32>
    %311 = arith.subf %310, %309 : vector<8x256xf32>
    %312 = math.exp %311 : vector<8x256xf32>
    %cst_89 = arith.constant 1.000000e+00 : f32
    %313 = vector.broadcast %cst_89 : f32 to vector<8x256xf32>
    %314 = arith.addf %313, %312 : vector<8x256xf32>
    %cst_90 = arith.constant 1.000000e+00 : f32
    %315 = vector.broadcast %cst_90 : f32 to vector<8x256xf32>
    %316 = arith.divf %315, %314 : vector<8x256xf32>
    %317 = arith.mulf %309, %316 : vector<8x256xf32>
    %318 = arith.truncf %317 : vector<8x256xf32> to vector<8x256xbf16>
    %c1_91 = arith.constant 1 : index
    %c0_92 = arith.constant 0 : index
    %c0_93 = arith.constant 0 : index
    %319 = vector.load %arg6[%c1_91, %c0_92, %c0_93] : memref<3x40x256xbf16, #tpu.memory_space<vmem>>, vector<1x40x256xbf16>
    %320 = vector.shape_cast %319 : vector<1x40x256xbf16> to vector<40x256xbf16>
    %321 = vector.extract_strided_slice %320 {offsets = [0, 0], sizes = [8, 256], strides = [1, 1]} : vector<40x256xbf16> to vector<8x256xbf16>
    %cst_94 = arith.constant dense<0.000000e+00> : vector<8x8xf32>
    %322 = tpu.matmul %318, %321, %cst_94 {dimension_numbers = #tpu.dot_dimension_numbers<[1], [1], [0], [0], [0, 0, 1, 0], [], []>} : vector<8x256xbf16>, vector<8x256xbf16>, vector<8x8xf32> -> vector<8x8xf32>
    %323 = vector.extract_strided_slice %320 {offsets = [8, 0], sizes = [32, 256], strides = [1, 1]} : vector<40x256xbf16> to vector<32x256xbf16>
    %cst_95 = arith.constant dense<0.000000e+00> : vector<32x8xf32>
    %324 = tpu.matmul %323, %318, %cst_95 {dimension_numbers = #tpu.dot_dimension_numbers<[1], [1], [0], [0], [0, 0, 1, 0], [], []>} : vector<32x256xbf16>, vector<8x256xbf16>, vector<32x8xf32> -> vector<32x8xf32>
    %325 = vector.extract_strided_slice %324 {offsets = [0, 0], sizes = [16, 8], strides = [1, 1]} : vector<32x8xf32> to vector<16x8xf32>
    %326 = vector.extract_strided_slice %324 {offsets = [16, 0], sizes = [16, 8], strides = [1, 1]} : vector<32x8xf32> to vector<16x8xf32>
    %327 = arith.truncf %322 : vector<8x8xf32> to vector<8x8xbf16>
    %c1_96 = arith.constant 1 : index
    %c0_97 = arith.constant 0 : index
    %c0_98 = arith.constant 0 : index
    %328 = vector.load %arg7[%c1_96, %c0_97, %c0_98] : memref<3x256x8xbf16, #tpu.memory_space<vmem>>, vector<1x256x8xbf16>
    %329 = vector.shape_cast %328 : vector<1x256x8xbf16> to vector<256x8xbf16>
    %cst_99 = arith.constant dense<0.000000e+00> : vector<8x256xf32>
    %330 = tpu.matmul %327, %329, %cst_99 {dimension_numbers = #tpu.dot_dimension_numbers<[1], [1], [0], [0], [0, 0, 1, 0], [], []>} : vector<8x8xbf16>, vector<256x8xbf16>, vector<8x256xf32> -> vector<8x256xf32>
    %c1_100 = arith.constant 1 : index
    %c0_101 = arith.constant 0 : index
    %c0_102 = arith.constant 0 : index
    %331 = vector.load %arg8[%c1_100, %c0_101, %c0_102] : memref<3x1x256xf32, #tpu.memory_space<vmem>>, vector<1x1x256xf32>
    %332 = vector.shape_cast %331 : vector<1x1x256xf32> to vector<1x256xf32>
    %333 = vector.broadcast %332 : vector<1x256xf32> to vector<8x256xf32>
    %334 = arith.addf %330, %333 : vector<8x256xf32>
    %335 = math.absf %334 : vector<8x256xf32>
    %cst_103 = arith.constant 0.000000e+00 : f32
    %336 = vector.broadcast %cst_103 : f32 to vector<8x256xf32>
    %337 = arith.subf %336, %335 : vector<8x256xf32>
    %338 = math.exp %337 : vector<8x256xf32>
    %339 = math.log1p %338 : vector<8x256xf32>
    %cst_104 = arith.constant 0.000000e+00 : f32
    %340 = vector.broadcast %cst_104 : f32 to vector<8x256xf32>
    %341 = arith.maximumf %334, %340 : vector<8x256xf32>
    %342 = arith.addf %339, %341 : vector<8x256xf32>
    %343 = arith.mulf %342, %317 : vector<8x256xf32>
    %c1_105 = arith.constant 1 : index
    %c0_106 = arith.constant 0 : index
    %c0_107 = arith.constant 0 : index
    %344 = vector.load %arg9[%c1_105, %c0_106, %c0_107] : memref<3x16x256xf32, #tpu.memory_space<vmem>>, vector<1x16x256xf32>
    %345 = vector.shape_cast %344 : vector<1x16x256xf32> to vector<16x256xf32>
    %cst_108 = arith.constant 0.000000e+00 : f32
    %346 = vector.broadcast %cst_108 : f32 to vector<16x256xf32>
    %347 = vector.extract_strided_slice %342 {offsets = [0, 0], sizes = [1, 256], strides = [1, 1]} : vector<8x256xf32> to vector<1x256xf32>
    %348 = vector.shape_cast %347 : vector<1x256xf32> to vector<1x256xf32>
    %349 = vector.broadcast %348 : vector<1x256xf32> to vector<16x256xf32>
    %350 = arith.mulf %349, %345 : vector<16x256xf32>
    %351 = math.exp %350 : vector<16x256xf32>
    %352 = vector.extract_strided_slice %343 {offsets = [0, 0], sizes = [1, 256], strides = [1, 1]} : vector<8x256xf32> to vector<1x256xf32>
    %353 = vector.shape_cast %352 : vector<1x256xf32> to vector<1x256xf32>
    %354 = vector.broadcast %353 : vector<1x256xf32> to vector<16x256xf32>
    %355 = arith.mulf %351, %346 : vector<16x256xf32>
    %356 = vector.extract_strided_slice %325 {offsets = [0, 0], sizes = [16, 1], strides = [1, 1]} : vector<16x8xf32> to vector<16x1xf32>
    %357 = vector.broadcast %356 : vector<16x1xf32> to vector<16x256xf32>
    %358 = arith.mulf %357, %354 : vector<16x256xf32>
    %359 = arith.addf %355, %358 : vector<16x256xf32>
    %360 = vector.extract_strided_slice %326 {offsets = [0, 0], sizes = [16, 1], strides = [1, 1]} : vector<16x8xf32> to vector<16x1xf32>
    %361 = vector.broadcast %360 : vector<16x1xf32> to vector<16x256xf32>
    %362 = arith.mulf %361, %359 : vector<16x256xf32>
    %cst_109 = arith.constant dense<0.000000e+00> : vector<256xf32>
    %363 = vector.multi_reduction <add>, %362, %cst_109 [0] : vector<16x256xf32> to vector<256xf32>
    %364 = vector.shape_cast %363 : vector<256xf32> to vector<1x256xf32>
    %c0_110 = arith.constant 0 : index
    %c0_111 = arith.constant 0 : index
    %365 = vector.load %arg15[%c0_110, %c0_111] : memref<8x256xf32, #tpu.memory_space<vmem>>, vector<1x256xf32>
    tpu.vector_store %arg15[%c0_110, %c0_111], %364 {strides = array<i32>} : memref<8x256xf32, #tpu.memory_space<vmem>>, vector<1x256xf32>,
    %366 = vector.extract_strided_slice %342 {offsets = [1, 0], sizes = [1, 256], strides = [1, 1]} : vector<8x256xf32> to vector<1x256xf32>
    %367 = vector.shape_cast %366 : vector<1x256xf32> to vector<1x256xf32>
    %368 = vector.broadcast %367 : vector<1x256xf32> to vector<16x256xf32>
    %369 = arith.mulf %368, %345 : vector<16x256xf32>
    %370 = math.exp %369 : vector<16x256xf32>
    %371 = vector.extract_strided_slice %343 {offsets = [1, 0], sizes = [1, 256], strides = [1, 1]} : vector<8x256xf32> to vector<1x256xf32>
    %372 = vector.shape_cast %371 : vector<1x256xf32> to vector<1x256xf32>
    %373 = vector.broadcast %372 : vector<1x256xf32> to vector<16x256xf32>
    %374 = arith.mulf %370, %359 : vector<16x256xf32>
    %375 = vector.extract_strided_slice %325 {offsets = [0, 1], sizes = [16, 1], strides = [1, 1]} : vector<16x8xf32> to vector<16x1xf32>
    %376 = vector.broadcast %375 : vector<16x1xf32> to vector<16x256xf32>
    %377 = arith.mulf %376, %373 : vector<16x256xf32>
    %378 = arith.addf %374, %377 : vector<16x256xf32>
    %379 = vector.extract_strided_slice %326 {offsets = [0, 1], sizes = [16, 1], strides = [1, 1]} : vector<16x8xf32> to vector<16x1xf32>
    %380 = vector.broadcast %379 : vector<16x1xf32> to vector<16x256xf32>
    %381 = arith.mulf %380, %378 : vector<16x256xf32>
    %cst_112 = arith.constant dense<0.000000e+00> : vector<256xf32>
    %382 = vector.multi_reduction <add>, %381, %cst_112 [0] : vector<16x256xf32> to vector<256xf32>
    %383 = vector.shape_cast %382 : vector<256xf32> to vector<1x256xf32>
    %c1_113 = arith.constant 1 : index
    %c0_114 = arith.constant 0 : index
    %384 = vector.load %arg15[%c1_113, %c0_114] : memref<8x256xf32, #tpu.memory_space<vmem>>, vector<1x256xf32>
    tpu.vector_store %arg15[%c1_113, %c0_114], %383 {strides = array<i32>} : memref<8x256xf32, #tpu.memory_space<vmem>>, vector<1x256xf32>,
    %385 = vector.extract_strided_slice %342 {offsets = [2, 0], sizes = [1, 256], strides = [1, 1]} : vector<8x256xf32> to vector<1x256xf32>
    %386 = vector.shape_cast %385 : vector<1x256xf32> to vector<1x256xf32>
    %387 = vector.broadcast %386 : vector<1x256xf32> to vector<16x256xf32>
    %388 = arith.mulf %387, %345 : vector<16x256xf32>
    %389 = math.exp %388 : vector<16x256xf32>
    %390 = vector.extract_strided_slice %343 {offsets = [2, 0], sizes = [1, 256], strides = [1, 1]} : vector<8x256xf32> to vector<1x256xf32>
    %391 = vector.shape_cast %390 : vector<1x256xf32> to vector<1x256xf32>
    %392 = vector.broadcast %391 : vector<1x256xf32> to vector<16x256xf32>
    %393 = arith.mulf %389, %378 : vector<16x256xf32>
    %394 = vector.extract_strided_slice %325 {offsets = [0, 2], sizes = [16, 1], strides = [1, 1]} : vector<16x8xf32> to vector<16x1xf32>
    %395 = vector.broadcast %394 : vector<16x1xf32> to vector<16x256xf32>
    %396 = arith.mulf %395, %392 : vector<16x256xf32>
    %397 = arith.addf %393, %396 : vector<16x256xf32>
    %398 = vector.extract_strided_slice %326 {offsets = [0, 2], sizes = [16, 1], strides = [1, 1]} : vector<16x8xf32> to vector<16x1xf32>
    %399 = vector.broadcast %398 : vector<16x1xf32> to vector<16x256xf32>
    %400 = arith.mulf %399, %397 : vector<16x256xf32>
    %cst_115 = arith.constant dense<0.000000e+00> : vector<256xf32>
    %401 = vector.multi_reduction <add>, %400, %cst_115 [0] : vector<16x256xf32> to vector<256xf32>
    %402 = vector.shape_cast %401 : vector<256xf32> to vector<1x256xf32>
    %c2_116 = arith.constant 2 : index
    %c0_117 = arith.constant 0 : index
    %403 = vector.load %arg15[%c2_116, %c0_117] : memref<8x256xf32, #tpu.memory_space<vmem>>, vector<1x256xf32>
    tpu.vector_store %arg15[%c2_116, %c0_117], %402 {strides = array<i32>} : memref<8x256xf32, #tpu.memory_space<vmem>>, vector<1x256xf32>,
    %404 = vector.extract_strided_slice %342 {offsets = [3, 0], sizes = [1, 256], strides = [1, 1]} : vector<8x256xf32> to vector<1x256xf32>
    %405 = vector.shape_cast %404 : vector<1x256xf32> to vector<1x256xf32>
    %406 = vector.broadcast %405 : vector<1x256xf32> to vector<16x256xf32>
    %407 = arith.mulf %406, %345 : vector<16x256xf32>
    %408 = math.exp %407 : vector<16x256xf32>
    %409 = vector.extract_strided_slice %343 {offsets = [3, 0], sizes = [1, 256], strides = [1, 1]} : vector<8x256xf32> to vector<1x256xf32>
    %410 = vector.shape_cast %409 : vector<1x256xf32> to vector<1x256xf32>
    %411 = vector.broadcast %410 : vector<1x256xf32> to vector<16x256xf32>
    %412 = arith.mulf %408, %397 : vector<16x256xf32>
    %413 = vector.extract_strided_slice %325 {offsets = [0, 3], sizes = [16, 1], strides = [1, 1]} : vector<16x8xf32> to vector<16x1xf32>
    %414 = vector.broadcast %413 : vector<16x1xf32> to vector<16x256xf32>
    %415 = arith.mulf %414, %411 : vector<16x256xf32>
    %416 = arith.addf %412, %415 : vector<16x256xf32>
    %417 = vector.extract_strided_slice %326 {offsets = [0, 3], sizes = [16, 1], strides = [1, 1]} : vector<16x8xf32> to vector<16x1xf32>
    %418 = vector.broadcast %417 : vector<16x1xf32> to vector<16x256xf32>
    %419 = arith.mulf %418, %416 : vector<16x256xf32>
    %cst_118 = arith.constant dense<0.000000e+00> : vector<256xf32>
    %420 = vector.multi_reduction <add>, %419, %cst_118 [0] : vector<16x256xf32> to vector<256xf32>
    %421 = vector.shape_cast %420 : vector<256xf32> to vector<1x256xf32>
    %c3_119 = arith.constant 3 : index
    %c0_120 = arith.constant 0 : index
    %422 = vector.load %arg15[%c3_119, %c0_120] : memref<8x256xf32, #tpu.memory_space<vmem>>, vector<1x256xf32>
    tpu.vector_store %arg15[%c3_119, %c0_120], %421 {strides = array<i32>} : memref<8x256xf32, #tpu.memory_space<vmem>>, vector<1x256xf32>,
    %423 = vector.extract_strided_slice %342 {offsets = [4, 0], sizes = [1, 256], strides = [1, 1]} : vector<8x256xf32> to vector<1x256xf32>
    %424 = vector.shape_cast %423 : vector<1x256xf32> to vector<1x256xf32>
    %425 = vector.broadcast %424 : vector<1x256xf32> to vector<16x256xf32>
    %426 = arith.mulf %425, %345 : vector<16x256xf32>
    %427 = math.exp %426 : vector<16x256xf32>
    %428 = vector.extract_strided_slice %343 {offsets = [4, 0], sizes = [1, 256], strides = [1, 1]} : vector<8x256xf32> to vector<1x256xf32>
    %429 = vector.shape_cast %428 : vector<1x256xf32> to vector<1x256xf32>
    %430 = vector.broadcast %429 : vector<1x256xf32> to vector<16x256xf32>
    %431 = arith.mulf %427, %416 : vector<16x256xf32>
    %432 = vector.extract_strided_slice %325 {offsets = [0, 4], sizes = [16, 1], strides = [1, 1]} : vector<16x8xf32> to vector<16x1xf32>
    %433 = vector.broadcast %432 : vector<16x1xf32> to vector<16x256xf32>
    %434 = arith.mulf %433, %430 : vector<16x256xf32>
    %435 = arith.addf %431, %434 : vector<16x256xf32>
    %436 = vector.extract_strided_slice %326 {offsets = [0, 4], sizes = [16, 1], strides = [1, 1]} : vector<16x8xf32> to vector<16x1xf32>
    %437 = vector.broadcast %436 : vector<16x1xf32> to vector<16x256xf32>
    %438 = arith.mulf %437, %435 : vector<16x256xf32>
    %cst_121 = arith.constant dense<0.000000e+00> : vector<256xf32>
    %439 = vector.multi_reduction <add>, %438, %cst_121 [0] : vector<16x256xf32> to vector<256xf32>
    %440 = vector.shape_cast %439 : vector<256xf32> to vector<1x256xf32>
    %c4_122 = arith.constant 4 : index
    %c0_123 = arith.constant 0 : index
    %441 = vector.load %arg15[%c4_122, %c0_123] : memref<8x256xf32, #tpu.memory_space<vmem>>, vector<1x256xf32>
    tpu.vector_store %arg15[%c4_122, %c0_123], %440 {strides = array<i32>} : memref<8x256xf32, #tpu.memory_space<vmem>>, vector<1x256xf32>,
    %442 = vector.extract_strided_slice %342 {offsets = [5, 0], sizes = [1, 256], strides = [1, 1]} : vector<8x256xf32> to vector<1x256xf32>
    %443 = vector.shape_cast %442 : vector<1x256xf32> to vector<1x256xf32>
    %444 = vector.broadcast %443 : vector<1x256xf32> to vector<16x256xf32>
    %445 = arith.mulf %444, %345 : vector<16x256xf32>
    %446 = math.exp %445 : vector<16x256xf32>
    %447 = vector.extract_strided_slice %343 {offsets = [5, 0], sizes = [1, 256], strides = [1, 1]} : vector<8x256xf32> to vector<1x256xf32>
    %448 = vector.shape_cast %447 : vector<1x256xf32> to vector<1x256xf32>
    %449 = vector.broadcast %448 : vector<1x256xf32> to vector<16x256xf32>
    %450 = arith.mulf %446, %435 : vector<16x256xf32>
    %451 = vector.extract_strided_slice %325 {offsets = [0, 5], sizes = [16, 1], strides = [1, 1]} : vector<16x8xf32> to vector<16x1xf32>
    %452 = vector.broadcast %451 : vector<16x1xf32> to vector<16x256xf32>
    %453 = arith.mulf %452, %449 : vector<16x256xf32>
    %454 = arith.addf %450, %453 : vector<16x256xf32>
    %455 = vector.extract_strided_slice %326 {offsets = [0, 5], sizes = [16, 1], strides = [1, 1]} : vector<16x8xf32> to vector<16x1xf32>
    %456 = vector.broadcast %455 : vector<16x1xf32> to vector<16x256xf32>
    %457 = arith.mulf %456, %454 : vector<16x256xf32>
    %cst_124 = arith.constant dense<0.000000e+00> : vector<256xf32>
    %458 = vector.multi_reduction <add>, %457, %cst_124 [0] : vector<16x256xf32> to vector<256xf32>
    %459 = vector.shape_cast %458 : vector<256xf32> to vector<1x256xf32>
    %c5_125 = arith.constant 5 : index
    %c0_126 = arith.constant 0 : index
    %460 = vector.load %arg15[%c5_125, %c0_126] : memref<8x256xf32, #tpu.memory_space<vmem>>, vector<1x256xf32>
    tpu.vector_store %arg15[%c5_125, %c0_126], %459 {strides = array<i32>} : memref<8x256xf32, #tpu.memory_space<vmem>>, vector<1x256xf32>,
    %461 = vector.extract_strided_slice %342 {offsets = [6, 0], sizes = [1, 256], strides = [1, 1]} : vector<8x256xf32> to vector<1x256xf32>
    %462 = vector.shape_cast %461 : vector<1x256xf32> to vector<1x256xf32>
    %463 = vector.broadcast %462 : vector<1x256xf32> to vector<16x256xf32>
    %464 = arith.mulf %463, %345 : vector<16x256xf32>
    %465 = math.exp %464 : vector<16x256xf32>
    %466 = vector.extract_strided_slice %343 {offsets = [6, 0], sizes = [1, 256], strides = [1, 1]} : vector<8x256xf32> to vector<1x256xf32>
    %467 = vector.shape_cast %466 : vector<1x256xf32> to vector<1x256xf32>
    %468 = vector.broadcast %467 : vector<1x256xf32> to vector<16x256xf32>
    %469 = arith.mulf %465, %454 : vector<16x256xf32>
    %470 = vector.extract_strided_slice %325 {offsets = [0, 6], sizes = [16, 1], strides = [1, 1]} : vector<16x8xf32> to vector<16x1xf32>
    %471 = vector.broadcast %470 : vector<16x1xf32> to vector<16x256xf32>
    %472 = arith.mulf %471, %468 : vector<16x256xf32>
    %473 = arith.addf %469, %472 : vector<16x256xf32>
    %474 = vector.extract_strided_slice %326 {offsets = [0, 6], sizes = [16, 1], strides = [1, 1]} : vector<16x8xf32> to vector<16x1xf32>
    %475 = vector.broadcast %474 : vector<16x1xf32> to vector<16x256xf32>
    %476 = arith.mulf %475, %473 : vector<16x256xf32>
    %cst_127 = arith.constant dense<0.000000e+00> : vector<256xf32>
    %477 = vector.multi_reduction <add>, %476, %cst_127 [0] : vector<16x256xf32> to vector<256xf32>
    %478 = vector.shape_cast %477 : vector<256xf32> to vector<1x256xf32>
    %c6_128 = arith.constant 6 : index
    %c0_129 = arith.constant 0 : index
    %479 = vector.load %arg15[%c6_128, %c0_129] : memref<8x256xf32, #tpu.memory_space<vmem>>, vector<1x256xf32>
    tpu.vector_store %arg15[%c6_128, %c0_129], %478 {strides = array<i32>} : memref<8x256xf32, #tpu.memory_space<vmem>>, vector<1x256xf32>,
    %480 = vector.extract_strided_slice %342 {offsets = [7, 0], sizes = [1, 256], strides = [1, 1]} : vector<8x256xf32> to vector<1x256xf32>
    %481 = vector.shape_cast %480 : vector<1x256xf32> to vector<1x256xf32>
    %482 = vector.broadcast %481 : vector<1x256xf32> to vector<16x256xf32>
    %483 = arith.mulf %482, %345 : vector<16x256xf32>
    %484 = math.exp %483 : vector<16x256xf32>
    %485 = vector.extract_strided_slice %343 {offsets = [7, 0], sizes = [1, 256], strides = [1, 1]} : vector<8x256xf32> to vector<1x256xf32>
    %486 = vector.shape_cast %485 : vector<1x256xf32> to vector<1x256xf32>
    %487 = vector.broadcast %486 : vector<1x256xf32> to vector<16x256xf32>
    %488 = arith.mulf %484, %473 : vector<16x256xf32>
    %489 = vector.extract_strided_slice %325 {offsets = [0, 7], sizes = [16, 1], strides = [1, 1]} : vector<16x8xf32> to vector<16x1xf32>
    %490 = vector.broadcast %489 : vector<16x1xf32> to vector<16x256xf32>
    %491 = arith.mulf %490, %487 : vector<16x256xf32>
    %492 = arith.addf %488, %491 : vector<16x256xf32>
    %493 = vector.extract_strided_slice %326 {offsets = [0, 7], sizes = [16, 1], strides = [1, 1]} : vector<16x8xf32> to vector<16x1xf32>
    %494 = vector.broadcast %493 : vector<16x1xf32> to vector<16x256xf32>
    %495 = arith.mulf %494, %492 : vector<16x256xf32>
    %cst_130 = arith.constant dense<0.000000e+00> : vector<256xf32>
    %496 = vector.multi_reduction <add>, %495, %cst_130 [0] : vector<16x256xf32> to vector<256xf32>
    %497 = vector.shape_cast %496 : vector<256xf32> to vector<1x256xf32>
    %c7_131 = arith.constant 7 : index
    %c0_132 = arith.constant 0 : index
    %498 = vector.load %arg15[%c7_131, %c0_132] : memref<8x256xf32, #tpu.memory_space<vmem>>, vector<1x256xf32>
    tpu.vector_store %arg15[%c7_131, %c0_132], %497 {strides = array<i32>} : memref<8x256xf32, #tpu.memory_space<vmem>>, vector<1x256xf32>,
    %c0_133 = arith.constant 0 : index
    %c0_134 = arith.constant 0 : index
    %499 = vector.load %arg15[%c0_133, %c0_134] : memref<8x256xf32, #tpu.memory_space<vmem>>, vector<8x256xf32>
    %c1_135 = arith.constant 1 : index
    %c0_136 = arith.constant 0 : index
    %c0_137 = arith.constant 0 : index
    %500 = vector.load %arg10[%c1_135, %c0_136, %c0_137] : memref<3x1x256xf32, #tpu.memory_space<vmem>>, vector<1x1x256xf32>
    %501 = vector.shape_cast %500 : vector<1x1x256xf32> to vector<1x256xf32>
    %502 = vector.broadcast %501 : vector<1x256xf32> to vector<8x256xf32>
    %503 = arith.mulf %502, %317 : vector<8x256xf32>
    %504 = arith.addf %499, %503 : vector<8x256xf32>
    %cst_138 = arith.constant 0.000000e+00 : f32
    %505 = vector.broadcast %cst_138 : f32 to vector<8x256xf32>
    %506 = arith.subf %505, %279 : vector<8x256xf32>
    %507 = math.exp %506 : vector<8x256xf32>
    %cst_139 = arith.constant 1.000000e+00 : f32
    %508 = vector.broadcast %cst_139 : f32 to vector<8x256xf32>
    %509 = arith.addf %508, %507 : vector<8x256xf32>
    %cst_140 = arith.constant 1.000000e+00 : f32
    %510 = vector.broadcast %cst_140 : f32 to vector<8x256xf32>
    %511 = arith.divf %510, %509 : vector<8x256xf32>
    %512 = arith.mulf %279, %511 : vector<8x256xf32>
    %513 = arith.mulf %504, %512 : vector<8x256xf32>
    %514 = arith.truncf %513 : vector<8x256xf32> to vector<8x256xbf16>
    %c1_141 = arith.constant 1 : index
    %c0_142 = arith.constant 0 : index
    %c0_143 = arith.constant 0 : index
    %515 = vector.load %arg11[%c1_141, %c0_142, %c0_143] : memref<3x128x256xbf16, #tpu.memory_space<vmem>>, vector<1x128x256xbf16>
    %516 = vector.shape_cast %515 : vector<1x128x256xbf16> to vector<128x256xbf16>
    %cst_144 = arith.constant dense<0.000000e+00> : vector<8x128xf32>
    %517 = tpu.matmul %514, %516, %cst_144 {dimension_numbers = #tpu.dot_dimension_numbers<[1], [1], [0], [0], [0, 0, 1, 0], [], []>} : vector<8x256xbf16>, vector<128x256xbf16>, vector<8x128xf32> -> vector<8x128xf32>
    %518 = arith.addf %259, %517 : vector<8x128xf32>
    %519 = arith.mulf %518, %518 : vector<8x128xf32>
    %cst_145 = arith.constant dense<0.000000e+00> : vector<8xf32>
    %520 = vector.multi_reduction <add>, %519, %cst_145 [1] : vector<8x128xf32> to vector<8xf32>
    %521 = vector.shape_cast %520 : vector<8xf32> to vector<8x1xf32>
    %cst_146 = arith.constant 1.280000e+02 : f32
    %522 = vector.broadcast %cst_146 : f32 to vector<8x1xf32>
    %523 = arith.divf %521, %522 : vector<8x1xf32>
    %cst_147 = arith.constant 9.99999974E-6 : f32
    %524 = vector.broadcast %cst_147 : f32 to vector<8x1xf32>
    %525 = arith.addf %523, %524 : vector<8x1xf32>
    %526 = math.rsqrt %525 : vector<8x1xf32>
    %527 = vector.broadcast %526 : vector<8x1xf32> to vector<8x128xf32>
    %528 = arith.mulf %518, %527 : vector<8x128xf32>
    %c2_148 = arith.constant 2 : index
    %c0_149 = arith.constant 0 : index
    %c0_150 = arith.constant 0 : index
    %529 = vector.load %arg2[%c2_148, %c0_149, %c0_150] : memref<3x1x128xf32, #tpu.memory_space<vmem>>, vector<1x1x128xf32>
    %530 = vector.shape_cast %529 : vector<1x1x128xf32> to vector<1x128xf32>
    %531 = vector.broadcast %530 : vector<1x128xf32> to vector<8x128xf32>
    %532 = arith.mulf %528, %531 : vector<8x128xf32>
    %533 = arith.truncf %532 : vector<8x128xf32> to vector<8x128xbf16>
    %c2_151 = arith.constant 2 : index
    %c0_152 = arith.constant 0 : index
    %c0_153 = arith.constant 0 : index
    %534 = vector.load %arg3[%c2_151, %c0_152, %c0_153] : memref<3x512x128xbf16, #tpu.memory_space<vmem>>, vector<1x512x128xbf16>
    %535 = vector.shape_cast %534 : vector<1x512x128xbf16> to vector<512x128xbf16>
    %cst_154 = arith.constant dense<0.000000e+00> : vector<8x512xf32>
    %536 = tpu.matmul %533, %535, %cst_154 {dimension_numbers = #tpu.dot_dimension_numbers<[1], [1], [0], [0], [0, 0, 1, 0], [], []>} : vector<8x128xbf16>, vector<512x128xbf16>, vector<8x512xf32> -> vector<8x512xf32>
    %537 = vector.extract_strided_slice %536 {offsets = [0, 0], sizes = [8, 256], strides = [1, 1]} : vector<8x512xf32> to vector<8x256xf32>
    %538 = vector.extract_strided_slice %536 {offsets = [0, 256], sizes = [8, 256], strides = [1, 1]} : vector<8x512xf32> to vector<8x256xf32>
    %c2_155 = arith.constant 2 : index
    %c0_156 = arith.constant 0 : index
    %c0_157 = arith.constant 0 : index
    %539 = vector.load %arg4[%c2_155, %c0_156, %c0_157] : memref<3x4x256xf32, #tpu.memory_space<vmem>>, vector<1x4x256xf32>
    %540 = vector.shape_cast %539 : vector<1x4x256xf32> to vector<4x256xf32>
    %541 = vector.extract_strided_slice %540 {offsets = [3, 0], sizes = [1, 256], strides = [1, 1]} : vector<4x256xf32> to vector<1x256xf32>
    %542 = vector.broadcast %541 : vector<1x256xf32> to vector<8x256xf32>
    %543 = arith.mulf %537, %542 : vector<8x256xf32>
    %c2_158 = arith.constant 2 : index
    %c0_159 = arith.constant 0 : index
    %c0_160 = arith.constant 0 : index
    %544 = vector.load %arg5[%c2_158, %c0_159, %c0_160] : memref<3x1x256xf32, #tpu.memory_space<vmem>>, vector<1x1x256xf32>
    %545 = vector.shape_cast %544 : vector<1x1x256xf32> to vector<1x256xf32>
    %546 = vector.broadcast %545 : vector<1x256xf32> to vector<8x256xf32>
    %547 = arith.addf %543, %546 : vector<8x256xf32>
    %cst_161 = arith.constant 0.000000e+00 : f32
    %548 = vector.broadcast %cst_161 : f32 to vector<1x256xf32>
    %549 = vector.extract_strided_slice %537 {offsets = [0, 0], sizes = [7, 256], strides = [1, 1]} : vector<8x256xf32> to vector<7x256xf32>
    %550 = tpu.concatenate %548, %549 in 0 : vector<1x256xf32>, vector<7x256xf32> -> vector<8x256xf32>
    %551 = vector.extract_strided_slice %540 {offsets = [2, 0], sizes = [1, 256], strides = [1, 1]} : vector<4x256xf32> to vector<1x256xf32>
    %552 = vector.broadcast %551 : vector<1x256xf32> to vector<8x256xf32>
    %553 = arith.mulf %550, %552 : vector<8x256xf32>
    %554 = arith.addf %547, %553 : vector<8x256xf32>
    %cst_162 = arith.constant 0.000000e+00 : f32
    %555 = vector.broadcast %cst_162 : f32 to vector<2x256xf32>
    %556 = vector.extract_strided_slice %537 {offsets = [0, 0], sizes = [6, 256], strides = [1, 1]} : vector<8x256xf32> to vector<6x256xf32>
    %557 = tpu.concatenate %555, %556 in 0 : vector<2x256xf32>, vector<6x256xf32> -> vector<8x256xf32>
    %558 = vector.extract_strided_slice %540 {offsets = [1, 0], sizes = [1, 256], strides = [1, 1]} : vector<4x256xf32> to vector<1x256xf32>
    %559 = vector.broadcast %558 : vector<1x256xf32> to vector<8x256xf32>
    %560 = arith.mulf %557, %559 : vector<8x256xf32>
    %561 = arith.addf %554, %560 : vector<8x256xf32>
    %cst_163 = arith.constant 0.000000e+00 : f32
    %562 = vector.broadcast %cst_163 : f32 to vector<3x256xf32>
    %563 = vector.extract_strided_slice %537 {offsets = [0, 0], sizes = [5, 256], strides = [1, 1]} : vector<8x256xf32> to vector<5x256xf32>
    %564 = tpu.concatenate %562, %563 in 0 : vector<3x256xf32>, vector<5x256xf32> -> vector<8x256xf32>
    %565 = vector.extract_strided_slice %540 {offsets = [0, 0], sizes = [1, 256], strides = [1, 1]} : vector<4x256xf32> to vector<1x256xf32>
    %566 = vector.broadcast %565 : vector<1x256xf32> to vector<8x256xf32>
    %567 = arith.mulf %564, %566 : vector<8x256xf32>
    %568 = arith.addf %561, %567 : vector<8x256xf32>
    %cst_164 = arith.constant 0.000000e+00 : f32
    %569 = vector.broadcast %cst_164 : f32 to vector<8x256xf32>
    %570 = arith.subf %569, %568 : vector<8x256xf32>
    %571 = math.exp %570 : vector<8x256xf32>
    %cst_165 = arith.constant 1.000000e+00 : f32
    %572 = vector.broadcast %cst_165 : f32 to vector<8x256xf32>
    %573 = arith.addf %572, %571 : vector<8x256xf32>
    %cst_166 = arith.constant 1.000000e+00 : f32
    %574 = vector.broadcast %cst_166 : f32 to vector<8x256xf32>
    %575 = arith.divf %574, %573 : vector<8x256xf32>
    %576 = arith.mulf %568, %575 : vector<8x256xf32>
    %577 = arith.truncf %576 : vector<8x256xf32> to vector<8x256xbf16>
    %c2_167 = arith.constant 2 : index
    %c0_168 = arith.constant 0 : index
    %c0_169 = arith.constant 0 : index
    %578 = vector.load %arg6[%c2_167, %c0_168, %c0_169] : memref<3x40x256xbf16, #tpu.memory_space<vmem>>, vector<1x40x256xbf16>
    %579 = vector.shape_cast %578 : vector<1x40x256xbf16> to vector<40x256xbf16>
    %580 = vector.extract_strided_slice %579 {offsets = [0, 0], sizes = [8, 256], strides = [1, 1]} : vector<40x256xbf16> to vector<8x256xbf16>
    %cst_170 = arith.constant dense<0.000000e+00> : vector<8x8xf32>
    %581 = tpu.matmul %577, %580, %cst_170 {dimension_numbers = #tpu.dot_dimension_numbers<[1], [1], [0], [0], [0, 0, 1, 0], [], []>} : vector<8x256xbf16>, vector<8x256xbf16>, vector<8x8xf32> -> vector<8x8xf32>
    %582 = vector.extract_strided_slice %579 {offsets = [8, 0], sizes = [32, 256], strides = [1, 1]} : vector<40x256xbf16> to vector<32x256xbf16>
    %cst_171 = arith.constant dense<0.000000e+00> : vector<32x8xf32>
    %583 = tpu.matmul %582, %577, %cst_171 {dimension_numbers = #tpu.dot_dimension_numbers<[1], [1], [0], [0], [0, 0, 1, 0], [], []>} : vector<32x256xbf16>, vector<8x256xbf16>, vector<32x8xf32> -> vector<32x8xf32>
    %584 = vector.extract_strided_slice %583 {offsets = [0, 0], sizes = [16, 8], strides = [1, 1]} : vector<32x8xf32> to vector<16x8xf32>
    %585 = vector.extract_strided_slice %583 {offsets = [16, 0], sizes = [16, 8], strides = [1, 1]} : vector<32x8xf32> to vector<16x8xf32>
    %586 = arith.truncf %581 : vector<8x8xf32> to vector<8x8xbf16>
    %c2_172 = arith.constant 2 : index
    %c0_173 = arith.constant 0 : index
    %c0_174 = arith.constant 0 : index
    %587 = vector.load %arg7[%c2_172, %c0_173, %c0_174] : memref<3x256x8xbf16, #tpu.memory_space<vmem>>, vector<1x256x8xbf16>
    %588 = vector.shape_cast %587 : vector<1x256x8xbf16> to vector<256x8xbf16>
    %cst_175 = arith.constant dense<0.000000e+00> : vector<8x256xf32>
    %589 = tpu.matmul %586, %588, %cst_175 {dimension_numbers = #tpu.dot_dimension_numbers<[1], [1], [0], [0], [0, 0, 1, 0], [], []>} : vector<8x8xbf16>, vector<256x8xbf16>, vector<8x256xf32> -> vector<8x256xf32>
    %c2_176 = arith.constant 2 : index
    %c0_177 = arith.constant 0 : index
    %c0_178 = arith.constant 0 : index
    %590 = vector.load %arg8[%c2_176, %c0_177, %c0_178] : memref<3x1x256xf32, #tpu.memory_space<vmem>>, vector<1x1x256xf32>
    %591 = vector.shape_cast %590 : vector<1x1x256xf32> to vector<1x256xf32>
    %592 = vector.broadcast %591 : vector<1x256xf32> to vector<8x256xf32>
    %593 = arith.addf %589, %592 : vector<8x256xf32>
    %594 = math.absf %593 : vector<8x256xf32>
    %cst_179 = arith.constant 0.000000e+00 : f32
    %595 = vector.broadcast %cst_179 : f32 to vector<8x256xf32>
    %596 = arith.subf %595, %594 : vector<8x256xf32>
    %597 = math.exp %596 : vector<8x256xf32>
    %598 = math.log1p %597 : vector<8x256xf32>
    %cst_180 = arith.constant 0.000000e+00 : f32
    %599 = vector.broadcast %cst_180 : f32 to vector<8x256xf32>
    %600 = arith.maximumf %593, %599 : vector<8x256xf32>
    %601 = arith.addf %598, %600 : vector<8x256xf32>
    %602 = arith.mulf %601, %576 : vector<8x256xf32>
    %c2_181 = arith.constant 2 : index
    %c0_182 = arith.constant 0 : index
    %c0_183 = arith.constant 0 : index
    %603 = vector.load %arg9[%c2_181, %c0_182, %c0_183] : memref<3x16x256xf32, #tpu.memory_space<vmem>>, vector<1x16x256xf32>
    %604 = vector.shape_cast %603 : vector<1x16x256xf32> to vector<16x256xf32>
    %cst_184 = arith.constant 0.000000e+00 : f32
    %605 = vector.broadcast %cst_184 : f32 to vector<16x256xf32>
    %606 = vector.extract_strided_slice %601 {offsets = [0, 0], sizes = [1, 256], strides = [1, 1]} : vector<8x256xf32> to vector<1x256xf32>
    %607 = vector.shape_cast %606 : vector<1x256xf32> to vector<1x256xf32>
    %608 = vector.broadcast %607 : vector<1x256xf32> to vector<16x256xf32>
    %609 = arith.mulf %608, %604 : vector<16x256xf32>
    %610 = math.exp %609 : vector<16x256xf32>
    %611 = vector.extract_strided_slice %602 {offsets = [0, 0], sizes = [1, 256], strides = [1, 1]} : vector<8x256xf32> to vector<1x256xf32>
    %612 = vector.shape_cast %611 : vector<1x256xf32> to vector<1x256xf32>
    %613 = vector.broadcast %612 : vector<1x256xf32> to vector<16x256xf32>
    %614 = arith.mulf %610, %605 : vector<16x256xf32>
    %615 = vector.extract_strided_slice %584 {offsets = [0, 0], sizes = [16, 1], strides = [1, 1]} : vector<16x8xf32> to vector<16x1xf32>
    %616 = vector.broadcast %615 : vector<16x1xf32> to vector<16x256xf32>
    %617 = arith.mulf %616, %613 : vector<16x256xf32>
    %618 = arith.addf %614, %617 : vector<16x256xf32>
    %619 = vector.extract_strided_slice %585 {offsets = [0, 0], sizes = [16, 1], strides = [1, 1]} : vector<16x8xf32> to vector<16x1xf32>
    %620 = vector.broadcast %619 : vector<16x1xf32> to vector<16x256xf32>
    %621 = arith.mulf %620, %618 : vector<16x256xf32>
    %cst_185 = arith.constant dense<0.000000e+00> : vector<256xf32>
    %622 = vector.multi_reduction <add>, %621, %cst_185 [0] : vector<16x256xf32> to vector<256xf32>
    %623 = vector.shape_cast %622 : vector<256xf32> to vector<1x256xf32>
    %c0_186 = arith.constant 0 : index
    %c0_187 = arith.constant 0 : index
    %624 = vector.load %arg15[%c0_186, %c0_187] : memref<8x256xf32, #tpu.memory_space<vmem>>, vector<1x256xf32>
    tpu.vector_store %arg15[%c0_186, %c0_187], %623 {strides = array<i32>} : memref<8x256xf32, #tpu.memory_space<vmem>>, vector<1x256xf32>,
    %625 = vector.extract_strided_slice %601 {offsets = [1, 0], sizes = [1, 256], strides = [1, 1]} : vector<8x256xf32> to vector<1x256xf32>
    %626 = vector.shape_cast %625 : vector<1x256xf32> to vector<1x256xf32>
    %627 = vector.broadcast %626 : vector<1x256xf32> to vector<16x256xf32>
    %628 = arith.mulf %627, %604 : vector<16x256xf32>
    %629 = math.exp %628 : vector<16x256xf32>
    %630 = vector.extract_strided_slice %602 {offsets = [1, 0], sizes = [1, 256], strides = [1, 1]} : vector<8x256xf32> to vector<1x256xf32>
    %631 = vector.shape_cast %630 : vector<1x256xf32> to vector<1x256xf32>
    %632 = vector.broadcast %631 : vector<1x256xf32> to vector<16x256xf32>
    %633 = arith.mulf %629, %618 : vector<16x256xf32>
    %634 = vector.extract_strided_slice %584 {offsets = [0, 1], sizes = [16, 1], strides = [1, 1]} : vector<16x8xf32> to vector<16x1xf32>
    %635 = vector.broadcast %634 : vector<16x1xf32> to vector<16x256xf32>
    %636 = arith.mulf %635, %632 : vector<16x256xf32>
    %637 = arith.addf %633, %636 : vector<16x256xf32>
    %638 = vector.extract_strided_slice %585 {offsets = [0, 1], sizes = [16, 1], strides = [1, 1]} : vector<16x8xf32> to vector<16x1xf32>
    %639 = vector.broadcast %638 : vector<16x1xf32> to vector<16x256xf32>
    %640 = arith.mulf %639, %637 : vector<16x256xf32>
    %cst_188 = arith.constant dense<0.000000e+00> : vector<256xf32>
    %641 = vector.multi_reduction <add>, %640, %cst_188 [0] : vector<16x256xf32> to vector<256xf32>
    %642 = vector.shape_cast %641 : vector<256xf32> to vector<1x256xf32>
    %c1_189 = arith.constant 1 : index
    %c0_190 = arith.constant 0 : index
    %643 = vector.load %arg15[%c1_189, %c0_190] : memref<8x256xf32, #tpu.memory_space<vmem>>, vector<1x256xf32>
    tpu.vector_store %arg15[%c1_189, %c0_190], %642 {strides = array<i32>} : memref<8x256xf32, #tpu.memory_space<vmem>>, vector<1x256xf32>,
    %644 = vector.extract_strided_slice %601 {offsets = [2, 0], sizes = [1, 256], strides = [1, 1]} : vector<8x256xf32> to vector<1x256xf32>
    %645 = vector.shape_cast %644 : vector<1x256xf32> to vector<1x256xf32>
    %646 = vector.broadcast %645 : vector<1x256xf32> to vector<16x256xf32>
    %647 = arith.mulf %646, %604 : vector<16x256xf32>
    %648 = math.exp %647 : vector<16x256xf32>
    %649 = vector.extract_strided_slice %602 {offsets = [2, 0], sizes = [1, 256], strides = [1, 1]} : vector<8x256xf32> to vector<1x256xf32>
    %650 = vector.shape_cast %649 : vector<1x256xf32> to vector<1x256xf32>
    %651 = vector.broadcast %650 : vector<1x256xf32> to vector<16x256xf32>
    %652 = arith.mulf %648, %637 : vector<16x256xf32>
    %653 = vector.extract_strided_slice %584 {offsets = [0, 2], sizes = [16, 1], strides = [1, 1]} : vector<16x8xf32> to vector<16x1xf32>
    %654 = vector.broadcast %653 : vector<16x1xf32> to vector<16x256xf32>
    %655 = arith.mulf %654, %651 : vector<16x256xf32>
    %656 = arith.addf %652, %655 : vector<16x256xf32>
    %657 = vector.extract_strided_slice %585 {offsets = [0, 2], sizes = [16, 1], strides = [1, 1]} : vector<16x8xf32> to vector<16x1xf32>
    %658 = vector.broadcast %657 : vector<16x1xf32> to vector<16x256xf32>
    %659 = arith.mulf %658, %656 : vector<16x256xf32>
    %cst_191 = arith.constant dense<0.000000e+00> : vector<256xf32>
    %660 = vector.multi_reduction <add>, %659, %cst_191 [0] : vector<16x256xf32> to vector<256xf32>
    %661 = vector.shape_cast %660 : vector<256xf32> to vector<1x256xf32>
    %c2_192 = arith.constant 2 : index
    %c0_193 = arith.constant 0 : index
    %662 = vector.load %arg15[%c2_192, %c0_193] : memref<8x256xf32, #tpu.memory_space<vmem>>, vector<1x256xf32>
    tpu.vector_store %arg15[%c2_192, %c0_193], %661 {strides = array<i32>} : memref<8x256xf32, #tpu.memory_space<vmem>>, vector<1x256xf32>,
    %663 = vector.extract_strided_slice %601 {offsets = [3, 0], sizes = [1, 256], strides = [1, 1]} : vector<8x256xf32> to vector<1x256xf32>
    %664 = vector.shape_cast %663 : vector<1x256xf32> to vector<1x256xf32>
    %665 = vector.broadcast %664 : vector<1x256xf32> to vector<16x256xf32>
    %666 = arith.mulf %665, %604 : vector<16x256xf32>
    %667 = math.exp %666 : vector<16x256xf32>
    %668 = vector.extract_strided_slice %602 {offsets = [3, 0], sizes = [1, 256], strides = [1, 1]} : vector<8x256xf32> to vector<1x256xf32>
    %669 = vector.shape_cast %668 : vector<1x256xf32> to vector<1x256xf32>
    %670 = vector.broadcast %669 : vector<1x256xf32> to vector<16x256xf32>
    %671 = arith.mulf %667, %656 : vector<16x256xf32>
    %672 = vector.extract_strided_slice %584 {offsets = [0, 3], sizes = [16, 1], strides = [1, 1]} : vector<16x8xf32> to vector<16x1xf32>
    %673 = vector.broadcast %672 : vector<16x1xf32> to vector<16x256xf32>
    %674 = arith.mulf %673, %670 : vector<16x256xf32>
    %675 = arith.addf %671, %674 : vector<16x256xf32>
    %676 = vector.extract_strided_slice %585 {offsets = [0, 3], sizes = [16, 1], strides = [1, 1]} : vector<16x8xf32> to vector<16x1xf32>
    %677 = vector.broadcast %676 : vector<16x1xf32> to vector<16x256xf32>
    %678 = arith.mulf %677, %675 : vector<16x256xf32>
    %cst_194 = arith.constant dense<0.000000e+00> : vector<256xf32>
    %679 = vector.multi_reduction <add>, %678, %cst_194 [0] : vector<16x256xf32> to vector<256xf32>
    %680 = vector.shape_cast %679 : vector<256xf32> to vector<1x256xf32>
    %c3_195 = arith.constant 3 : index
    %c0_196 = arith.constant 0 : index
    %681 = vector.load %arg15[%c3_195, %c0_196] : memref<8x256xf32, #tpu.memory_space<vmem>>, vector<1x256xf32>
    tpu.vector_store %arg15[%c3_195, %c0_196], %680 {strides = array<i32>} : memref<8x256xf32, #tpu.memory_space<vmem>>, vector<1x256xf32>,
    %682 = vector.extract_strided_slice %601 {offsets = [4, 0], sizes = [1, 256], strides = [1, 1]} : vector<8x256xf32> to vector<1x256xf32>
    %683 = vector.shape_cast %682 : vector<1x256xf32> to vector<1x256xf32>
    %684 = vector.broadcast %683 : vector<1x256xf32> to vector<16x256xf32>
    %685 = arith.mulf %684, %604 : vector<16x256xf32>
    %686 = math.exp %685 : vector<16x256xf32>
    %687 = vector.extract_strided_slice %602 {offsets = [4, 0], sizes = [1, 256], strides = [1, 1]} : vector<8x256xf32> to vector<1x256xf32>
    %688 = vector.shape_cast %687 : vector<1x256xf32> to vector<1x256xf32>
    %689 = vector.broadcast %688 : vector<1x256xf32> to vector<16x256xf32>
    %690 = arith.mulf %686, %675 : vector<16x256xf32>
    %691 = vector.extract_strided_slice %584 {offsets = [0, 4], sizes = [16, 1], strides = [1, 1]} : vector<16x8xf32> to vector<16x1xf32>
    %692 = vector.broadcast %691 : vector<16x1xf32> to vector<16x256xf32>
    %693 = arith.mulf %692, %689 : vector<16x256xf32>
    %694 = arith.addf %690, %693 : vector<16x256xf32>
    %695 = vector.extract_strided_slice %585 {offsets = [0, 4], sizes = [16, 1], strides = [1, 1]} : vector<16x8xf32> to vector<16x1xf32>
    %696 = vector.broadcast %695 : vector<16x1xf32> to vector<16x256xf32>
    %697 = arith.mulf %696, %694 : vector<16x256xf32>
    %cst_197 = arith.constant dense<0.000000e+00> : vector<256xf32>
    %698 = vector.multi_reduction <add>, %697, %cst_197 [0] : vector<16x256xf32> to vector<256xf32>
    %699 = vector.shape_cast %698 : vector<256xf32> to vector<1x256xf32>
    %c4_198 = arith.constant 4 : index
    %c0_199 = arith.constant 0 : index
    %700 = vector.load %arg15[%c4_198, %c0_199] : memref<8x256xf32, #tpu.memory_space<vmem>>, vector<1x256xf32>
    tpu.vector_store %arg15[%c4_198, %c0_199], %699 {strides = array<i32>} : memref<8x256xf32, #tpu.memory_space<vmem>>, vector<1x256xf32>,
    %701 = vector.extract_strided_slice %601 {offsets = [5, 0], sizes = [1, 256], strides = [1, 1]} : vector<8x256xf32> to vector<1x256xf32>
    %702 = vector.shape_cast %701 : vector<1x256xf32> to vector<1x256xf32>
    %703 = vector.broadcast %702 : vector<1x256xf32> to vector<16x256xf32>
    %704 = arith.mulf %703, %604 : vector<16x256xf32>
    %705 = math.exp %704 : vector<16x256xf32>
    %706 = vector.extract_strided_slice %602 {offsets = [5, 0], sizes = [1, 256], strides = [1, 1]} : vector<8x256xf32> to vector<1x256xf32>
    %707 = vector.shape_cast %706 : vector<1x256xf32> to vector<1x256xf32>
    %708 = vector.broadcast %707 : vector<1x256xf32> to vector<16x256xf32>
    %709 = arith.mulf %705, %694 : vector<16x256xf32>
    %710 = vector.extract_strided_slice %584 {offsets = [0, 5], sizes = [16, 1], strides = [1, 1]} : vector<16x8xf32> to vector<16x1xf32>
    %711 = vector.broadcast %710 : vector<16x1xf32> to vector<16x256xf32>
    %712 = arith.mulf %711, %708 : vector<16x256xf32>
    %713 = arith.addf %709, %712 : vector<16x256xf32>
    %714 = vector.extract_strided_slice %585 {offsets = [0, 5], sizes = [16, 1], strides = [1, 1]} : vector<16x8xf32> to vector<16x1xf32>
    %715 = vector.broadcast %714 : vector<16x1xf32> to vector<16x256xf32>
    %716 = arith.mulf %715, %713 : vector<16x256xf32>
    %cst_200 = arith.constant dense<0.000000e+00> : vector<256xf32>
    %717 = vector.multi_reduction <add>, %716, %cst_200 [0] : vector<16x256xf32> to vector<256xf32>
    %718 = vector.shape_cast %717 : vector<256xf32> to vector<1x256xf32>
    %c5_201 = arith.constant 5 : index
    %c0_202 = arith.constant 0 : index
    %719 = vector.load %arg15[%c5_201, %c0_202] : memref<8x256xf32, #tpu.memory_space<vmem>>, vector<1x256xf32>
    tpu.vector_store %arg15[%c5_201, %c0_202], %718 {strides = array<i32>} : memref<8x256xf32, #tpu.memory_space<vmem>>, vector<1x256xf32>,
    %720 = vector.extract_strided_slice %601 {offsets = [6, 0], sizes = [1, 256], strides = [1, 1]} : vector<8x256xf32> to vector<1x256xf32>
    %721 = vector.shape_cast %720 : vector<1x256xf32> to vector<1x256xf32>
    %722 = vector.broadcast %721 : vector<1x256xf32> to vector<16x256xf32>
    %723 = arith.mulf %722, %604 : vector<16x256xf32>
    %724 = math.exp %723 : vector<16x256xf32>
    %725 = vector.extract_strided_slice %602 {offsets = [6, 0], sizes = [1, 256], strides = [1, 1]} : vector<8x256xf32> to vector<1x256xf32>
    %726 = vector.shape_cast %725 : vector<1x256xf32> to vector<1x256xf32>
    %727 = vector.broadcast %726 : vector<1x256xf32> to vector<16x256xf32>
    %728 = arith.mulf %724, %713 : vector<16x256xf32>
    %729 = vector.extract_strided_slice %584 {offsets = [0, 6], sizes = [16, 1], strides = [1, 1]} : vector<16x8xf32> to vector<16x1xf32>
    %730 = vector.broadcast %729 : vector<16x1xf32> to vector<16x256xf32>
    %731 = arith.mulf %730, %727 : vector<16x256xf32>
    %732 = arith.addf %728, %731 : vector<16x256xf32>
    %733 = vector.extract_strided_slice %585 {offsets = [0, 6], sizes = [16, 1], strides = [1, 1]} : vector<16x8xf32> to vector<16x1xf32>
    %734 = vector.broadcast %733 : vector<16x1xf32> to vector<16x256xf32>
    %735 = arith.mulf %734, %732 : vector<16x256xf32>
    %cst_203 = arith.constant dense<0.000000e+00> : vector<256xf32>
    %736 = vector.multi_reduction <add>, %735, %cst_203 [0] : vector<16x256xf32> to vector<256xf32>
    %737 = vector.shape_cast %736 : vector<256xf32> to vector<1x256xf32>
    %c6_204 = arith.constant 6 : index
    %c0_205 = arith.constant 0 : index
    %738 = vector.load %arg15[%c6_204, %c0_205] : memref<8x256xf32, #tpu.memory_space<vmem>>, vector<1x256xf32>
    tpu.vector_store %arg15[%c6_204, %c0_205], %737 {strides = array<i32>} : memref<8x256xf32, #tpu.memory_space<vmem>>, vector<1x256xf32>,
    %739 = vector.extract_strided_slice %601 {offsets = [7, 0], sizes = [1, 256], strides = [1, 1]} : vector<8x256xf32> to vector<1x256xf32>
    %740 = vector.shape_cast %739 : vector<1x256xf32> to vector<1x256xf32>
    %741 = vector.broadcast %740 : vector<1x256xf32> to vector<16x256xf32>
    %742 = arith.mulf %741, %604 : vector<16x256xf32>
    %743 = math.exp %742 : vector<16x256xf32>
    %744 = vector.extract_strided_slice %602 {offsets = [7, 0], sizes = [1, 256], strides = [1, 1]} : vector<8x256xf32> to vector<1x256xf32>
    %745 = vector.shape_cast %744 : vector<1x256xf32> to vector<1x256xf32>
    %746 = vector.broadcast %745 : vector<1x256xf32> to vector<16x256xf32>
    %747 = arith.mulf %743, %732 : vector<16x256xf32>
    %748 = vector.extract_strided_slice %584 {offsets = [0, 7], sizes = [16, 1], strides = [1, 1]} : vector<16x8xf32> to vector<16x1xf32>
    %749 = vector.broadcast %748 : vector<16x1xf32> to vector<16x256xf32>
    %750 = arith.mulf %749, %746 : vector<16x256xf32>
    %751 = arith.addf %747, %750 : vector<16x256xf32>
    %752 = vector.extract_strided_slice %585 {offsets = [0, 7], sizes = [16, 1], strides = [1, 1]} : vector<16x8xf32> to vector<16x1xf32>
    %753 = vector.broadcast %752 : vector<16x1xf32> to vector<16x256xf32>
    %754 = arith.mulf %753, %751 : vector<16x256xf32>
    %cst_206 = arith.constant dense<0.000000e+00> : vector<256xf32>
    %755 = vector.multi_reduction <add>, %754, %cst_206 [0] : vector<16x256xf32> to vector<256xf32>
    %756 = vector.shape_cast %755 : vector<256xf32> to vector<1x256xf32>
    %c7_207 = arith.constant 7 : index
    %c0_208 = arith.constant 0 : index
    %757 = vector.load %arg15[%c7_207, %c0_208] : memref<8x256xf32, #tpu.memory_space<vmem>>, vector<1x256xf32>
    tpu.vector_store %arg15[%c7_207, %c0_208], %756 {strides = array<i32>} : memref<8x256xf32, #tpu.memory_space<vmem>>, vector<1x256xf32>,
    %c0_209 = arith.constant 0 : index
    %c0_210 = arith.constant 0 : index
    %758 = vector.load %arg15[%c0_209, %c0_210] : memref<8x256xf32, #tpu.memory_space<vmem>>, vector<8x256xf32>
    %c2_211 = arith.constant 2 : index
    %c0_212 = arith.constant 0 : index
    %c0_213 = arith.constant 0 : index
    %759 = vector.load %arg10[%c2_211, %c0_212, %c0_213] : memref<3x1x256xf32, #tpu.memory_space<vmem>>, vector<1x1x256xf32>
    %760 = vector.shape_cast %759 : vector<1x1x256xf32> to vector<1x256xf32>
    %761 = vector.broadcast %760 : vector<1x256xf32> to vector<8x256xf32>
    %762 = arith.mulf %761, %576 : vector<8x256xf32>
    %763 = arith.addf %758, %762 : vector<8x256xf32>
    %cst_214 = arith.constant 0.000000e+00 : f32
    %764 = vector.broadcast %cst_214 : f32 to vector<8x256xf32>
    %765 = arith.subf %764, %538 : vector<8x256xf32>
    %766 = math.exp %765 : vector<8x256xf32>
    %cst_215 = arith.constant 1.000000e+00 : f32
    %767 = vector.broadcast %cst_215 : f32 to vector<8x256xf32>
    %768 = arith.addf %767, %766 : vector<8x256xf32>
    %cst_216 = arith.constant 1.000000e+00 : f32
    %769 = vector.broadcast %cst_216 : f32 to vector<8x256xf32>
    %770 = arith.divf %769, %768 : vector<8x256xf32>
    %771 = arith.mulf %538, %770 : vector<8x256xf32>
    %772 = arith.mulf %763, %771 : vector<8x256xf32>
    %773 = arith.truncf %772 : vector<8x256xf32> to vector<8x256xbf16>
    %c2_217 = arith.constant 2 : index
    %c0_218 = arith.constant 0 : index
    %c0_219 = arith.constant 0 : index
    %774 = vector.load %arg11[%c2_217, %c0_218, %c0_219] : memref<3x128x256xbf16, #tpu.memory_space<vmem>>, vector<1x128x256xbf16>
    %775 = vector.shape_cast %774 : vector<1x128x256xbf16> to vector<128x256xbf16>
    %cst_220 = arith.constant dense<0.000000e+00> : vector<8x128xf32>
    %776 = tpu.matmul %773, %775, %cst_220 {dimension_numbers = #tpu.dot_dimension_numbers<[1], [1], [0], [0], [0, 0, 1, 0], [], []>} : vector<8x256xbf16>, vector<128x256xbf16>, vector<8x128xf32> -> vector<8x128xf32>
    %777 = arith.addf %518, %776 : vector<8x128xf32>
    %778 = arith.truncf %777 : vector<8x128xf32> to vector<8x128xbf16>
    %c0_221 = arith.constant 0 : index
    %c0_222 = arith.constant 0 : index
    %779 = vector.load %arg12[%c0_221, %c0_222] : memref<128x128xbf16, #tpu.memory_space<vmem>>, vector<128x128xbf16>
    %cst_223 = arith.constant dense<0.000000e+00> : vector<8x128xf32>
    %780 = tpu.matmul %778, %779, %cst_223 {dimension_numbers = #tpu.dot_dimension_numbers<[1], [1], [0], [0], [0, 0, 1, 0], [], []>} : vector<8x128xbf16>, vector<128x128xbf16>, vector<8x128xf32> -> vector<8x128xf32>
    %c0_224 = arith.constant 0 : index
    %c0_225 = arith.constant 0 : index
    %781 = vector.load %arg13[%c0_224, %c0_225] : memref<1x128xf32, #tpu.memory_space<vmem>>, vector<1x128xf32>
    %782 = vector.broadcast %781 : vector<1x128xf32> to vector<8x128xf32>
    %783 = arith.addf %780, %782 : vector<8x128xf32>
    %c0_226 = arith.constant 0 : index
    %c0_227 = arith.constant 0 : index
    %784 = vector.load %arg14[%c0_226, %c0_227] : memref<8x128xf32, #tpu.memory_space<vmem>>, vector<8x128xf32>
    tpu.vector_store %arg14[%c0_226, %c0_227], %783 {strides = array<i32>} : memref<8x128xf32, #tpu.memory_space<vmem>>, vector<8x128xf32>,
    return
  }
  func.func @transform_0(%arg0: i32) -> (i32, i32) {
    %c0_i32 = arith.constant 0 : i32
    %c0_i32_0 = arith.constant 0 : i32
    return %arg0, %c0_i32 : i32, i32
  }
  func.func @transform_1(%arg0: i32) -> (i32, i32, i32) {
    %c0_i32 = arith.constant 0 : i32
    %c0_i32_0 = arith.constant 0 : i32
    %c0_i32_1 = arith.constant 0 : i32
    %c0_i32_2 = arith.constant 0 : i32
    return %c0_i32, %c0_i32_0, %c0_i32_1 : i32, i32, i32
  }
  func.func @transform_2(%arg0: i32) -> (i32, i32, i32) {
    %c0_i32 = arith.constant 0 : i32
    %c0_i32_0 = arith.constant 0 : i32
    %c0_i32_1 = arith.constant 0 : i32
    %c0_i32_2 = arith.constant 0 : i32
    return %c0_i32, %c0_i32_0, %c0_i32_1 : i32, i32, i32
  }
  func.func @transform_3(%arg0: i32) -> (i32, i32, i32) {
    %c0_i32 = arith.constant 0 : i32
    %c0_i32_0 = arith.constant 0 : i32
    %c0_i32_1 = arith.constant 0 : i32
    %c0_i32_2 = arith.constant 0 : i32
    return %c0_i32, %c0_i32_0, %c0_i32_1 : i32, i32, i32
  }
  func.func @transform_4(%arg0: i32) -> (i32, i32, i32) {
    %c0_i32 = arith.constant 0 : i32
    %c0_i32_0 = arith.constant 0 : i32
    %c0_i32_1 = arith.constant 0 : i32
    %c0_i32_2 = arith.constant 0 : i32
    return %c0_i32, %c0_i32_0, %c0_i32_1 : i32, i32, i32
  }
  func.func @transform_5(%arg0: i32) -> (i32, i32, i32) {
    %c0_i32 = arith.constant 0 : i32
    %c0_i32_0 = arith.constant 0 : i32
    %c0_i32_1 = arith.constant 0 : i32
    %c0_i32_2 = arith.constant 0 : i32
    return %c0_i32, %c0_i32_0, %c0_i32_1 : i32, i32, i32
  }
  func.func @transform_6(%arg0: i32) -> (i32, i32, i32) {
    %c0_i32 = arith.constant 0 : i32
    %c0_i32_0 = arith.constant 0 : i32
    %c0_i32_1 = arith.constant 0 : i32
    %c0_i32_2 = arith.constant 0 : i32
    return %c0_i32, %c0_i32_0, %c0_i32_1 : i32, i32, i32
  }
  func.func @transform_7(%arg0: i32) -> (i32, i32, i32) {
    %c0_i32 = arith.constant 0 : i32
    %c0_i32_0 = arith.constant 0 : i32
    %c0_i32_1 = arith.constant 0 : i32
    %c0_i32_2 = arith.constant 0 : i32
    return %c0_i32, %c0_i32_0, %c0_i32_1 : i32, i32, i32
  }
  func.func @transform_8(%arg0: i32) -> (i32, i32, i32) {
    %c0_i32 = arith.constant 0 : i32
    %c0_i32_0 = arith.constant 0 : i32
    %c0_i32_1 = arith.constant 0 : i32
    %c0_i32_2 = arith.constant 0 : i32
    return %c0_i32, %c0_i32_0, %c0_i32_1 : i32, i32, i32
  }
  func.func @transform_9(%arg0: i32) -> (i32, i32, i32) {
    %c0_i32 = arith.constant 0 : i32
    %c0_i32_0 = arith.constant 0 : i32
    %c0_i32_1 = arith.constant 0 : i32
    %c0_i32_2 = arith.constant 0 : i32
    return %c0_i32, %c0_i32_0, %c0_i32_1 : i32, i32, i32
  }
  func.func @transform_10(%arg0: i32) -> (i32, i32, i32) {
    %c0_i32 = arith.constant 0 : i32
    %c0_i32_0 = arith.constant 0 : i32
    %c0_i32_1 = arith.constant 0 : i32
    %c0_i32_2 = arith.constant 0 : i32
    return %c0_i32, %c0_i32_0, %c0_i32_1 : i32, i32, i32
  }
  func.func @transform_11(%arg0: i32) -> (i32, i32) {
    %c0_i32 = arith.constant 0 : i32
    %c0_i32_0 = arith.constant 0 : i32
    %c0_i32_1 = arith.constant 0 : i32
    return %c0_i32, %c0_i32_0 : i32, i32
  }
  func.func @transform_12(%arg0: i32) -> (i32, i32) {
    %c0_i32 = arith.constant 0 : i32
    %c0_i32_0 = arith.constant 0 : i32
    %c0_i32_1 = arith.constant 0 : i32
    return %c0_i32, %c0_i32_0 : i32, i32
  }
  func.func @transform_13(%arg0: i32) -> (i32, i32) {
    %c0_i32 = arith.constant 0 : i32
    %c0_i32_0 = arith.constant 0 : i32
    return %arg0, %c0_i32 : i32, i32
  }
}

</mosaic_0001>

<bundles_post_ra>
// kernel: mamba_model_forward.1
= control target key start
LH: loop header
LB: loop body
LE: loop exit
PB: predicated region body
PF: predicated region fallthrough
CT: control target
= control target key end

     0   :  { %s10094_s0 = inlined_call_operand.vmem [shape: f32[16,128], index: 0, kind: input, shape index: {}]   ;;  %s10095_s1 = inlined_call_operand.vmem [shape: f32[3,1,128], index: 1, kind: input, shape index: {}]   ;;  %s10096_s2 = inlined_call_operand.vmem [shape: bf16[3,512,128], index: 2, kind: input, shape index: {}]   ;;  %s10097_s3 = inlined_call_operand.vmem [shape: f32[3,4,256], index: 3, kind: input, shape index: {}]   ;;  %s10098_s4 = inlined_call_operand.vmem [shape: f32[3,1,256], index: 4, kind: input, shape index: {}]   ;;  %s10099_s5 = inlined_call_operand.vmem [shape: bf16[3,40,256], index: 5, kind: input, shape index: {}]   ;;  %s10100_s6 = inlined_call_operand.vmem [shape: bf16[3,256,8], index: 6, kind: input, shape index: {}]   ;;  %s10101_s7 = inlined_call_operand.vmem [shape: f32[3,1,256], index: 7, kind: input, shape index: {}]   ;;  %s10102_s8 = inlined_call_operand.vmem [shape: f32[3,16,256], index: 8, kind: input, shape index: {}]   ;;  %s10103_s9 = inlined_call_operand.vmem [shape: f32[3,1,256], index: 9, kind: input, shape index: {}]   ;;  %s10104_s10 = inlined_call_operand.vmem [shape: bf16[3,128,256], index: 10, kind: input, shape index: {}]   ;;  %s10105_s11 = inlined_call_operand.vmem [shape: bf16[128,128], index: 11, kind: input, shape index: {}]   ;;  %s10106_s12 = inlined_call_operand.vmem [shape: f32[1,128], index: 12, kind: input, shape index: {}]   ;;  %s10107_s13 = inlined_call_operand.hbm [shape: f32[16,128], index: 13, kind: output, shape index: {}]  }
   0x1   :  { %10202 = sst [smem:[#allocation35_spill]] %s10094_s0 }
   0x2   :  { %18 = vsyncpa [#allocation4], 0 }
   0x3   :  { %20 = vsyncpa [#allocation4 + $0x1], 0  ;;  %s7555_s25 = smov 0   ;;  %s7557_s26 = smov 0  }
   0x4   :  { %s7559_s27 = smov 0   ;;  %s7561_s28 = smov 0  }
   0x5 LB: > { %10203 = sst [smem:[#allocation6_spill]] %s7467_s27  ;;  %s7576_s29 = sadd.s32 4294967295, %s7471_s28   ;;  %s7471_s28 = sphi %s7561_s28, %s10351_s28   ;;  %s7467_s27 = sphi %s7559_s27, %s10353_s27   ;;  %s7463_s26 = sphi %s7557_s26, %s10355_s26   ;;  %s7459_s25 = sphi %s7555_s25, %s10354_s25  }
   0x6   : > { %s6045_s30 = sadd.s32 4294967294, %s7471_s28   ;;  %s7580_s14 = sadd.s32 1, %s7471_s28  }
   0x7   : > { %10204 = sst [smem:[#allocation7_spill]] %s7580_s14  ;;  %s311_s15 = sadd.s32 1, %s7467_s27 }
   0x8   : > { %s308_s16 = ssub.s32 %s7471_s28, %s7580_s14  ;;  %p321_p0 = scmp.ne.s32.totalorder %s7467_s27, %s7463_s26 }
   0x9   : > { %p309_p1 = scmp.eq.s32.totalorder %s308_s16, 0  ;;  %p322_p2 = scmp.eq.s32.totalorder %s7576_s29, 1 }
   0xa   : > { %p327_p3 = scmp.ne.s32.totalorder %s7463_s26, %s7459_s25  ;;  %p328_p4 = scmp.eq.s32.totalorder %s6045_s30, 1 }
   0xb   : > { %s7591_s17 = scalar_select %p309_p1, %s7467_s27, %s311_s15  }
   0xc   : > { %p7593_p5 = por %p322_p2, %p321_p0  ;;  %p7597_p6 = por %p328_p4, %p327_p3 }
   0xd   : > { %10205 = sst [smem:[#allocation8_spill]] %s7591_s17  ;;  %p6048_p7 = scmp.ge.s32.totalorder %s7471_s28, 1 }
   0xe   : > { %s10207_s19 = scalar_select %p7597_p6, 1, 0 }
   0xf   : > { %p389_p8 = scmp.lt.s32.totalorder %s7471_s28, 3 }
  0x10   : > { %10208 = sst [smem:[#allocation9_spill]] %s10207_s19 }
  0x11   : > { %p390_p9 = pnand %p6048_p7, %p389_p8 }
  0x13   : > { %393 = sbr.rel (%p390_p9) target bundleno = 3779 (0xec3), region = 72 }
  0x18   : > { %p432_p10 = scmp.lt.s32.totalorder %s7576_s29, 1  ;;  %v6892_v0 = vld [vmem:[%s10096_s2 + $0x78] sm:$0xff]   ;;  %v6896_v4 = vld [vmem:[%s10096_s2 + $0x70] sm:$0xff]   ;;  %s10209_s0 = sld [smem:[#allocation35_spill]]  ;;  %v6900_v10 = vld [vmem:[%s10096_s2 + $0x68] sm:$0xff]   ;;  %vm1180_vm0 = vcmask 64512   ;;  %v10127_v62 = vlaneseq }
  0x19   : > { %v6893_v1 = vld [vmem:[%s10096_s2 + $0xf8] sm:$0xff]   ;;  %6532 = vmatprep.subr.bf16.mxu0 %v6892_v0  ;;  %v6897_v5 = vld [vmem:[%s10096_s2 + $0xf0] sm:$0xff]   ;;  %v6901_v11 = vld [vmem:[%s10096_s2 + $0xe8] sm:$0xff]   ;;  %vm835_vm1 = vcmask 1040384   ;;  %vm864_vm2 = vcmask 1041408   ;;  %vm893_vm3 = vcmask 1042432  }
  0x1a   : > { %s433_s24 = scalar_select %p432_p10, %s7576_s29, 1  ;;  %v6894_v2 = vld [vmem:[%s10096_s2 + $0x38] sm:$0xff]   ;;  %6550 = vmatprep.subr.bf16.mxu1 %v6893_v1  ;;  %v6898_v8 = vld [vmem:[%s10096_s2 + $0x30] sm:$0xff]   ;;  %v6902_v12 = vld [vmem:[%s10096_s2 + $0x28] sm:$0xff]   ;;  %v7770_v1 = vshrl.u32 %v10127_v62, 7  ;;  %vm7483_vm11 = vmmov 0  }
  0x1b   : > { %v6895_v3 = vld [vmem:[%s10096_s2 + $0xb8] sm:$0xff]   ;;  %6533 = vmatpush3.bf16.xpose.msra.mxu0 %v6894_v2  ;;  %v6899_v9 = vld [vmem:[%s10096_s2 + $0xb0] sm:$0xff]   ;;  %v6903_v13 = vld [vmem:[%s10096_s2 + $0xa8] sm:$0xff]  }
  0x1c   : > { %s6050_s27 = sshll.u32 %s433_s24, 3  ;;  %6551 = vmatpush3.bf16.xpose.msra.mxu1 %v6895_v3  ;;  %6534 = vmatprep.subr.bf16.mxu0 %v6896_v4  ;;  %v6904_v14 = vld [vmem:[%s10096_s2 + $0x60] sm:$0xff]   ;;  %v6908_v18 = vld [vmem:[%s10096_s2 + $0x58] sm:$0xff]   ;;  %v6912_v22 = vld [vmem:[%s10096_s2 + $0x50] sm:$0xff]   ;;  %v7777_v3 = vsub.s32 3, %v7770_v1 }
  0x1d   : > { %6552 = vmatprep.subr.bf16.mxu1 %v6897_v5  ;;  %v6905_v15 = vld [vmem:[%s10096_s2 + $0xe0] sm:$0xff]   ;;  %v6909_v19 = vld [vmem:[%s10096_s2 + $0xd8] sm:$0xff]   ;;  %v6913_v23 = vld [vmem:[%s10096_s2 + $0xd0] sm:$0xff]   ;;  %v7785_v5 = vsub.s32 2, %v7770_v1 }
  0x1e   : > { %s7623_s23 = scalar_lea.vmem %s10209_s0, %s6050_s27  ;;  %v6906_v16 = vld [vmem:[%s10096_s2 + $0x20] sm:$0xff]   ;;  %v6910_v20 = vld [vmem:[%s10096_s2 + $0x18] sm:$0xff]   ;;  %v6914_v24 = vld [vmem:[%s10096_s2 + $0x10] sm:$0xff]   ;;  %10210 = vst [vmem:[#allocation10_spill] sm:$0xff] %v7777_v3  ;;  %s429_s0 = sand.u32 1, %s7463_s26  }
  0x1f   : > { %v7629_v6 = vld [vmem:[%s7623_s23] sm:$0xff]  ;;  %v6911_v21 = vld [vmem:[%s10096_s2 + $0x98] sm:$0xff]   ;;  %v6915_v25 = vld [vmem:[%s10096_s2 + $0x90] sm:$0xff]   ;;  %10211 = vst [vmem:[#allocation11_spill] sm:$0xff] %v7785_v5  ;;  %s6049_s19 = sshll.u32 %s429_s0, 3  ;;  %s5973_s22 = scalar_lea.sflag [#allocation4], %s429_s0 }
  0x20   : > { %v438_v7 = vmul.f32 %v7629_v6, %v7629_v6  ;;  %v6907_v17 = vld [vmem:[%s10096_s2 + $0xa0] sm:$0xff]   ;;  %v6916_v26 = vld [vmem:[%s10096_s2 + $0x48] sm:$0xff]   ;;  %v6932_v45 = vld [vmem:[%s10100_s6 + $0x78] sm:$0xff]   ;;  %s431_s24 = scalar_lea.vmem [#allocation3], %s6049_s19 }
  0x21   : > { %v6917_v27 = vld [vmem:[%s10096_s2 + $0xc8] sm:$0xff]   ;;  %v6920_v30 = vld [vmem:[%s10096_s2 + $0x40] sm:$0xff]   ;;  %v6933_v46 = vld [vmem:[%s10100_s6 + $0x38] sm:$0xff]   ;;  %s5986_s27 = sshll.u32 %s431_s24, 4  ;;  %s10055_s27 = int_to_ptr.vmem [resolvable:$true] %s5986_s27 }
  0x22   : > { %439 = vadd.xlane.f32.xlu0 %v438_v7  ;;  %v6918_v28 = vld [vmem:[%s10096_s2 + $0x8] sm:$0xff]   ;;  %v6921_v31 = vld [vmem:[%s10096_s2 + $0xc0] sm:$0xff]   ;;  %v6934_v47 = vld [vmem:[%s10100_s6 + $0x70] sm:$0xff]   ;;  %v1206_v48 = vsel %vm1180_vm0, %v6933_v46, 0  ;;  %s7411_s30 = scalar_lea.vmem %s10055_s27, 128 }
  0x23   : > { %6535 = vmatpush3.bf16.xpose.msra.mxu0 %v6898_v8  ;;  %v6919_v29 = vld [vmem:[%s10096_s2 + $0x88] sm:$0xff]   ;;  %v6922_v32 = vld [vmem:[%s10096_s2] sm:$0xff]   ;;  %v6935_v49 = vld [vmem:[%s10100_s6 + $0x30] sm:$0xff]   ;;  %v7792_v8 = vsub.s32 7, %v7770_v1  ;;  %p7412_p11 = scmp.ne.s32.totalorder %s10055_s27, %s7411_s30 }
  0x24   : > { %6553 = vmatpush3.bf16.xpose.msra.mxu1 %v6899_v9  ;;  %6536 = vmatprep.subr.bf16.mxu0 %v6900_v10  ;;  %v6923_v33 = vld [vmem:[%s10096_s2 + $0x80] sm:$0xff]   ;;  %v1203_v50 = vsel %vm1180_vm0, %v6935_v49, 0  ;;  %v6936_v51 = vld [vmem:[%s10100_s6 + $0x68] sm:$0xff]   ;;  %v6940_v57 = vld [vmem:[%s10100_s6 + $0x58] sm:$0xff]   ;;  %v7797_v10 = vsub.s32 0, %v7770_v1 }
  0x25   : > { %6554 = vmatprep.subr.bf16.mxu1 %v6901_v11  ;;  %v6051_v38 = vld [vmem:[%s10095_s1] ss:$0 sm:$0xff]  ;;  %v6937_v52 = vld [vmem:[%s10100_s6 + $0x28] sm:$0xff]   ;;  %v6941_v58 = vld [vmem:[%s10100_s6 + $0x18] sm:$0xff]   ;;  %10212 = vst [vmem:[#allocation12_spill] sm:$0xff] %v7792_v8  ;;  %v7800_v11 = vsub.s32 1, %v7770_v1  ;;  %p7413_p12 = pnand %p7412_p11, %p7593_p5 }
  0x26   : > { %v934_v42 = vld [vmem:[%s10099_s5] sm:$0xff]  ;;  %v1200_v53 = vsel %vm1180_vm0, %v6937_v52, 0  ;;  %v1194_v59 = vsel %vm1180_vm0, %v6941_v58, 0  ;;  %v6942_v60 = vld [vmem:[%s10100_s6 + $0x50] sm:$0xff]   ;;  %v6944_v0 = vld [vmem:[%s10100_s6 + $0x48] sm:$0xff]   ;;  %10213 = vst [vmem:[#allocation13_spill] sm:$0xff] %v7797_v10 }
  0x27   : > { %v6084_v43 = vcombine.low %v934_v42, %v934_v42  ;;  %v6085_v44 = vcombine.high %v934_v42, %v934_v42  ;;  %v6938_v54 = vld [vmem:[%s10100_s6 + $0x60] sm:$0xff]   ;;  %v6943_v61 = vld [vmem:[%s10100_s6 + $0x10] sm:$0xff]   ;;  %v6945_v2 = vld [vmem:[%s10100_s6 + $0x8] sm:$0xff]   ;;  %10214 = vst [vmem:[#allocation14_spill] sm:$0xff] %v7800_v11  ;;  %p7414_p13 = pneg %p7413_p12 }
  0x28   : > { %v6939_v55 = vld [vmem:[%s10100_s6 + $0x20] sm:$0xff]   ;;  %v1191_v63 = vsel %vm1180_vm0, %v6943_v61, 0 }
  0x29   : > { %v1197_v56 = vsel %vm1180_vm0, %v6939_v55, 0  ;;  %v7782_v4 = vld [vmem:[%s10097_s3] sm:$0xff] }
  0x2a   : > { %v6946_v7 = vld [vmem:[%s10100_s6 + $0x40] sm:$0xff]   ;;  %v798_v9 = vrot.slane %v7782_v4, %v7777_v3 }
  0x2b   : > { %6537 = vmatpush3.bf16.xpose.msra.mxu0 %v6902_v12  ;;  %v815_v12 = vld [vmem:[%s10098_s4] sm:$0x3] }
  0x2c   : > { %6555 = vmatpush3.bf16.xpose.msra.mxu1 %v6903_v13  ;;  %6538 = vmatprep.subr.bf16.mxu0 %v6904_v14  ;;  %v841_v13 = vrot.slane %v7782_v4, %v7785_v5  ;;  %v6947_v14 = vld [vmem:[%s10100_s6] sm:$0xff]  }
  0x2d   : > { %6556 = vmatprep.subr.bf16.mxu1 %v6905_v15  ;;  %v802_v15 = vrot.slane %v7782_v4, %v7792_v8 }
  0x33   : > { %6539 = vmatpush3.bf16.xpose.msra.mxu0 %v6906_v16  ;;  %v7814_v16 = vsub.s32 6, %v7770_v1 }
  0x34   : > { %6557 = vmatpush3.bf16.xpose.msra.mxu1 %v6907_v17  ;;  %6540 = vmatprep.subr.bf16.mxu0 %v6908_v18  ;;  %v808_v17 = vrot.slane %v798_v9, %v7777_v3  ;;  %v820_v18 = vrot.slane %v815_v12, %v7797_v10 }
  0x35   : > { %6558 = vmatprep.subr.bf16.mxu1 %v6909_v19  ;;  %v870_v19 = vrot.slane %v7782_v4, %v7800_v11 }
  0x3b   : > { %6541 = vmatpush3.bf16.xpose.msra.mxu0 %v6910_v20  ;;  %v899_v20 = vrot.slane %v7782_v4, %v7797_v10 }
  0x3c   : > { %6559 = vmatpush3.bf16.xpose.msra.mxu1 %v6911_v21  ;;  %6542 = vmatprep.subr.bf16.mxu0 %v6912_v22  ;;  %v7823_v21 = vsub.s32 5, %v7770_v1  ;;  %v851_v22 = vrot.slane %v841_v13, %v7785_v5 }
  0x3d   : > { %6560 = vmatprep.subr.bf16.mxu1 %v6913_v23  ;;  %v1185_v23 = vsel %vm1180_vm0, %v6947_v14, 0 }
  0x3e   : > { %10215 = vst [vmem:[#allocation15_spill] sm:$0xff] %v7823_v21 }
  0x43   : > { %6543 = vmatpush3.bf16.xpose.msra.mxu0 %v6914_v24 }
  0x44   : > { %6561 = vmatpush3.bf16.xpose.msra.mxu1 %v6915_v25  ;;  %6544 = vmatprep.subr.bf16.mxu0 %v6916_v26  ;;  %v812_v26 = vrot.slane %v802_v15, %v7777_v3 }
  0x45   : > { %6562 = vmatprep.subr.bf16.mxu1 %v6917_v27  ;;  %v845_v27 = vrot.slane %v7782_v4, %v7814_v16 }
  0x4b   : > { %6545 = vmatpush3.bf16.xpose.msra.mxu0 %v6918_v28  ;;  %v7833_v28 = vsub.s32 4, %v7770_v1 }
  0x4c   : > { %6563 = vmatpush3.bf16.xpose.msra.mxu1 %v6919_v29  ;;  %6546 = vmatprep.subr.bf16.mxu0 %v6920_v30 }
  0x4d   : > { %6564 = vmatprep.subr.bf16.mxu1 %v6921_v31  ;;  %10217 = vst [vmem:[#allocation17_spill] sm:$0xff] %v7833_v28 }
  0x53   : > { %6547 = vmatpush3.bf16.xpose.msra.mxu0 %v6922_v32 }
  0x54   : > { %6565 = vmatpush3.bf16.xpose.msra.mxu1 %v6923_v33  ;;  %6723 = vmatprep.subr.msk.bf16.mxu0 %vm1180_vm0, %v6932_v45  ;;  %v880_v33 = vrot.slane %v870_v19, %v7800_v11  ;;  %v903_v45 = vrot.slane %v7782_v4, %v7833_v28 }
  0x55   : > { %960 = vmatprep.subr.bf16.mxu1 %v6085_v44  ;;  %v855_v44 = vrot.slane %v845_v27, %v7785_v5 }
  0xab   : > { %v440_v34 = vpop.xlane.xlu0 %439 }
  0xac   : > { %v442_v35 = vmul.f32 0.0078125, %v440_v34  ;;  %v909_v34 = vrot.slane %v899_v20, %v7797_v10 }
  0xae   : > { %v443_v36 = vadd.f32 1e-05, %v442_v35 }
  0xb0   : > { %7140 = vrsqrt.f32 %v443_v36  ;;  %v874_v36 = vrot.slane %v7782_v4, %v7823_v21 }
  0xbd   : > { %v7141_v37 = vpop.eup %7140 }
  0xbe   : > { %v445_v39 = vmul.f32 %v7141_v37, %v7629_v6  ;;  %v1188_v6 = vsel %vm1180_vm0, %v6945_v2, 0 }
  0xc0   : > { %v453_v40 = vmul.f32 %v6051_v38, %v445_v39 }
  0xc2   : > { %v454_v41 = vpack.c.bf16 %v453_v40, %v453_v40 }
  0xc4   : > { %6548 = vmatprep.mubr.bf16.mxu0 %v454_v41  ;;  %6566 = vmatprep.mubr.bf16.mxu1 %v454_v41 }
  0xc5   : > { %6549 = vmatmul.mubr.bf16.vlgmr.msra.gmra.mxu0 %v454_v41  ;;  %6567 = vmatmul.mubr.bf16.vlgmr.msra.gmra.mxu1 %v454_v41  ;;  %v824_v41 = vrot.slane %v815_v12, %v7800_v11 }
  0xc6   : > { %961 = vmatpush1.bf16.xpose.msra.mxu1 %v6084_v43  ;;  %6569 = vmatpush3.bf16.xpose.msra.mxu0 %v1206_v48 }
  0xc7   : > { %6724 = vmatprep.subr.msk.bf16.mxu0 %vm1180_vm0, %v6934_v47 }
  0xce   : > { %6571 = vmatpush3.bf16.xpose.msra.mxu0 %v1203_v50 }
  0xcf   : > { %6725 = vmatprep.subr.msk.bf16.mxu0 %vm1180_vm0, %v6936_v51 }
  0xd6   : > { %6573 = vmatpush3.bf16.xpose.msra.mxu0 %v1200_v53 }
  0xd7   : > { %6726 = vmatprep.subr.msk.bf16.mxu0 %vm1180_vm0, %v6938_v54  ;;  %v884_v54 = vrot.slane %v874_v36, %v7800_v11  ;;  %v10123_v36 = vmov 1  }
  0xd8   : > { %6798 = vset.pattern.permute.xlu1 %v10123_v36 }
  0xde   : > { %6575 = vmatpush3.bf16.xpose.msra.mxu0 %v1197_v56 }
  0xdf   : > { %6727 = vmatprep.subr.msk.bf16.mxu0 %vm1180_vm0, %v6940_v57 }
  0xe6   : > { %6577 = vmatpush3.bf16.xpose.msra.mxu0 %v1194_v59 }
  0xe7   : > { %6728 = vmatprep.subr.msk.bf16.mxu0 %vm1180_vm0, %v6942_v60 }
  0xee   : > { %6579 = vmatpush3.bf16.xpose.msra.mxu0 %v1191_v63 }
  0xef   : > { %6729 = vmatprep.subr.msk.bf16.mxu0 %vm1180_vm0, %v6944_v0  ;;  %v913_v0 = vrot.slane %v903_v45, %v7797_v10 }
  0xf6   : > { %6581 = vmatpush3.bf16.xpose.msra.mxu0 %v1188_v6 }
  0xf7   : > { %6730 = vmatprep.subr.msk.bf16.mxu0 %vm1180_vm0, %v6946_v7 }
  0xfe   : > { %6583 = vmatpush3.bf16.xpose.msra.mxu0 %v1185_v23 }
 0x185   : > { %v745_v24 = vpop.f32.mrf.mxu0  ;;  %v7827_v25 = vpop.f32.mrf.mxu1 }
 0x186   : > { %10216 = vst [vmem:[#allocation16_spill] sm:$0xff] %v7827_v25  ;;  %v813_v29 = vmul.f32 %v808_v17, %v745_v24  ;;  %v831_v30 = vrot.slane %v745_v24, 7  ;;  %v860_v31 = vrot.slane %v745_v24, 6  ;;  %v889_v32 = vrot.slane %v745_v24, 5 }
 0x187   : > { %v747_v35 = vpop.f32.mrf.mxu0  ;;  %v7839_v37 = vpop.f32.mrf.mxu1 }
 0x188   : > { %10218 = vst [vmem:[#allocation18_spill] sm:$0xff] %v7839_v37  ;;  %v827_v38 = vadd.f32 %v820_v18, %v813_v29  ;;  %v836_v39 = vsel %vm835_vm1, 0.0, %v831_v30  ;;  %v865_v40 = vsel %vm864_vm2, 0.0, %v860_v31  ;;  %v894_v43 = vsel %vm893_vm3, 0.0, %v889_v32  ;;  %v6928_v31 = vld [vmem:[%s10099_s5 + $0xc] ss:$8 sps:$4 sm:$0xff]  }
 0x189   : > { %v856_v42 = vmul.f32 %v851_v22, %v836_v39  ;;  %v749_v46 = vpop.f32.mrf.mxu0  ;;  %v790_v47 = vpop.f32.mrf.mxu1  ;;  %v814_v48 = vmul.f32 %v812_v26, %v747_v35  ;;  %v832_v49 = vrot.slane %v747_v35, 7  ;;  %v861_v50 = vrot.slane %v747_v35, 6 }
 0x18a   : > { %v890_v51 = vrot.slane %v747_v35, 5  ;;  %v885_v53 = vmul.f32 %v880_v33, %v865_v40  ;;  %v914_v61 = vmul.f32 %v909_v34, %v894_v43  ;;  %v6926_v33 = vld [vmem:[%s10099_s5 + $0x8] ss:$8 sps:$4 sm:$0xff]   ;;  %v6929_v34 = vld [vmem:[%s10099_s5 + $0x1c] ss:$8 sps:$4 sm:$0xff]   ;;  %v10121_v47 = vmov 2  }
 0x18b   : > { %v858_v52 = vadd.f32 %v856_v42, %v827_v38  ;;  %v750_v55 = vpop.f32.mrf.mxu0  ;;  %v791_v56 = vpop.f32.mrf.mxu1  ;;  %v828_v57 = vadd.f32 %v824_v41, %v814_v48  ;;  %v837_v58 = vsel %vm835_vm1, 0.0, %v832_v49  ;;  %v866_v59 = vsel %vm864_vm2, 0.0, %v861_v50  ;;  %v6931_v35 = vld [vmem:[%s10099_s5 + $0x18] ss:$8 sps:$4 sm:$0xff]  }
 0x18c   : > { %v857_v63 = vmul.f32 %v855_v44, %v837_v58  ;;  %v895_v2 = vsel %vm893_vm3, 0.0, %v890_v51  ;;  %v886_v7 = vmul.f32 %v884_v54, %v866_v59  ;;  %v10113_v38 = vmov 0  }
 0x18d   : > { %v887_v60 = vadd.f32 %v885_v53, %v858_v52  ;;  %v915_v13 = vmul.f32 %v913_v0, %v895_v2  ;;  %6797 = vset.pattern.permute.xlu0 %v10113_v38  ;;  %v10125_v48 = vmov 6   ;;  %v10117_v51 = vmov 3  }
 0x18e   : > { %v859_v6 = vadd.f32 %v857_v63, %v828_v57  ;;  %v10119_v55 = vmov 4   ;;  %v10111_v56 = vmov 5   ;;  %v10115_v57 = vmov 7  }
 0x18f   : > { %v916_v4 = vadd.f32 %v914_v61, %v887_v60  ;;  %v1088_v61 = vld [vmem:[%s10101_s7] sm:$0x3] }
 0x190   : > { %v888_v12 = vadd.f32 %v886_v7, %v859_v6  ;;  %v1093_v0 = vrot.slane %v1088_v61, %v7797_v10  ;;  %v1097_v2 = vrot.slane %v1088_v61, %v7800_v11 }
 0x191   : > { %v918_v9 = vsub.f32 0.0, %v916_v4 }
 0x192   : > { %v917_v15 = vadd.f32 %v915_v13, %v888_v12 }
 0x193   : > { %v920_v14 = vmul.f32 1.442695, %v918_v9 }
 0x194   : > { %v919_v17 = vsub.f32 0.0, %v917_v15 }
 0x195   : > { %7142 = vpow2.f32 %v920_v14 }
 0x196   : > { %v922_v18 = vmul.f32 1.442695, %v919_v17 }
 0x198   : > { %7144 = vpow2.f32 %v922_v18 }
 0x1a2   : > { %v7143_v19 = vpop.eup %7142 }
 0x1a3   : > { %v924_v20 = vadd.f32 1.0, %v7143_v19 }
 0x1a5   : > { %v7145_v22 = vpop.eup %7144  ;;  %7146 = vrcp.f32 %v924_v20 }
 0x1a6   : > { %v925_v23 = vadd.f32 1.0, %v7145_v22 }
 0x1a8   : > { %7148 = vrcp.f32 %v925_v23 }
 0x1b2   : > { %v7147_v24 = vpop.eup %7146 }
 0x1b3   : > { %v7853_v27 = vmul.f32 %v7147_v24, %v916_v4 }
 0x1b5   : > { %v7149_v26 = vpop.eup %7148  ;;  %10219 = vst [vmem:[#allocation19_spill] sm:$0xff] %v7853_v27  ;;  %v932_v32 = vpack.c.bf16 %v7853_v27, %v7853_v27 }
 0x1b6   : > { %v7855_v29 = vmul.f32 %v7149_v26, %v917_v15  ;;  %v6950_v26 = vld [vmem:[%s10104_s10 + $0x74] ss:$8 sps:$4 sm:$0xff]  }
 0x1b8   : > { %10220 = vst [vmem:[#allocation20_spill] sm:$0xff] %v7855_v29  ;;  %v933_v30 = vpack.c.bf16 %v7855_v29, %v7855_v29 }
 0x1ba   : > { %978 = vmatprep.mubr.bf16.mxu1 %v933_v30  ;;  %1020 = vmatprep.subr.bf16.mxu1 %v933_v30  ;;  %v6948_v30 = vld [vmem:[%s10104_s10 + $0x70] ss:$8 sps:$4 sm:$0xff]  }
 0x1bb   : > { %979 = vmatmul.mubr.bf16.vlgmr.msra.gmra.mxu1 %v932_v32 }
 0x1bc   : > { %1021 = vmatpush1.bf16.xpose.msra.mxu1 %v932_v32  ;;  %1038 = vmatprep.mubr.bf16.mxu1 %v6928_v31 }
 0x1bd   : > { %2208 = vmatprep.subr.bf16.mxu1 %v6950_v26 }
 0x1c3   : > { %1039 = vmatmul.mubr.bf16.vlgmr.msra.gmra.mxu1 %v6926_v33 }
 0x1c4   : > { %1046 = vmatprep.mubr.bf16.mxu1 %v6929_v34  ;;  %2209 = vmatpush1.bf16.xpose.msra.mxu1 %v6948_v30 }
 0x1cb   : > { %1047 = vmatmul.mubr.bf16.gmra.mxu1 %v6931_v35 }
 0x27b   : > { %v980_v39 = vpop.f32.mrf.mxu1 }
 0x27c   : > { %v1055_v40 = vpack.c.bf16 %v980_v39, %v980_v39 }
 0x27d   : > { %v982_v41 = vpop.f32.mrf.mxu1 }
 0x27e   : > { %6584 = vmatprep.mubr.msk.bf16.mxu0 %vm1180_vm0, %v1055_v40  ;;  %v6951_v41 = vld [vmem:[%s10104_s10 + $0x60] ss:$8 sps:$4 sm:$0xff]  }
 0x27f   : > { %v983_v42 = vpop.f32.mrf.mxu1  ;;  %6585 = vmatmul.mubr.msk.bf16.vlgmr.msra.gmra.mxu0 %vm1180_vm0, %v1055_v40  ;;  %v6953_v40 = vld [vmem:[%s10104_s10 + $0x64] ss:$8 sps:$4 sm:$0xff]  }
 0x280   : > { %2210 = vmatprep.subr.bf16.mxu1 %v6953_v40  ;;  %v6962_v40 = vld [vmem:[%s10104_s10 + $0x34] ss:$8 sps:$4 sm:$0xff]  }
 0x281   : > { %v984_v43 = vpop.f32.mrf.mxu1  ;;  %2211 = vmatpush1.bf16.xpose.msra.mxu1 %v6951_v41 }
 0x283   : > { %v1040_v44 = vpop.f32.mrf.mxu1 }
 0x284   : > { %1444 = vperm.xlu1 %6798, %v1040_v44   ;;  %1343 = vperm.xlu0 %6797, %v1040_v44  }
 0x285   : > { %v1042_v45 = vpop.f32.mrf.mxu1 }
 0x286   : > { %v6956_v45 = vld [vmem:[%s10104_s10 + $0x54] ss:$8 sps:$4 sm:$0xff]  }
 0x287   : > { %v1043_v46 = vpop.f32.mrf.mxu1  ;;  %2212 = vmatprep.subr.bf16.mxu1 %v6956_v45 }
 0x288   : > { %6799 = vset.pattern.permute.xlu1 %v10121_v47  ;;  %6811 = vset.pattern.permute.xlu0 %v10125_v48 }
 0x289   : > { %1539 = vperm.xlu1 %6799, %v1040_v44   ;;  %v1045_v49 = vpop.f32.mrf.mxu1  ;;  %1923 = vperm.xlu0 %6811, %v1043_v46  }
 0x28b   : > { %v7879_v50 = vpop.f32.mrf.mxu1 }
 0x28d   : > { %6800 = vset.pattern.permute.xlu1 %v10117_v51  ;;  %v1050_v52 = vpop.f32.mrf.mxu1  ;;  %6813 = vset.pattern.permute.xlu0 %v10113_v38 }
 0x28e   : > { %1634 = vperm.xlu1 %6800, %v1040_v44   ;;  %1361 = vperm.xlu0 %6813, %v7879_v50  }
 0x28f   : > { %v1051_v53 = vpop.f32.mrf.mxu1 }
 0x291   : > { %v1053_v54 = vpop.f32.mrf.mxu1 }
 0x292   : > { %6801 = vset.pattern.permute.xlu1 %v10119_v55  ;;  %6816 = vset.pattern.permute.xlu0 %v10117_v51 }
 0x293   : > { %1729 = vperm.xlu1 %6801, %v1040_v44   ;;  %1650 = vperm.xlu0 %6816, %v7879_v50  }
 0x297   : > { %6802 = vset.pattern.permute.xlu1 %v10111_v56  ;;  %6819 = vset.pattern.permute.xlu0 %v10125_v48 }
 0x298   : > { %1824 = vperm.xlu1 %6802, %v1040_v44   ;;  %1935 = vperm.xlu0 %6819, %v7879_v50  }
 0x29c   : > { %6803 = vset.pattern.permute.xlu1 %v10125_v48  ;;  %6821 = vset.pattern.permute.xlu0 %v10123_v36 }
 0x29d   : > { %1919 = vperm.xlu1 %6803, %v1040_v44   ;;  %1464 = vperm.xlu0 %6821, %v1051_v53  }
 0x2a1   : > { %6804 = vset.pattern.permute.xlu1 %v10115_v57  ;;  %6824 = vset.pattern.permute.xlu0 %v10119_v55 }
 0x2a2   : > { %2014 = vperm.xlu1 %6804, %v1040_v44   ;;  %1749 = vperm.xlu0 %6824, %v1051_v53  }
 0x2a6   : > { %6805 = vset.pattern.permute.xlu1 %v10113_v38  ;;  %6828 = vset.pattern.permute.xlu0 %v10115_v57 }
 0x2a7   : > { %1348 = vperm.xlu1 %6805, %v1043_v46   ;;  %2034 = vperm.xlu0 %6828, %v1051_v53  }
 0x2ab   : > { %6806 = vset.pattern.permute.xlu1 %v10123_v36  ;;  %6829 = vset.pattern.permute.xlu0 %v10113_v38 }
 0x2ac   : > { %1448 = vperm.xlu1 %6806, %v1043_v46  }
 0x2b0   : > { %6807 = vset.pattern.permute.xlu1 %v10121_v47 }
 0x2b1   : > { %1543 = vperm.xlu1 %6807, %v1043_v46  }
 0x2b5   : > { %6808 = vset.pattern.permute.xlu1 %v10117_v51 }
 0x2b6   : > { %1638 = vperm.xlu1 %6808, %v1043_v46  }
 0x2ba   : > { %6809 = vset.pattern.permute.xlu1 %v10119_v55 }
 0x2bb   : > { %1733 = vperm.xlu1 %6809, %v1043_v46  }
 0x2bf   : > { %6810 = vset.pattern.permute.xlu1 %v10111_v56 }
 0x2c0   : > { %1828 = vperm.xlu1 %6810, %v1043_v46  }
 0x2c4   : > { %6812 = vset.pattern.permute.xlu1 %v10115_v57 }
 0x2c5   : > { %2018 = vperm.xlu1 %6812, %v1043_v46   ;;  %v6954_v46 = vld [vmem:[%s10104_s10 + $0x50] ss:$8 sps:$4 sm:$0xff]  }
 0x2c6   : > { %2213 = vmatpush1.bf16.xpose.msra.mxu1 %v6954_v46 }
 0x2c9   : > { %6814 = vset.pattern.permute.xlu1 %v10123_v36  ;;  %v8113_v36 = vld [vmem:[%s10102_s8 + $0x10] sm:$0xff] }
 0x2ca   : > { %1460 = vperm.xlu1 %6814, %v7879_v50  }
 0x2ce   : > { %6815 = vset.pattern.permute.xlu1 %v10121_v47 }
 0x2cf   : > { %1555 = vperm.xlu1 %6815, %v7879_v50  }
 0x2d3   : > { %6817 = vset.pattern.permute.xlu1 %v10119_v55 }
 0x2d4   : > { %1745 = vperm.xlu1 %6817, %v7879_v50  }
 0x2d8   : > { %6818 = vset.pattern.permute.xlu1 %v10111_v56 }
 0x2d9   : > { %1840 = vperm.xlu1 %6818, %v7879_v50  }
 0x2dd   : > { %6820 = vset.pattern.permute.xlu1 %v10113_v38 }
 0x2de   : > { %1366 = vperm.xlu1 %6820, %v1051_v53  }
 0x2e2   : > { %6822 = vset.pattern.permute.xlu1 %v10121_v47 }
 0x2e3   : > { %1559 = vperm.xlu1 %6822, %v1051_v53  }
 0x2e7   : > { %6823 = vset.pattern.permute.xlu1 %v10117_v51  ;;  %v6968_v51 = vld [vmem:[%s10104_s10 + $0x14] ss:$8 sps:$4 sm:$0xff]  }
 0x2e8   : > { %1654 = vperm.xlu1 %6823, %v1051_v53  }
 0x2ec   : > { %6825 = vset.pattern.permute.xlu1 %v10111_v56 }
 0x2ed   : > { %1844 = vperm.xlu1 %6825, %v1051_v53  }
 0x2f1   : > { %6826 = vset.pattern.permute.xlu1 %v10125_v48 }
 0x2f2   : > { %1939 = vperm.xlu1 %6826, %v1051_v53  }
 0x2f6   : > { %6827 = vset.pattern.permute.xlu1 %v10115_v57 }
 0x2f7   : > { %2030 = vperm.xlu1 %6827, %v7879_v50  }
 0x2fb   : > { %6834 = vset.pattern.permute.xlu1 %v10111_v56  ;;  %v6963_v56 = vld [vmem:[%s10104_s10 + $0x20] ss:$8 sps:$4 sm:$0xff]  }
 0x2ff   : > { %v7919_v58 = vpop.permute.xlu1 %1444  ;;  %v1344_v55 = vpop.permute.xlu0 %1343 }
 0x304   : > { %v7921_v59 = vpop.permute.xlu1 %1539 }
 0x309   : > { %v7923_v60 = vpop.permute.xlu1 %1634 }
 0x30e   : > { %v7928_v63 = vpop.permute.xlu1 %1729 }
 0x313   : > { %v7932_v6 = vpop.permute.xlu1 %1824 }
 0x318   : > { %v7934_v19 = vpop.permute.xlu1 %1919 }
 0x319   : > { %10221 = vst [vmem:[#allocation21_spill] sm:$0xff] %v7934_v19 }
 0x31d   : > { %v7936_v24 = vpop.permute.xlu1 %2014 }
 0x31e   : > { %10222 = vst [vmem:[#allocation22_spill] sm:$0xff] %v7936_v24 }
 0x322   : > { %v7944_v31 = vpop.permute.xlu1 %1348 }
 0x327   : > { %v7946_v35 = vpop.permute.xlu1 %1448 }
 0x32c   : > { %v7954_v42 = vpop.permute.xlu1 %1543 }
 0x331   : > { %v7962_v52 = vpop.permute.xlu1 %1638 }
 0x33f   : > { %v1266_v4 = vpop.f32.mrf.mxu0 }
 0x340   : > { %v1267_v7 = vadd.f32 %v1266_v4, %v1093_v0 }
 0x341   : > { %v1268_v9 = vpop.f32.mrf.mxu0 }
 0x342   : > { %v1273_v12 = vand.u32 2147483647, %v1267_v7  ;;  %v1269_v13 = vadd.f32 %v1268_v9, %v1097_v2  ;;  %v1299_v9 = vmax.f32 %v1267_v7, 0.0  ;;  %v7977_v7 = vld [vmem:[%s10102_s8] sm:$0xff] }
 0x343   : > { %v1270_v14 = vpop.f32.mrf.mxu0 }
 0x344   : > { %v1275_v15 = vsub.f32 0.0, %v1273_v12  ;;  %v1274_v17 = vand.u32 2147483647, %v1269_v13 }
 0x345   : > { %v1271_v18 = vpop.f32.mrf.mxu0 }
 0x346   : > { %v1277_v20 = vmul.f32 1.442695, %v1275_v15  ;;  %v1276_v22 = vsub.f32 0.0, %v1274_v17  ;;  %v6959_v17 = vld [vmem:[%s10104_s10 + $0x44] ss:$8 sps:$4 sm:$0xff]  }
 0x347   : > { %2214 = vmatprep.subr.bf16.mxu1 %v6959_v17 }
 0x348   : > { %7150 = vpow2.f32 %v1277_v20  ;;  %v1279_v23 = vmul.f32 1.442695, %v1276_v22  ;;  %v1300_v20 = vmax.f32 %v1269_v13, 0.0  ;;  %v6957_v22 = vld [vmem:[%s10104_s10 + $0x40] ss:$8 sps:$4 sm:$0xff]  }
 0x349   : > { %2215 = vmatpush1.bf16.xpose.msra.mxu1 %v6957_v22 }
 0x34a   : > { %7152 = vpow2.f32 %v1279_v23  ;;  %v7972_v23 = vpop.permute.xlu1 %1733  ;;  %2216 = vmatprep.subr.bf16.mxu1 %v6962_v40 }
 0x34b   : > { %10223 = vst [vmem:[#allocation23_spill] sm:$0xff] %v7972_v23 }
 0x355   : > { %v7151_v32 = vpop.eup %7150 }
 0x356   : > { %v1281_v33 = vadd.f32 1.0, %v7151_v32  ;;  %v1284_v43 = vmul.f32 -0.5, %v7151_v32  ;;  %v1287_v50 = vand.u32 2147483647, %v7151_v32 }
 0x357   : > { %v7153_v34 = vpop.eup %7152 }
 0x358   : > { %7154 = vlog2.f32 %v1281_v33  ;;  %v1290_v39 = vadd.f32 1.0, %v7153_v34  ;;  %v1293_v44 = vmul.f32 -0.5, %v7153_v34  ;;  %v1285_v49 = vadd.f32 1.0, %v1284_v43  ;;  %v7992_v33 = vld [vmem:[%s10102_s8 + $0x8] sm:$0xff] }
 0x359   : > { %v1296_v61 = vand.u32 2147483647, %v7153_v34  ;;  %vm1288_vm4 = vcmp.lt.f32.partialorder %v1287_v50, 0.0004427343  ;;  %v7481_v50 = vmov 1966171168  }
 0x35a   : > { %7156 = vlog2.f32 %v1290_v39  ;;  %v1294_v53 = vadd.f32 1.0, %v1293_v44  ;;  %v1286_v2 = vmul.f32 %v7151_v32, %v1285_v49  ;;  %v6960_v49 = vld [vmem:[%s10104_s10 + $0x30] ss:$8 sps:$4 sm:$0xff]  }
 0x35b   : > { %vm1297_vm5 = vcmp.lt.f32.partialorder %v1296_v61, 0.0004427343  ;;  %2217 = vmatpush1.bf16.xpose.msra.mxu1 %v6960_v49 }
 0x35c   : > { %v1295_v15 = vmul.f32 %v7153_v34, %v1294_v53  ;;  %v1391_v53 = vunpack.c.l.s4 %v7481_v50 }
 0x35e   : > { %v1392_v22 = vunpack.c.0.s8 %v1391_v53 }
 0x360   : > { %v8087_v38 = vsub.s32 %v1392_v22, %v7770_v1 }
 0x362   : > { %10226 = vst [vmem:[#allocation26_spill] sm:$0xff] %v8087_v38 }
 0x365   : > { %v7155_v54 = vpop.eup %7154 }
 0x366   : > { %v1283_v0 = vmul.f32 0.6931472, %v7155_v54  ;;  %v8018_v54 = vpop.permute.xlu1 %1828 }
 0x367   : > { %v7157_v4 = vpop.eup %7156  ;;  %10224 = vst [vmem:[#allocation24_spill] sm:$0xff] %v8018_v54 }
 0x368   : > { %v1289_v12 = vsel %vm1288_vm4, %v1286_v2, %v1283_v0  ;;  %v1292_v14 = vmul.f32 0.6931472, %v7157_v4  ;;  %v6965_v2 = vld [vmem:[%s10104_s10 + $0x24] ss:$8 sps:$4 sm:$0xff]  }
 0x369   : > { %v7967_v18 = vadd.f32 %v1299_v9, %v1289_v12  ;;  %2218 = vmatprep.subr.bf16.mxu1 %v6965_v2 }
 0x36a   : > { %v1298_v26 = vsel %vm1297_vm5, %v1295_v15, %v1292_v14  ;;  %v8059_v49 = vpop.permute.xlu1 %2018  ;;  %2219 = vmatpush1.bf16.xpose.msra.mxu1 %v6963_v56 }
 0x36b   : > { %v7979_v30 = vadd.f32 %v1300_v20, %v1298_v26  ;;  %v7983_v32 = vrot.slane %v7967_v18, %v7797_v10  ;;  %v7987_v13 = vrot.slane %v7967_v18, %v7800_v11  ;;  %v8013_v46 = vrot.slane %v7967_v18, %v7785_v5  ;;  %10225 = vst [vmem:[#allocation25_spill] sm:$0xff] %v8059_v49 }
 0x36c   : > { %v8022_v61 = vmul.f32 %v7967_v18, %v7853_v27  ;;  %v8031_v12 = vrot.slane %v7967_v18, %v7777_v3  ;;  %v8051_v40 = vrot.slane %v7967_v18, %v7833_v28  ;;  %2220 = vmatprep.subr.bf16.mxu1 %v6968_v51 }
 0x36d   : > { %v7996_v34 = vrot.slane %v7979_v30, %v7797_v10  ;;  %v1317_v39 = vmul.f32 %v7983_v32, %v7977_v7  ;;  %v8005_v41 = vrot.slane %v7979_v30, %v7800_v11  ;;  %v1419_v43 = vmul.f32 %v7987_v13, %v7977_v7 }
 0x36e   : > { %v8035_v14 = vmul.f32 %v7979_v30, %v7855_v29  ;;  %v8039_v15 = vrot.slane %v7979_v30, %v7785_v5  ;;  %v1514_v20 = vmul.f32 %v8013_v46, %v7977_v7  ;;  %v8067_v53 = vrot.slane %v8022_v61, %v7800_v11  ;;  %v8115_v48 = vpop.permute.xlu1 %1460 }
 0x36f   : > { %v1318_v44 = vmul.f32 %v7996_v34, %v7992_v33  ;;  %v1321_v45 = vmul.f32 1.442695, %v1317_v39  ;;  %v1420_v0 = vmul.f32 %v8005_v41, %v7992_v33  ;;  %v1423_v9 = vmul.f32 1.442695, %v1419_v43 }
 0x370   : > { %v1515_v26 = vmul.f32 %v8039_v15, %v7992_v33  ;;  %v8047_v39 = vrot.slane %v7979_v30, %v7777_v3  ;;  %v8055_v43 = vrot.slane %v8022_v61, %v7797_v10  ;;  %v8063_v50 = vrot.slane %v8035_v14, %v7797_v10 }
 0x371   : > { %7158 = vpow2.f32 %v1321_v45  ;;  %v1323_v4 = vmul.f32 1.442695, %v1318_v44  ;;  %v1425_v17 = vmul.f32 1.442695, %v1420_v0  ;;  %v1518_v44 = vmul.f32 1.442695, %v1514_v20 }
 0x372   : > { %v1609_v45 = vmul.f32 %v8031_v12, %v7977_v7  ;;  %v8071_v0 = vrot.slane %v8035_v14, %v7800_v11  ;;  %v1610_v2 = vmul.f32 %v8047_v39, %v7992_v33  ;;  %v8081_v20 = vrot.slane %v8035_v14, %v7785_v5  ;;  %v8171_v25 = vpop.permute.xlu1 %1555 }
 0x373   : > { %7160 = vpow2.f32 %v1323_v4  ;;  %v1520_v4 = vmul.f32 1.442695, %v1515_v26  ;;  %v8091_v57 = vrot.slane %v7979_v30, %v7833_v28  ;;  %v8097_v26 = vrot.slane %v7967_v18, %v7823_v21 }
 0x374   : > { %7162 = vpow2.f32 %v1423_v9  ;;  %v8077_v9 = vrot.slane %v8022_v61, %v7785_v5  ;;  %v1613_v47 = vmul.f32 1.442695, %v1609_v45  ;;  %v8104_v1 = vrot.slane %v8022_v61, %v7777_v3 }
 0x375   : > { %7164 = vpow2.f32 %v1425_v17  ;;  %v1704_v17 = vmul.f32 %v8051_v40, %v7977_v7  ;;  %10227 = vst [vmem:[#allocation27_spill] sm:$0xff] %v8097_v26  ;;  %v8108_v22 = vrot.slane %v8035_v14, %v7777_v3  ;;  %v1351_v62 = vmul.f32 %v1344_v55, %v8055_v43  ;;  %v8124_v3 = vld [vmem:[%s10102_s8 + $0x18] sm:$0xff] }
 0x376   : > { %7166 = vpow2.f32 %v1518_v44  ;;  %v1352_v44 = vmul.f32 %v1344_v55, %v8063_v50  ;;  %v1451_v45 = vmul.f32 %v7919_v58, %v8067_v53  ;;  %v1615_v5 = vmul.f32 1.442695, %v1610_v2 }
 0x377   : > { %10228 = vst [vmem:[#allocation28_spill] sm:$0xff] %v8108_v22  ;;  %v8128_v29 = vmul.f32 %v7919_v58, %v8071_v0  ;;  %7168 = vpow2.f32 %v1520_v4  ;;  %v8132_v27 = vmul.f32 %v7921_v59, %v8077_v9  ;;  %v8136_v55 = vmul.f32 %v7921_v59, %v8081_v20 }
 0x378   : > { %v1705_v2 = vmul.f32 %v8091_v57, %v7992_v33  ;;  %v1708_v11 = vmul.f32 1.442695, %v1704_v17  ;;  %v8142_v10 = vrot.slane %v7979_v30, %v7823_v21  ;;  %v1319_v58 = vmul.f32 %v7983_v32, %v8113_v36 }
 0x379   : > { %7170 = vpow2.f32 %v1613_v47  ;;  %v8148_v4 = vmul.f32 %v7923_v60, %v8104_v1  ;;  %v8152_v56 = vmul.f32 %v7923_v60, %v8108_v22  ;;  %v1320_v59 = vmul.f32 %v7996_v34, %v8124_v3 }
 0x37a   : > { %10229 = vst [vmem:[#allocation29_spill] sm:$0xff] %v8142_v10  ;;  %7172 = vpow2.f32 %v1615_v5  ;;  %v8158_v24 = vrot.slane %v8022_v61, %v7833_v28  ;;  %v8162_v47 = vrot.slane %v8035_v14, %v7833_v28  ;;  %v1325_v51 = vmul.f32 1.442695, %v1319_v58  ;;  %v6966_v5 = vld [vmem:[%s10104_s10 + $0x10] ss:$8 sps:$4 sm:$0xff]  }
 0x37b   : > { %v1799_v49 = vmul.f32 %v8097_v26, %v7977_v7  ;;  %v1327_v60 = vmul.f32 1.442695, %v1320_v59  ;;  %v1421_v37 = vmul.f32 %v7987_v13, %v8113_v36  ;;  %7174 = vpow2.f32 %v1708_v11  ;;  %v6971_v59 = vld [vmem:[%s10104_s10 + $0x4] ss:$8 sps:$4 sm:$0xff]   ;;  %v8180_v13 = vpop.permute.xlu0 %1923  ;;  %2221 = vmatpush1.bf16.xpose.msra.mxu1 %v6966_v5 }
 0x37c   : > { %v1710_v19 = vmul.f32 1.442695, %v1705_v2  ;;  %v1800_v58 = vmul.f32 %v8142_v10, %v7992_v33  ;;  %7176 = vpow2.f32 %v1325_v51  ;;  %v1516_v2 = vmul.f32 %v8013_v46, %v8113_v36  ;;  %2222 = vmatprep.subr.bf16.mxu1 %v6971_v59 }
 0x37d   : > { %v1427_v54 = vmul.f32 1.442695, %v1421_v37  ;;  %7178 = vpow2.f32 %v1327_v60  ;;  %v1517_v10 = vmul.f32 %v8039_v15, %v8124_v3  ;;  %v1803_v26 = vmul.f32 1.442695, %v1799_v49 }
 0x37e   : > { %v7159_v17 = vpop.eup %7158  ;;  %v8188_v22 = vrot.slane %v8022_v61, %v7823_v21  ;;  %7180 = vpow2.f32 %v1710_v19  ;;  %v8192_v37 = vmul.f32 %v7928_v63, %v8158_v24  ;;  %v8196_v46 = vmul.f32 %v7928_v63, %v8162_v47 }
 0x37f   : > { %v1337_v32 = vmul.f32 0.0, %v7159_v17  ;;  %v1422_v17 = vmul.f32 %v8005_v41, %v8124_v3  ;;  %v1805_v51 = vmul.f32 1.442695, %v1800_v58  ;;  %v1362_v15 = vpop.permute.xlu0 %1361  ;;  %7182 = vpow2.f32 %v1427_v54  ;;  %v6969_v54 = vld [vmem:[%s10104_s10] ss:$8 sps:$4 sm:$0xff]  }
 0x380   : > { %v7161_v34 = vpop.eup %7160  ;;  %v1522_v49 = vmul.f32 1.442695, %v1516_v2  ;;  %v8202_v19 = vrot.slane %v8035_v14, %v7823_v21  ;;  %v1524_v60 = vmul.f32 1.442695, %v1517_v10  ;;  %v8206_v63 = vrot.slane %v7967_v18, %v7814_v16 }
 0x381   : > { %v1338_v28 = vmul.f32 0.0, %v7161_v34  ;;  %v1355_v8 = vadd.f32 %v1351_v62, %v1337_v32  ;;  %v7163_v38 = vpop.eup %7162  ;;  %v1429_v11 = vmul.f32 1.442695, %v1422_v17  ;;  %v8198_v32 = vpop.permute.xlu1 %1745  ;;  %v1353_v10 = vmul.f32 %v7944_v31, %v8055_v43 }
 0x382   : > { %v7165_v62 = vpop.eup %7164  ;;  %v1354_v58 = vmul.f32 %v7944_v31, %v8063_v50  ;;  %v1611_v59 = vmul.f32 %v8031_v12, %v8113_v36  ;;  %v8229_v2 = vmul.f32 %v7946_v35, %v8067_v53  ;;  %v1894_v31 = vmul.f32 %v8206_v63, %v7977_v7 }
 0x383   : > { %v1356_v41 = vadd.f32 %v1352_v44, %v1338_v28  ;;  %v1439_v23 = vmul.f32 %v7163_v38, %v1355_v8  ;;  %v7167_v44 = vpop.eup %7166  ;;  %7184 = vpow2.f32 %v1429_v11  ;;  %v1612_v43 = vmul.f32 %v8047_v39, %v8124_v3  ;;  %2223 = vmatpush1.bf16.xpose.msra.mxu1 %v6969_v54 }
 0x384   : > { %7186 = vpow2.f32 %v1803_v26  ;;  %v1454_v12 = vmul.f32 %v7946_v35, %v8071_v0  ;;  %v8251_v35 = vmul.f32 %v7954_v42, %v8081_v20 }
 0x385   : > { %v1440_v28 = vmul.f32 %v7165_v62, %v1356_v41  ;;  %v1455_v38 = vadd.f32 %v1451_v45, %v1439_v23  ;;  %v8211_v23 = vmul.f32 %v7932_v6, %v8188_v22  ;;  %v7169_v45 = vpop.eup %7168  ;;  %7188 = vpow2.f32 %v1805_v51  ;;  %v8236_v51 = vpop.permute.xlu0 %1650 }
 0x386   : > { %7190 = vpow2.f32 %v1522_v49  ;;  %v7171_v11 = vpop.eup %7170  ;;  %v8240_v53 = vpop.permute.xlu1 %1840  ;;  %v1369_v49 = vmul.f32 %v1362_v15, %v1355_v8  ;;  %v1619_v0 = vmul.f32 1.442695, %v1612_v43 }
 0x387   : > { %v1456_v5 = vadd.f32 %v8128_v29, %v1440_v28  ;;  %v1534_v34 = vmul.f32 %v7167_v44, %v1455_v38  ;;  %v8222_v29 = vrot.slane %v7979_v30, %v7814_v16  ;;  %7192 = vpow2.f32 %v1524_v60  ;;  %v7173_v50 = vpop.eup %7172 }
 0x388   : > { %v1617_v28 = vmul.f32 1.442695, %v1611_v59  ;;  %v1370_v44 = vmul.f32 %v1362_v15, %v1356_v41  ;;  %v8244_v60 = vmul.f32 %v7954_v42, %v8077_v9  ;;  %v8254_v8 = vmul.f32 %v8115_v48, %v1455_v38 }
 0x389   : > { %v1535_v26 = vmul.f32 %v7169_v45, %v1456_v5  ;;  %v1550_v17 = vadd.f32 %v8132_v27, %v1534_v34  ;;  %v1895_v39 = vmul.f32 %v8222_v29, %v7992_v33  ;;  %v1898_v41 = vmul.f32 1.442695, %v1894_v31 }
 0x38a   : > { %v1706_v9 = vmul.f32 %v8051_v40, %v8113_v36  ;;  %v1707_v15 = vmul.f32 %v8091_v57, %v8124_v3  ;;  %v8261_v59 = vmul.f32 %v8115_v48, %v1456_v5  ;;  %7194 = vpow2.f32 %v1617_v28  ;;  %v1367_v48 = vpop.permute.xlu1 %1366 }
 0x38b   : > { %v1551_v62 = vadd.f32 %v8136_v55, %v1535_v26  ;;  %v1629_v27 = vmul.f32 %v7171_v11, %v1550_v17  ;;  %v7175_v55 = vpop.eup %7174  ;;  %v8265_v20 = vmul.f32 %v8171_v25, %v1550_v17  ;;  %v1900_v11 = vmul.f32 1.442695, %v1895_v39  ;;  %v10230_v17 = vld [vmem:[#allocation28_spill] sm:$0xff] }
 0x38c   : > { %v7177_v54 = vpop.eup %7176  ;;  %v1712_v31 = vmul.f32 1.442695, %v1706_v9  ;;  %7196 = vpow2.f32 %v1619_v0  ;;  %v1714_v57 = vmul.f32 1.442695, %v1707_v15  ;;  %v8275_v28 = vmul.f32 %v7962_v52, %v10230_v17  ;;  %v10232_v17 = vld [vmem:[#allocation23_spill] sm:$0xff] }
 0x38d   : > { %v1630_v34 = vmul.f32 %v7173_v50, %v1551_v62  ;;  %v1645_v45 = vadd.f32 %v8148_v4, %v1629_v27  ;;  %v7179_v26 = vpop.eup %7178  ;;  %v1339_v42 = vmul.f32 0.0, %v7177_v54  ;;  %v8267_v27 = vpop.permute.xlu0 %1935  ;;  %7198 = vpow2.f32 %v1898_v41 }
 0x38e   : > { %v1340_v38 = vmul.f32 0.0, %v7179_v26  ;;  %v7181_v43 = vpop.eup %7180  ;;  %7200 = vpow2.f32 %v1712_v31 }
 0x38f   : > { %v1646_v4 = vadd.f32 %v8152_v56, %v1630_v34  ;;  %v1724_v50 = vmul.f32 %v7175_v55, %v1645_v45  ;;  %v1357_v40 = vadd.f32 %v1353_v10, %v1339_v42  ;;  %v7183_v21 = vpop.eup %7182  ;;  %v8271_v56 = vmul.f32 %v7962_v52, %v8104_v1  ;;  %v10231_v10 = vld [vmem:[#allocation27_spill] sm:$0xff] }
 0x390   : > { %v1358_v5 = vadd.f32 %v1354_v58, %v1340_v38  ;;  %v7185_v39 = vpop.eup %7184  ;;  %v1801_v0 = vmul.f32 %v10231_v10, %v8113_v36  ;;  %7202 = vpow2.f32 %v1900_v11  ;;  %v1563_v1 = vmul.f32 %v8171_v25, %v1551_v62 }
 0x391   : > { %v1725_v34 = vmul.f32 %v7181_v43, %v1646_v4  ;;  %v1371_v55 = vmul.f32 %v1367_v48, %v1357_v40  ;;  %v7187_v54 = vpop.eup %7186  ;;  %v1441_v15 = vmul.f32 %v7183_v21, %v1357_v40  ;;  %v1740_v26 = vadd.f32 %v8192_v37, %v1724_v50  ;;  %v1465_v62 = vpop.permute.xlu0 %1464 }
 0x392   : > { %v1372_v9 = vmul.f32 %v1367_v48, %v1358_v5  ;;  %v1442_v58 = vmul.f32 %v7185_v39, %v1358_v5  ;;  %v8279_v41 = vpop.eup %7188  ;;  %7204 = vpow2.f32 %v1714_v57  ;;  %v8286_v10 = vmul.f32 %v10232_v17, %v8158_v24  ;;  %v1560_v39 = vpop.permute.xlu1 %1559 }
 0x393   : > { %v1373_v52 = vadd.f32 %v1371_v55, %v1369_v49  ;;  %v7191_v42 = vpop.eup %7190  ;;  %v1457_v31 = vadd.f32 %v8229_v2, %v1441_v15  ;;  %v8289_v11 = vadd.f32 %v8196_v46, %v1725_v34  ;;  %v1657_v25 = vmul.f32 %v8236_v51, %v1645_v45 }
 0x394   : > { %v1380_v38 = vadd.f32 %v1372_v9, %v1370_v44  ;;  %v1458_v43 = vadd.f32 %v1454_v12, %v1442_v58  ;;  %v7193_v21 = vpop.eup %7192  ;;  %v1807_v37 = vmul.f32 1.442695, %v1801_v0  ;;  %v1819_v48 = vmul.f32 %v7187_v54, %v1740_v26 }
 0x395   : > { %v1374_v40 = vrot.slane %v1373_v52, 4  ;;  %v1536_v50 = vmul.f32 %v7191_v42, %v1457_v31  ;;  %v1469_v44 = vmul.f32 %v1465_v62, %v1457_v31  ;;  %v1658_v12 = vmul.f32 %v8236_v51, %v1646_v4  ;;  %v10233_v31 = vld [vmem:[#allocation29_spill] sm:$0xff] }
 0x396   : > { %v1381_v49 = vrot.slane %v1380_v38, 4  ;;  %v1537_v57 = vmul.f32 %v7193_v21, %v1458_v43  ;;  %v8295_v24 = vmul.f32 %v10232_v17, %v8162_v47  ;;  %v8298_v46 = vmul.f32 %v8198_v32, %v1740_v26 }
 0x397   : > { %v1375_v2 = vadd.f32 %v1374_v40, %v1373_v52  ;;  %v1552_v45 = vadd.f32 %v8244_v60, %v1536_v50  ;;  %v8304_v55 = vmul.f32 %v8198_v32, %v8289_v11  ;;  %v1470_v54 = vmul.f32 %v1465_v62, %v1458_v43  ;;  %v7195_v4 = vpop.eup %7194 }
 0x398   : > { %v1382_v5 = vadd.f32 %v1381_v49, %v1380_v38  ;;  %v1553_v34 = vadd.f32 %v8251_v35, %v1537_v57  ;;  %v1471_v51 = vadd.f32 %v1469_v44, %v8254_v8  ;;  %7206 = vpow2.f32 %v1807_v37  ;;  %v1655_v57 = vpop.permute.xlu1 %1654 }
 0x399   : > { %v1376_v0 = vrot.slane %v1375_v2, 2  ;;  %v1564_v9 = vmul.f32 %v1560_v39, %v1552_v45  ;;  %v8308_v58 = vadd.f32 %v8211_v23, %v1819_v48  ;;  %v1631_v60 = vmul.f32 %v7195_v4, %v1552_v45  ;;  %v7197_v35 = vpop.eup %7196 }
 0x39a   : > { %v1383_v47 = vrot.slane %v1382_v5, 2  ;;  %v1565_v15 = vmul.f32 %v1560_v39, %v1553_v34  ;;  %v1472_v52 = vrot.slane %v1471_v51, 4  ;;  %v1802_v43 = vmul.f32 %v10233_v31, %v8124_v3  ;;  %v8313_v8 = vpop.eup %7198 }
 0x39b   : > { %v1377_v26 = vadd.f32 %v1376_v0, %v1375_v2  ;;  %v1566_v32 = vadd.f32 %v1564_v9, %v8265_v20  ;;  %v10234_v17 = vlaneseq  ;;  %v10235_v21 = vmov 0  ;;  %v7201_v49 = vpop.eup %7200 }
 0x39c   : > { %v1384_v42 = vadd.f32 %v1383_v47, %v1382_v5  ;;  %v1573_v38 = vadd.f32 %v1565_v15, %v1563_v1  ;;  %v1632_v40 = vmul.f32 %v7197_v35, %v1553_v34  ;;  %v1647_v62 = vadd.f32 %v8271_v56, %v1631_v60 }
 0x39d   : > { %vm8316_vm6 = vcmp.lt.s32.totalorder %v10234_v17, 256  ;;  %v1378_v23 = vrot.slane %v1377_v26, 1  ;;  %v1478_v37 = vadd.f32 %v1470_v54, %v8261_v59  ;;  %v1567_v20 = vrot.slane %v1566_v32, 4  ;;  %v8322_v48 = vpop.eup %7202 }
 0x39e   : > { %v10236_v21 = vsel %vm8316_vm6, 4294967295, %v10235_v21  ;;  %v1385_v50 = vrot.slane %v1384_v42, 1  ;;  %v1574_v1 = vrot.slane %v1573_v38, 4  ;;  %v1473_v44 = vadd.f32 %v1472_v52, %v1471_v51 }
 0x39f   : > { %10237 = vst [vmem:[#allocation28_spill] sm:$0xff] %v10236_v21  ;;  %v1379_v2 = vadd.f32 %v1378_v23, %v1377_v26  ;;  %v1648_v5 = vadd.f32 %v8275_v28, %v1632_v40  ;;  %v1659_v39 = vmul.f32 %v1655_v57, %v1647_v62  ;;  %v1726_v45 = vmul.f32 %v7201_v49, %v1647_v62  ;;  %v7205_v0 = vpop.eup %7204  ;;  %v10238_v23 = vld [vmem:[#allocation26_spill] sm:$0xff] }
 0x3a0   : > { %v1386_v4 = vadd.f32 %v1385_v50, %v1384_v42  ;;  %v1568_v34 = vadd.f32 %v1567_v20, %v1566_v32  ;;  %v1575_v47 = vadd.f32 %v1574_v1, %v1573_v38  ;;  %v1474_v56 = vrot.slane %v1473_v44, 2 }
 0x3a1   : > { %v1660_v9 = vmul.f32 %v1655_v57, %v1648_v5  ;;  %v1661_v59 = vadd.f32 %v1659_v39, %v1657_v25  ;;  %v1727_v54 = vmul.f32 %v7205_v0, %v1648_v5  ;;  %v1479_v15 = vrot.slane %v1478_v37, 4 }
 0x3a2   : > { %v1389_v60 = vcombine.low %v1379_v2, %v1386_v4  ;;  %v1569_v35 = vrot.slane %v1568_v34, 2  ;;  %v1576_v31 = vrot.slane %v1575_v47, 2  ;;  %v1475_v51 = vadd.f32 %v1474_v56, %v1473_v44  ;;  %v10239_v4 = vld [vmem:[#allocation24_spill] sm:$0xff] }
 0x3a3   : > { %v1847_v26 = vmul.f32 %v8240_v53, %v8308_v58  ;;  %v1662_v52 = vrot.slane %v1661_v59, 4  ;;  %v1668_v28 = vadd.f32 %v1660_v9, %v1658_v12  ;;  %v1480_v17 = vadd.f32 %v1479_v15, %v1478_v37 }
 0x3a4   : > { %v1396_v40 = vrot.slane %v1389_v60, %v10238_v23  ;;  %v1570_v42 = vadd.f32 %v1569_v35, %v1568_v34  ;;  %v1577_v32 = vadd.f32 %v1576_v31, %v1575_v47  ;;  %v1742_v38 = vadd.f32 %v8286_v10, %v1726_v45 }
 0x3a5   : > { %v1663_v62 = vadd.f32 %v1662_v52, %v1661_v59  ;;  %v1669_v25 = vrot.slane %v1668_v28, 4  ;;  %v1476_v49 = vrot.slane %v1475_v51, 1  ;;  %v1481_v50 = vrot.slane %v1480_v17, 2  ;;  %v7207_v2 = vpop.eup %7206  ;;  %v8339_v52 = vpop.permute.xlu1 %1844 }
 0x3a6   : > { %v1403_v20 = vrot.slane %v1396_v40, %v10238_v23  ;;  %v1571_v1 = vrot.slane %v1570_v42, 1  ;;  %v1578_v57 = vrot.slane %v1577_v32, 1  ;;  %v8331_v44 = vadd.f32 %v8295_v24, %v1727_v54  ;;  %v1750_v24 = vpop.permute.xlu0 %1749 }
 0x3a7   : > { %v1664_v12 = vrot.slane %v1663_v62, 2  ;;  %v1670_v37 = vadd.f32 %v1669_v25, %v1668_v28  ;;  %v1482_v5 = vadd.f32 %v1481_v50, %v1480_v17  ;;  %v1809_v39 = vmul.f32 1.442695, %v1802_v43 }
 0x3a8   : > { %1409 = vst.msk [vmem:[#allocation2] ss:$8 sm:$0x3] %vm8316_vm6, %v1403_v20  ;;  %v1572_v10 = vadd.f32 %v1571_v1, %v1570_v42  ;;  %v1579_v45 = vadd.f32 %v1578_v57, %v1577_v32  ;;  %v1821_v0 = vmul.f32 %v7207_v2, %v1742_v38  ;;  %v1833_v34 = vmul.f32 %v10239_v4, %v8188_v22 }
 0x3a9   : > { %v1665_v47 = vadd.f32 %v1664_v12, %v1663_v62  ;;  %v1671_v56 = vrot.slane %v1670_v37, 2  ;;  %v1483_v9 = vrot.slane %v1482_v5, 1  ;;  %7208 = vpow2.f32 %v1809_v39 }
 0x3aa   : > { %v1582_v59 = vcombine.low %v1572_v10, %v1579_v45  ;;  %v1477_v54 = vadd.f32 %v1476_v49, %v1475_v51  ;;  %v8337_v15 = vadd.f32 %v1833_v34, %v1821_v0  ;;  %v1754_v60 = vmul.f32 %v1750_v24, %v1742_v38  ;;  %v10240_v45 = vld [vmem:[#allocation12_spill] sm:$0xff] }
 0x3ab   : > { %v1666_v43 = vrot.slane %v1665_v47, 1  ;;  %v1672_v35 = vadd.f32 %v1671_v56, %v1670_v37  ;;  %v1484_v31 = vadd.f32 %v1483_v9, %v1482_v5  ;;  %v1755_v28 = vmul.f32 %v1750_v24, %v8331_v44 }
 0x3ac   : > { %v1589_v17 = vrot.slane %v1582_v59, %v10238_v23  ;;  %v1849_v22 = vmul.f32 %v8339_v52, %v8337_v15  ;;  %v1756_v40 = vadd.f32 %v1754_v60, %v8298_v46  ;;  %v1896_v51 = vmul.f32 %v8206_v63, %v8113_v36 }
 0x3ad   : > { %v1820_v42 = vmul.f32 %v8279_v41, %v8289_v11  ;;  %v1673_v32 = vrot.slane %v1672_v35, 1  ;;  %v1487_v38 = vcombine.low %v1477_v54, %v1484_v31  ;;  %v1763_v62 = vadd.f32 %v1755_v28, %v8304_v55 }
 0x3ae   : > { %v1596_v25 = vrot.slane %v1589_v17, %v10238_v23  ;;  %v1667_v49 = vadd.f32 %v1666_v43, %v1665_v47  ;;  %v1757_v50 = vrot.slane %v1756_v40, 4  ;;  %v1897_v20 = vmul.f32 %v8222_v29, %v8124_v3 }
 0x3af   : > { %v1674_v1 = vadd.f32 %v1673_v32, %v1672_v35  ;;  %v1494_v46 = vrot.slane %v1487_v38, %v10238_v23  ;;  %v1764_v57 = vrot.slane %v1763_v62, 4  ;;  %v1902_v2 = vmul.f32 1.442695, %v1896_v51  ;;  %v10241_v38 = vld [vmem:[#allocation21_spill] sm:$0xff] }
 0x3b0   : > { %v1832_v63 = vmul.f32 %v7932_v6, %v8202_v19  ;;  %1599 = vst.msk [vmem:[#allocation2 + $0x2] ss:$8 sm:$0x3] %vm8316_vm6, %v1596_v25  ;;  %v1851_v41 = vadd.f32 %v1849_v22, %v1847_v26  ;;  %v1758_v11 = vadd.f32 %v1757_v50, %v1756_v40  ;;  %v1904_v55 = vmul.f32 1.442695, %v1897_v20 }
 0x3b1   : > { %v1677_v12 = vcombine.low %v1667_v49, %v1674_v1  ;;  %v1501_v37 = vrot.slane %v1494_v46, %v10238_v23  ;;  %v1765_v5 = vadd.f32 %v1764_v57, %v1763_v62  ;;  %7210 = vpow2.f32 %v1902_v2 }
 0x3b2   : > { %v1836_v29 = vadd.f32 %v1832_v63, %v1820_v42  ;;  %v1759_v39 = vrot.slane %v1758_v11, 2  ;;  %7212 = vpow2.f32 %v1904_v55  ;;  %v1984_v0 = vrot.slane %v7967_v18, %v10240_v45 }
 0x3b3   : > { %v1684_v10 = vrot.slane %v1677_v12, %v10238_v23  ;;  %1504 = vst.msk [vmem:[#allocation2 + $0x1] ss:$8 sm:$0x3] %vm8316_vm6, %v1501_v37  ;;  %v1766_v6 = vrot.slane %v1765_v5, 2  ;;  %v1988_v26 = vrot.slane %v7979_v30, %v10240_v45  ;;  %v1909_v34 = vrot.slane %v8022_v61, %v7814_v16 }
 0x3b4   : > { %v1913_v47 = vrot.slane %v8035_v14, %v7814_v16  ;;  %v1852_v56 = vrot.slane %v1851_v41, 4  ;;  %v1760_v9 = vadd.f32 %v1759_v39, %v1758_v11  ;;  %v1991_v54 = vmul.f32 %v1984_v0, %v8113_v36 }
 0x3b5   : > { %v1691_v24 = vrot.slane %v1684_v10, %v10238_v23  ;;  %v1767_v59 = vadd.f32 %v1766_v6, %v1765_v5  ;;  %v1992_v60 = vmul.f32 %v1988_v26, %v8124_v3  ;;  %v1848_v18 = vmul.f32 %v8240_v53, %v1836_v29 }
 0x3b6   : > { %v7209_v43 = vpop.eup %7208  ;;  %v1834_v30 = vmul.f32 %v10239_v4, %v8202_v19  ;;  %v1761_v35 = vrot.slane %v1760_v9, 1  ;;  %v1989_v31 = vmul.f32 %v1984_v0, %v7977_v7  ;;  %v1997_v22 = vmul.f32 1.442695, %v1991_v54 }
 0x3b7   : > { %1694 = vst.msk [vmem:[#allocation2 + $0x3] ss:$8 sm:$0x3] %vm8316_vm6, %v1691_v24  ;;  %v1822_v28 = vmul.f32 %v7209_v43, %v8331_v44  ;;  %v1768_v17 = vrot.slane %v1767_v59, 1  ;;  %v1999_v40 = vmul.f32 1.442695, %v1992_v60  ;;  %v1914_v3 = vmul.f32 %v8313_v8, %v8308_v58 }
 0x3b8   : > { %v1853_v36 = vadd.f32 %v1852_v56, %v1851_v41  ;;  %v1990_v53 = vmul.f32 %v1988_v26, %v7992_v33  ;;  %v1993_v51 = vmul.f32 1.442695, %v1989_v31  ;;  %v1762_v19 = vadd.f32 %v1761_v35, %v1760_v9  ;;  %v10242_v33 = vld [vmem:[#allocation16_spill] sm:$0xff]  ;;  %v1940_v56 = vpop.permute.xlu1 %1939 }
 0x3b9   : > { %v1838_v42 = vadd.f32 %v1834_v30, %v1822_v28  ;;  %v1769_v4 = vadd.f32 %v1768_v17, %v1767_v59  ;;  %7214 = vpow2.f32 %v1997_v22  ;;  %v1915_v7 = vmul.f32 %v8322_v48, %v1836_v29  ;;  %v10243_v48 = vld [vmem:[#allocation18_spill] sm:$0xff] }
 0x3ba   : > { %7216 = vpow2.f32 %v1999_v40  ;;  %v1995_v32 = vmul.f32 1.442695, %v1990_v53  ;;  %v1926_v44 = vmul.f32 %v10241_v38, %v1909_v34  ;;  %v1927_v58 = vmul.f32 %v10241_v38, %v1913_v47  ;;  %v10245_v17 = vld [vmem:[#allocation22_spill] sm:$0xff]  ;;  %v2035_v38 = vpop.permute.xlu0 %2034 }
 0x3bb   : > { %v1850_v62 = vmul.f32 %v8339_v52, %v1838_v42  ;;  %v1772_v25 = vcombine.low %v1762_v19, %v1769_v4  ;;  %7218 = vpow2.f32 %v1993_v51  ;;  %v1854_v8 = vrot.slane %v1853_v36, 2 }
 0x3bc   : > { %7220 = vpow2.f32 %v1995_v32  ;;  %v2094_v49 = vsub.f32 0.0, %v10242_v33  ;;  %v1930_v50 = vadd.f32 %v1926_v44, %v1914_v3  ;;  %v2095_v57 = vsub.f32 0.0, %v10243_v48 }
 0x3bd   : > { %v1858_v20 = vadd.f32 %v1850_v62, %v1848_v18  ;;  %v1779_v1 = vrot.slane %v1772_v25, %v10238_v23  ;;  %v1931_v2 = vadd.f32 %v1927_v58, %v1915_v7  ;;  %v1928_v55 = vmul.f32 %v8180_v13, %v1909_v34  ;;  %v10244_v18 = vld [vmem:[#allocation25_spill] sm:$0xff] }
 0x3be   : > { %v7211_v46 = vpop.eup %7210  ;;  %v1855_v12 = vadd.f32 %v1854_v8, %v1853_v36  ;;  %v1929_v5 = vmul.f32 %v8180_v13, %v1913_v47  ;;  %v2096_v29 = vmul.f32 1.442695, %v2094_v49  ;;  %v1942_v39 = vmul.f32 %v8267_v27, %v1930_v50 }
 0x3bf   : > { %v7213_v63 = vpop.eup %7212  ;;  %v1859_v41 = vrot.slane %v1858_v20, 4  ;;  %v1786_v52 = vrot.slane %v1779_v1, %v10238_v23  ;;  %v1916_v11 = vmul.f32 %v7211_v46, %v8337_v15  ;;  %v2098_v0 = vmul.f32 1.442695, %v2095_v57  ;;  %v2031_v57 = vpop.permute.xlu1 %2030 }
 0x3c0   : > { %v1917_v37 = vmul.f32 %v7213_v63, %v1838_v42  ;;  %v2004_v26 = vrot.slane %v8022_v61, %v10240_v45  ;;  %v1943_v15 = vmul.f32 %v8267_v27, %v1931_v2  ;;  %v1856_v59 = vrot.slane %v1855_v12, 1 }
 0x3c1   : > { %v1860_v10 = vadd.f32 %v1859_v41, %v1858_v20  ;;  %1789 = vst.msk [vmem:[#allocation2 + $0x4] ss:$8 sm:$0x3] %vm8316_vm6, %v1786_v52  ;;  %v1932_v6 = vadd.f32 %v1928_v55, %v1916_v11  ;;  %v2008_v47 = vrot.slane %v8035_v14, %v10240_v45  ;;  %7222 = vpow2.f32 %v2096_v29 }
 0x3c2   : > { %v1933_v34 = vadd.f32 %v1929_v5, %v1917_v37  ;;  %7224 = vpow2.f32 %v2098_v0  ;;  %v2023_v30 = vmul.f32 %v10244_v18, %v2004_v26  ;;  %v2021_v22 = vmul.f32 %v10245_v17, %v2004_v26 }
 0x3c3   : > { %v1861_v9 = vrot.slane %v1860_v10, 2  ;;  %v1944_v24 = vmul.f32 %v1940_v56, %v1932_v6  ;;  %v1857_v3 = vadd.f32 %v1856_v59, %v1855_v12  ;;  %v2024_v14 = vmul.f32 %v10244_v18, %v2008_v47 }
 0x3c4   : > { %v1945_v13 = vmul.f32 %v1940_v56, %v1933_v34  ;;  %v2022_v25 = vmul.f32 %v10245_v17, %v2008_v47 }
 0x3c5   : > { %v1862_v54 = vadd.f32 %v1861_v9, %v1860_v10  ;;  %v1946_v60 = vadd.f32 %v1944_v24, %v1942_v39 }
 0x3c6   : > { %v7215_v43 = vpop.eup %7214  ;;  %v1953_v35 = vadd.f32 %v1945_v13, %v1943_v15 }
 0x3c7   : > { %v7217_v61 = vpop.eup %7216  ;;  %v1863_v31 = vrot.slane %v1862_v54, 1  ;;  %v1947_v27 = vrot.slane %v1946_v60, 4  ;;  %v2011_v28 = vmul.f32 %v7215_v43, %v1932_v6 }
 0x3c8   : > { %v7219_v40 = vpop.eup %7218  ;;  %v1954_v36 = vrot.slane %v1953_v35, 4  ;;  %v2012_v53 = vmul.f32 %v7217_v61, %v1933_v34 }
 0x3c9   : > { %v7221_v51 = vpop.eup %7220  ;;  %v1864_v42 = vadd.f32 %v1863_v31, %v1862_v54  ;;  %v1948_v19 = vadd.f32 %v1947_v27, %v1946_v60  ;;  %v2027_v4 = vadd.f32 %v2023_v30, %v2011_v28  ;;  %v2009_v7 = vmul.f32 %v7219_v40, %v1930_v50  ;;  %v10246_v40 = vld [vmem:[#allocation13_spill] sm:$0xff] }
 0x3ca   : > { %v1955_v32 = vadd.f32 %v1954_v36, %v1953_v35  ;;  %v2028_v44 = vadd.f32 %v2024_v14, %v2012_v53  ;;  %v2010_v62 = vmul.f32 %v7221_v51, %v1931_v2  ;;  %v10247_v36 = vld [vmem:[#allocation14_spill] sm:$0xff] }
 0x3cb   : > { %v1867_v58 = vcombine.low %v1857_v3, %v1864_v42  ;;  %v1949_v8 = vrot.slane %v1948_v19, 2  ;;  %v2039_v49 = vmul.f32 %v2035_v38, %v2027_v4  ;;  %v2025_v20 = vadd.f32 %v2021_v22, %v2009_v7  ;;  %v2078_v22 = vld [vmem:[%s10103_s9] sm:$0x3]  ;;  %v10248_v42 = vld [vmem:[#allocation19_spill] sm:$0xff]  ;;  %v10249_v4 = vld [vmem:[#allocation20_spill] sm:$0xff] }
 0x3cc   : > { %v1956_v1 = vrot.slane %v1955_v32, 2  ;;  %v2040_v46 = vmul.f32 %v2035_v38, %v2028_v44  ;;  %v2026_v63 = vadd.f32 %v2022_v25, %v2010_v62  ;;  %v2083_v3 = vrot.slane %v2078_v22, %v10246_v40 }
 0x3cd   : > { %v1874_v41 = vrot.slane %v1867_v58, %v10238_v23  ;;  %v1950_v52 = vadd.f32 %v1949_v8, %v1948_v19  ;;  %v2037_v11 = vmul.f32 %v2031_v57, %v2025_v20  ;;  %v2087_v53 = vrot.slane %v2078_v22, %v10247_v36 }
 0x3ce   : > { %v1957_v55 = vadd.f32 %v1956_v1, %v1955_v32  ;;  %v2038_v50 = vmul.f32 %v2031_v57, %v2026_v63  ;;  %v7223_v10 = vpop.eup %7222  ;;  %v2090_v19 = vmul.f32 %v2083_v3, %v10248_v42  ;;  %v6973_v57 = vld [vmem:[%s10096_s2 + $0x1f8] sm:$0xff]   ;;  %v6976_v63 = vld [vmem:[%s10096_s2 + $0x170] sm:$0xff]  }
 0x3cf   : > { %v1881_v12 = vrot.slane %v1874_v41, %v10238_v23  ;;  %v1951_v37 = vrot.slane %v1950_v52, 1  ;;  %v2041_v2 = vadd.f32 %v2039_v49, %v2037_v11  ;;  %v7225_v15 = vpop.eup %7224  ;;  %v2100_v47 = vadd.f32 1.0, %v7223_v10  ;;  %v6977_v41 = vld [vmem:[%s10096_s2 + $0x1f0] sm:$0xff]   ;;  %6604 = vmatprep.subr.bf16.mxu1 %v6973_v57  ;;  %v6988_v10 = vld [vmem:[%s10096_s2 + $0x158] sm:$0xff]   ;;  %v7018_v57 = vld [vmem:[%s10100_s6 + $0xe0] sm:$0xff]  }
 0x3d0   : > { %v1958_v5 = vrot.slane %v1957_v55, 1  ;;  %v2048_v29 = vadd.f32 %v2040_v46, %v2038_v50  ;;  %v2101_v60 = vadd.f32 1.0, %v7225_v15  ;;  %v2091_v7 = vmul.f32 %v2087_v53, %v10249_v4  ;;  %v6972_v46 = vld [vmem:[%s10096_s2 + $0x178] sm:$0xff]   ;;  %v6979_v11 = vld [vmem:[%s10096_s2 + $0x1b0] sm:$0xff]   ;;  %v6981_v50 = vld [vmem:[%s10096_s2 + $0x1e8] sm:$0xff]  }
 0x3d1   : > { %1884 = vst.msk [vmem:[#allocation2 + $0x5] ss:$8 sm:$0x3] %vm8316_vm6, %v1881_v12  ;;  %v2042_v39 = vrot.slane %v2041_v2, 4  ;;  %v1952_v6 = vadd.f32 %v1951_v37, %v1950_v52  ;;  %7226 = vrcp.f32 %v2100_v47  ;;  %6586 = vmatprep.subr.bf16.mxu0 %v6972_v46  ;;  %v6978_v52 = vld [vmem:[%s10096_s2 + $0x130] sm:$0xff]   ;;  %v6982_v12 = vld [vmem:[%s10096_s2 + $0x128] sm:$0xff]  }
 0x3d2   : > { %v1959_v0 = vadd.f32 %v1958_v5, %v1957_v55  ;;  %v2049_v26 = vrot.slane %v2048_v29, 4  ;;  %7228 = vrcp.f32 %v2101_v60  ;;  %v6980_v55 = vld [vmem:[%s10096_s2 + $0x168] sm:$0xff]   ;;  %v6985_v5 = vld [vmem:[%s10096_s2 + $0x1e0] sm:$0xff]   ;;  %v6992_v47 = vld [vmem:[%s10096_s2 + $0x150] sm:$0xff]  }
 0x3d3   : > { %v2043_v56 = vadd.f32 %v2042_v39, %v2041_v2  ;;  %v6983_v37 = vld [vmem:[%s10096_s2 + $0x1a8] sm:$0xff]   ;;  %v6984_v2 = vld [vmem:[%s10096_s2 + $0x160] sm:$0xff]   ;;  %v6994_v60 = vld [vmem:[%s10096_s2 + $0x110] sm:$0xff]  }
 0x3d4   : > { %v1962_v34 = vcombine.low %v1952_v6, %v1959_v0  ;;  %v2050_v9 = vadd.f32 %v2049_v26, %v2048_v29  ;;  %v6986_v29 = vld [vmem:[%s10096_s2 + $0x120] sm:$0xff]   ;;  %v6989_v6 = vld [vmem:[%s10096_s2 + $0x1d8] sm:$0xff]  }
 0x3d5   : > { %v2044_v24 = vrot.slane %v2043_v56, 2  ;;  %v6987_v39 = vld [vmem:[%s10096_s2 + $0x1a0] sm:$0xff]   ;;  %v6990_v0 = vld [vmem:[%s10096_s2 + $0x118] sm:$0xff]  }
 0x3d6   : > { %v1969_v59 = vrot.slane %v1962_v34, %v10238_v23  ;;  %v2051_v13 = vrot.slane %v2050_v9, 2  ;;  %v6991_v26 = vld [vmem:[%s10096_s2 + $0x198] sm:$0xff]  }
 0x3d7   : > { %v2045_v54 = vadd.f32 %v2044_v24, %v2043_v56  ;;  %v7410_v56 = vld [vmem:[%s7623_s23] sm:$0xff]  ;;  %s6529_s23 = sshll.u32 %s7576_s29, 7  ;;  %s7484_s29 = smov [#allocation3]  }
 0x3d8   : > { %v1976_v43 = vrot.slane %v1969_v59, %v10238_v23  ;;  %v2052_v18 = vadd.f32 %v2051_v13, %v2050_v9  ;;  %s10053_s21 = scalar_lea.hbm %s10107_s13, %s6529_s23  ;;  %s7415_s15 = sshll.u32 %s7484_s29, 4  ;;  %s7416_s15 = int_to_ptr.vmem [resolvable:$false] %s7415_s15 }
 0x3d9   : > { %v2046_v30 = vrot.slane %v2045_v54, 1  ;;  %s7417_s19 = scalar_lea.vmem %s7416_s15, 256  ;;  %p7418_p0 = scmp.lt.s32.totalorder %s10055_s27, %s7416_s15 }
 0x3da   : > { %1979 = vst.msk [vmem:[#allocation2 + $0x6] ss:$8 sm:$0x3] %vm8316_vm6, %v1976_v43  ;;  %v2053_v35 = vrot.slane %v2052_v18, 1  ;;  %v6995_v43 = vld [vmem:[%s10096_s2 + $0x190] sm:$0xff]   ;;  %p7419_p1 = scmp.lt.s32.totalorder %s7417_s19, %s7411_s30 }
 0x3db   : > { %v2047_v61 = vadd.f32 %v2046_v30, %v2045_v54  ;;  %v6993_v54 = vld [vmem:[%s10096_s2 + $0x1d0] sm:$0xff]   ;;  %v6997_v30 = vld [vmem:[%s10096_s2 + $0x1c8] sm:$0xff]  }
 0x3dc   : > { %v2054_v31 = vadd.f32 %v2053_v35, %v2052_v18  ;;  %v6996_v18 = vld [vmem:[%s10096_s2 + $0x148] sm:$0xff]   ;;  %p7420_p2 = por %p7419_p1, %p7418_p0 }
 0x3dd   : > { %v6998_v35 = vld [vmem:[%s10096_s2 + $0x108] sm:$0xff]  }
 0x3de   : > { %v2057_v27 = vcombine.low %v2047_v61, %v2054_v31  ;;  %v7227_v14 = vpop.eup %7226  ;;  %v6999_v61 = vld [vmem:[%s10096_s2 + $0x188] sm:$0xff]   ;;  %v7000_v31 = vld [vmem:[%s10096_s2 + $0x140] sm:$0xff]   ;;  %p7421_p3 = pnand %p7420_p2, %p7414_p13 }
 0x3df   : > { %v7229_v51 = vpop.eup %7228  ;;  %v2106_v44 = vmul.f32 %v7227_v14, %v10242_v33  ;;  %v6974_v33 = vld [vmem:[%s10096_s2 + $0x138] sm:$0xff]  }
 0x3e0   : > { %v2064_v28 = vrot.slane %v2057_v27, %v10238_v23  ;;  %v2107_v62 = vmul.f32 %v7229_v51, %v10243_v48  ;;  %v6975_v48 = vld [vmem:[%s10096_s2 + $0x1b8] sm:$0xff]   ;;  %6587 = vmatpush3.bf16.xpose.msra.mxu0 %v6974_v33  ;;  %v7001_v27 = vld [vmem:[%s10096_s2 + $0x1c0] sm:$0xff]  }
 0x3e1   : > { %6588 = vmatprep.subr.bf16.mxu0 %v6976_v63  ;;  %v6124_v51 = vld [vmem:[%s10095_s1 + $0x1] ss:$0 sm:$0xff]  ;;  %v7020_v63 = vld [vmem:[%s10100_s6 + $0xd8] sm:$0xff]  }
 0x3e2   : > { %v2071_v17 = vrot.slane %v2064_v28, %v10238_v23  ;;  %v7002_v28 = vld [vmem:[%s10096_s2 + $0x100] sm:$0xff]  }
 0x3e3   : > { %v7019_v33 = vld [vmem:[%s10100_s6 + $0xa0] sm:$0xff]  }
 0x3e4   : > { %2074 = vst.msk [vmem:[#allocation2 + $0x7] ss:$8 sm:$0x3] %vm8316_vm6, %v2071_v17  ;;  %v7003_v17 = vld [vmem:[%s10096_s2 + $0x180] sm:$0xff]  }
 0x3e8   : > { %6589 = vmatpush3.bf16.xpose.msra.mxu0 %v6978_v52 }
 0x3e9   : > { %6590 = vmatprep.subr.bf16.mxu0 %v6980_v55  ;;  %v7023_v55 = vld [vmem:[%s10100_s6 + $0x90] sm:$0xff]  }
 0x3eb   : > { %v2076_v32 = vld [vmem:[#allocation2] sm:$0xff]  ;;  %v2077_v38 = vld [vmem:[#allocation2 + $0x8] sm:$0xff] }
 0x3ec   : > { %v2093_v25 = vadd.f32 %v2091_v7, %v2077_v38  ;;  %v2092_v58 = vadd.f32 %v2090_v19, %v2076_v32  ;;  %v6223_v7 = vld [vmem:[%s10099_s5 + $0x28] sm:$0xff] }
 0x3ed   : > { %v6228_v32 = vcombine.low %v6223_v7, %v6223_v7  ;;  %v6229_v38 = vcombine.high %v6223_v7, %v6223_v7 }
 0x3ee   : > { %v2109_v8 = vmul.f32 %v2107_v62, %v2093_v25  ;;  %v2108_v49 = vmul.f32 %v2106_v44, %v2092_v58  ;;  %v7012_v44 = vld [vmem:[%s10100_s6 + $0xf8] sm:$0xff]   ;;  %v7014_v25 = vld [vmem:[%s10100_s6 + $0xf0] sm:$0xff]  }
 0x3ef   : > { %v7013_v62 = vld [vmem:[%s10100_s6 + $0xb8] sm:$0xff]  }
 0x3f0   : > { %v2111_v20 = vpack.c.bf16 %v2109_v8, %v2109_v8  ;;  %v2110_v1 = vpack.c.bf16 %v2108_v49, %v2108_v49  ;;  %6591 = vmatpush3.bf16.xpose.msra.mxu0 %v6982_v12  ;;  %v3019_v58 = vsel %vm1180_vm0, %v7013_v62, 0  ;;  %v7015_v8 = vld [vmem:[%s10100_s6 + $0xb0] sm:$0xff]   ;;  %v7024_v12 = vld [vmem:[%s10100_s6 + $0xc8] sm:$0xff]  }
 0x3f1   : > { %6592 = vmatprep.subr.bf16.mxu0 %v6984_v2  ;;  %v3016_v49 = vsel %vm1180_vm0, %v7015_v8, 0  ;;  %v6221_v2 = vld [vmem:[%s10097_s3 + $0x8] sm:$0xff] }
 0x3f2   : > { %2240 = vmatprep.mubr.bf16.mxu1 %v2111_v20  ;;  %v7016_v20 = vld [vmem:[%s10100_s6 + $0xe8] sm:$0xff]  }
 0x3f3   : > { %2241 = vmatmul.mubr.bf16.vlgmr.msra.gmra.mxu1 %v2110_v1  ;;  %v7017_v1 = vld [vmem:[%s10100_s6 + $0xa8] sm:$0xff]  }
 0x3f4   : > { %6605 = vmatpush3.bf16.xpose.msra.mxu1 %v6975_v48  ;;  %v3013_v46 = vsel %vm1180_vm0, %v7017_v1, 0  ;;  %v3010_v48 = vsel %vm1180_vm0, %v7019_v33, 0 }
 0x3f5   : > { %6606 = vmatprep.subr.bf16.mxu1 %v6977_v41  ;;  %v7021_v41 = vld [vmem:[%s10100_s6 + $0x98] sm:$0xff]  }
 0x3f6   : > { %v3007_v52 = vsel %vm1180_vm0, %v7021_v41, 0 }
 0x3f8   : > { %6593 = vmatpush3.bf16.xpose.msra.mxu0 %v6986_v29  ;;  %v7026_v29 = vld [vmem:[%s10100_s6 + $0xc0] sm:$0xff]  }
 0x3f9   : > { %6594 = vmatprep.subr.bf16.mxu0 %v6988_v10 }
 0x3fc   : > { %6607 = vmatpush3.bf16.xpose.msra.mxu1 %v6979_v11  ;;  %v7022_v11 = vld [vmem:[%s10100_s6 + $0xd0] sm:$0xff]  }
 0x3fd   : > { %6608 = vmatprep.subr.bf16.mxu1 %v6981_v50  ;;  %v3004_v50 = vsel %vm1180_vm0, %v7023_v55, 0 }
 0x400   : > { %6595 = vmatpush3.bf16.xpose.msra.mxu0 %v6990_v0  ;;  %v6222_v0 = vld [vmem:[%s10098_s4 + $0x2] sm:$0x3] }
 0x401   : > { %6596 = vmatprep.subr.bf16.mxu0 %v6992_v47 }
 0x404   : > { %6609 = vmatpush3.bf16.xpose.msra.mxu1 %v6983_v37  ;;  %v7025_v37 = vld [vmem:[%s10100_s6 + $0x88] sm:$0xff]  }
 0x405   : > { %6610 = vmatprep.subr.bf16.mxu1 %v6985_v5  ;;  %v3001_v5 = vsel %vm1180_vm0, %v7025_v37, 0 }
 0x408   : > { %6597 = vmatpush3.bf16.xpose.msra.mxu0 %v6994_v60 }
 0x409   : > { %6598 = vmatprep.subr.bf16.mxu0 %v6996_v18 }
 0x40c   : > { %6611 = vmatpush3.bf16.xpose.msra.mxu1 %v6987_v39  ;;  %v10251_v39 = vld [vmem:[#allocation10_spill] sm:$0xff] }
 0x40d   : > { %6612 = vmatprep.subr.bf16.mxu1 %v6989_v6  ;;  %v2611_v10 = vrot.slane %v6221_v2, %v10251_v39  ;;  %v7027_v6 = vld [vmem:[%s10100_s6 + $0x80] sm:$0xff]  }
 0x40e   : > { %v2998_v47 = vsel %vm1180_vm0, %v7027_v6, 0 }
 0x410   : > { %6599 = vmatpush3.bf16.xpose.msra.mxu0 %v6998_v35 }
 0x411   : > { %6600 = vmatprep.subr.bf16.mxu0 %v7000_v31 }
 0x414   : > { %6613 = vmatpush3.bf16.xpose.msra.mxu1 %v6991_v26  ;;  %v10252_v26 = vld [vmem:[#allocation11_spill] sm:$0xff] }
 0x415   : > { %6614 = vmatprep.subr.bf16.mxu1 %v6993_v54 }
 0x418   : > { %6601 = vmatpush3.bf16.xpose.msra.mxu0 %v7002_v28 }
 0x419   : > { %6731 = vmatprep.subr.msk.bf16.mxu0 %vm1180_vm0, %v7012_v44  ;;  %v10256_v44 = vld [vmem:[#allocation17_spill] sm:$0xff] }
 0x41a   : > { %v2714_v62 = vrot.slane %v6221_v2, %v10256_v44 }
 0x41c   : > { %6615 = vmatpush3.bf16.xpose.msra.mxu1 %v6995_v43  ;;  %v2724_v37 = vrot.slane %v2714_v62, %v10246_v40 }
 0x41d   : > { %6616 = vmatprep.subr.bf16.mxu1 %v6997_v30  ;;  %v2658_v30 = vrot.slane %v6221_v2, %v7814_v16 }
 0x424   : > { %6617 = vmatpush3.bf16.xpose.msra.mxu1 %v6999_v61 }
 0x425   : > { %6618 = vmatprep.subr.bf16.mxu1 %v7001_v27 }
 0x42c   : > { %6619 = vmatpush3.bf16.xpose.msra.mxu1 %v7003_v17 }
 0x42d   : > { %2772 = vmatprep.subr.bf16.mxu1 %v6229_v38  ;;  %v2668_v38 = vrot.slane %v2658_v30, %v10252_v26 }
 0x4b3   : > { %v2242_v15 = vpop.f32.mrf.mxu1 }
 0x4b4   : > { %v8489_v34 = vadd.f32 %v7410_v56, %v2242_v15  ;;  %v2654_v15 = vrot.slane %v6221_v2, %v10252_v26  ;;  %v2615_v56 = vrot.slane %v6221_v2, %v10240_v45 }
 0x4b5   : > { %v2244_v9 = vpop.f32.mrf.mxu1 }
 0x4b6   : > { %10250 = vst [vmem:[#allocation27_spill] sm:$0xff] %v8489_v34  ;;  %v2249_v24 = vmul.f32 %v8489_v34, %v8489_v34  ;;  %v2621_v9 = vrot.slane %v2611_v10, %v10251_v39  ;;  %v2664_v60 = vrot.slane %v2654_v15, %v10252_v26  ;;  %v2625_v18 = vrot.slane %v2615_v56, %v10251_v39 }
 0x4b7   : > { %v2245_v59 = vpop.f32.mrf.mxu1 }
 0x4b8   : > { %2250 = vadd.xlane.f32.xlu1 %v2249_v24  ;;  %v2682_v24 = vrot.slane %v6221_v2, %v10247_v36  ;;  %v2710_v59 = vrot.slane %v6221_v2, %v10246_v40 }
 0x4b9   : > { %v2246_v13 = vpop.f32.mrf.mxu1 }
 0x4ba   : > { %v2634_v13 = vrot.slane %v6222_v0, %v10246_v40  ;;  %v2692_v28 = vrot.slane %v2682_v24, %v10247_v36  ;;  %v2720_v17 = vrot.slane %v2710_v59, %v10246_v40 }
 0x541   : > { %v2251_v22 = vpop.xlane.xlu1 %2250 }
 0x542   : > { %v2252_v3 = vmul.f32 0.0078125, %v2251_v22 }
 0x544   : > { %v2253_v53 = vadd.f32 1e-05, %v2252_v3  ;;  %v10254_v3 = vld [vmem:[#allocation15_spill] sm:$0xff] }
 0x546   : > { %7230 = vrsqrt.f32 %v2253_v53  ;;  %v2686_v53 = vrot.slane %v6221_v2, %v10254_v3 }
 0x548   : > { %v2696_v33 = vrot.slane %v2686_v53, %v10247_v36  ;;  %v7011_v53 = vld [vmem:[%s10099_s5 + $0x40] ss:$8 sps:$4 sm:$0xff]  }
 0x553   : > { %v7231_v14 = vpop.eup %7230 }
 0x554   : > { %v2255_v42 = vmul.f32 %v7231_v14, %v8489_v34 }
 0x556   : > { %v2264_v19 = vmul.f32 %v6124_v51, %v2255_v42 }
 0x558   : > { %v2265_v4 = vpack.c.bf16 %v2264_v19, %v2264_v19 }
 0x55a   : > { %6602 = vmatprep.mubr.bf16.mxu0 %v2265_v4  ;;  %6620 = vmatprep.mubr.bf16.mxu1 %v2265_v4 }
 0x55b   : > { %6603 = vmatmul.mubr.bf16.vlgmr.msra.gmra.mxu0 %v2265_v4  ;;  %6621 = vmatmul.mubr.bf16.vlgmr.msra.gmra.mxu1 %v2265_v4  ;;  %v2638_v4 = vrot.slane %v6222_v0, %v10247_v36 }
 0x55c   : > { %2773 = vmatpush1.bf16.xpose.msra.mxu1 %v6228_v32  ;;  %6623 = vmatpush3.bf16.xpose.msra.mxu0 %v3019_v58 }
 0x55d   : > { %6732 = vmatprep.subr.msk.bf16.mxu0 %vm1180_vm0, %v7014_v25 }
 0x564   : > { %6625 = vmatpush3.bf16.xpose.msra.mxu0 %v3016_v49 }
 0x565   : > { %6733 = vmatprep.subr.msk.bf16.mxu0 %vm1180_vm0, %v7016_v20 }
 0x56c   : > { %6627 = vmatpush3.bf16.xpose.msra.mxu0 %v3013_v46 }
 0x56d   : > { %6734 = vmatprep.subr.msk.bf16.mxu0 %vm1180_vm0, %v7018_v57 }
 0x574   : > { %6629 = vmatpush3.bf16.xpose.msra.mxu0 %v3010_v48 }
 0x575   : > { %6735 = vmatprep.subr.msk.bf16.mxu0 %vm1180_vm0, %v7020_v63 }
 0x57c   : > { %6631 = vmatpush3.bf16.xpose.msra.mxu0 %v3007_v52 }
 0x57d   : > { %6736 = vmatprep.subr.msk.bf16.mxu0 %vm1180_vm0, %v7022_v11 }
 0x584   : > { %6633 = vmatpush3.bf16.xpose.msra.mxu0 %v3004_v50 }
 0x585   : > { %6737 = vmatprep.subr.msk.bf16.mxu0 %vm1180_vm0, %v7024_v12 }
 0x58c   : > { %6635 = vmatpush3.bf16.xpose.msra.mxu0 %v3001_v5 }
 0x58d   : > { %6738 = vmatprep.subr.msk.bf16.mxu0 %vm1180_vm0, %v7026_v29 }
 0x594   : > { %6637 = vmatpush3.bf16.xpose.msra.mxu0 %v2998_v47 }
 0x61b   : > { %v2557_v54 = vpop.f32.mrf.mxu0  ;;  %v8614_v43 = vpop.f32.mrf.mxu1 }
 0x61c   : > { %10253 = vst [vmem:[#allocation23_spill] sm:$0xff] %v8614_v43  ;;  %v2626_v35 = vmul.f32 %v2621_v9, %v2557_v54  ;;  %v2645_v61 = vrot.slane %v2557_v54, 7  ;;  %v2673_v31 = vrot.slane %v2557_v54, 6  ;;  %v2701_v27 = vrot.slane %v2557_v54, 5 }
 0x61d   : > { %v2559_v22 = vpop.f32.mrf.mxu0  ;;  %v8621_v14 = vpop.f32.mrf.mxu1 }
 0x61e   : > { %10255 = vst [vmem:[#allocation29_spill] sm:$0xff] %v8621_v14  ;;  %v2641_v51 = vadd.f32 %v2634_v13, %v2626_v35  ;;  %v2649_v42 = vsel %vm835_vm1, 0.0, %v2645_v61  ;;  %v2677_v19 = vsel %vm864_vm2, 0.0, %v2673_v31  ;;  %v2705_v32 = vsel %vm893_vm3, 0.0, %v2701_v27  ;;  %v7008_v27 = vld [vmem:[%s10099_s5 + $0x34] ss:$8 sps:$4 sm:$0xff]  }
 0x61f   : > { %v2669_v7 = vmul.f32 %v2664_v60, %v2649_v42  ;;  %v2561_v25 = vpop.f32.mrf.mxu0  ;;  %v2602_v58 = vpop.f32.mrf.mxu1  ;;  %v2627_v8 = vmul.f32 %v2625_v18, %v2559_v22  ;;  %v2646_v49 = vrot.slane %v2559_v22, 7  ;;  %v2674_v20 = vrot.slane %v2559_v22, 6 }
 0x620   : > { %v2702_v1 = vrot.slane %v2559_v22, 5  ;;  %v2697_v57 = vmul.f32 %v2692_v28, %v2677_v19  ;;  %v2725_v50 = vmul.f32 %v2720_v17, %v2705_v32  ;;  %v7006_v17 = vld [vmem:[%s10099_s5 + $0x30] ss:$8 sps:$4 sm:$0xff]   ;;  %v7009_v22 = vld [vmem:[%s10099_s5 + $0x44] ss:$8 sps:$4 sm:$0xff]   ;;  %v10259_v25 = vmov 6  }
 0x621   : > { %v2671_v46 = vadd.f32 %v2669_v7, %v2641_v51  ;;  %v2562_v48 = vpop.f32.mrf.mxu0  ;;  %v2603_v63 = vpop.f32.mrf.mxu1  ;;  %v2642_v41 = vadd.f32 %v2638_v4, %v2627_v8  ;;  %v2650_v52 = vsel %vm835_vm1, 0.0, %v2646_v49  ;;  %v2678_v11 = vsel %vm864_vm2, 0.0, %v2674_v20 }
 0x622   : > { %v2670_v12 = vmul.f32 %v2668_v38, %v2650_v52  ;;  %v2706_v2 = vsel %vm893_vm3, 0.0, %v2702_v1  ;;  %v2698_v10 = vmul.f32 %v2696_v33, %v2678_v11  ;;  %v10260_v58 = vmov 1   ;;  %v6266_v11 = vld [vmem:[%s10101_s7 + $0x2] sm:$0x3] }
 0x623   : > { %v2699_v55 = vadd.f32 %v2697_v57, %v2671_v46  ;;  %v2726_v15 = vmul.f32 %v2724_v37, %v2706_v2  ;;  %v10261_v20 = vmov 2   ;;  %v10262_v33 = vmov 4  }
 0x624   : > { %v2672_v29 = vadd.f32 %v2670_v12, %v2642_v41  ;;  %v10263_v48 = vmov 3   ;;  %v10264_v63 = vmov 7   ;;  %v10265_v41 = vmov 0  }
 0x625   : > { %v2727_v5 = vadd.f32 %v2725_v50, %v2699_v55  ;;  %v10266_v52 = vmov 5   ;;  %v2907_v55 = vrot.slane %v6266_v11, %v10246_v40  ;;  %v2911_v50 = vrot.slane %v6266_v11, %v10247_v36 }
 0x626   : > { %v2700_v0 = vadd.f32 %v2698_v10, %v2672_v29 }
 0x627   : > { %v2729_v6 = vsub.f32 0.0, %v2727_v5 }
 0x628   : > { %v2728_v9 = vadd.f32 %v2726_v15, %v2700_v0 }
 0x629   : > { %v2731_v56 = vmul.f32 1.442695, %v2729_v6 }
 0x62a   : > { %v2730_v24 = vsub.f32 0.0, %v2728_v9 }
 0x62b   : > { %7232 = vpow2.f32 %v2731_v56 }
 0x62c   : > { %v2733_v59 = vmul.f32 1.442695, %v2730_v24 }
 0x62e   : > { %7234 = vpow2.f32 %v2733_v59 }
 0x638   : > { %v7233_v13 = vpop.eup %7232 }
 0x639   : > { %v2735_v47 = vadd.f32 1.0, %v7233_v13 }
 0x63b   : > { %v7235_v54 = vpop.eup %7234  ;;  %7236 = vrcp.f32 %v2735_v47 }
 0x63c   : > { %v2736_v60 = vadd.f32 1.0, %v7235_v54 }
 0x63e   : > { %7238 = vrcp.f32 %v2736_v60  ;;  %v7030_v60 = vld [vmem:[%s10104_s10 + $0xf4] ss:$8 sps:$4 sm:$0xff]  }
 0x648   : > { %v7237_v18 = vpop.eup %7236 }
 0x649   : > { %v8634_v35 = vmul.f32 %v7237_v18, %v2727_v5  ;;  %v7028_v18 = vld [vmem:[%s10104_s10 + $0xf0] ss:$8 sps:$4 sm:$0xff]  }
 0x64b   : > { %v7239_v30 = vpop.eup %7238  ;;  %10257 = vst [vmem:[#allocation24_spill] sm:$0xff] %v8634_v35  ;;  %v2743_v28 = vpack.c.bf16 %v8634_v35, %v8634_v35 }
 0x64c   : > { %v8636_v61 = vmul.f32 %v7239_v30, %v2728_v9 }
 0x64e   : > { %10258 = vst [vmem:[#allocation21_spill] sm:$0xff] %v8636_v61  ;;  %v2744_v31 = vpack.c.bf16 %v8636_v61, %v8636_v61 }
 0x650   : > { %2790 = vmatprep.mubr.bf16.mxu1 %v2744_v31  ;;  %2832 = vmatprep.subr.bf16.mxu1 %v2744_v31 }
 0x651   : > { %2791 = vmatmul.mubr.bf16.vlgmr.msra.gmra.mxu1 %v2743_v28 }
 0x652   : > { %2833 = vmatpush1.bf16.xpose.msra.mxu1 %v2743_v28  ;;  %2850 = vmatprep.mubr.bf16.mxu1 %v7008_v27 }
 0x653   : > { %4013 = vmatprep.subr.bf16.mxu1 %v7030_v60  ;;  %v7037_v60 = vld [vmem:[%s10104_s10 + $0xc0] ss:$8 sps:$4 sm:$0xff]  }
 0x659   : > { %2851 = vmatmul.mubr.bf16.vlgmr.msra.gmra.mxu1 %v7006_v17 }
 0x65a   : > { %2858 = vmatprep.mubr.bf16.mxu1 %v7009_v22  ;;  %4014 = vmatpush1.bf16.xpose.msra.mxu1 %v7028_v18 }
 0x661   : > { %2859 = vmatmul.mubr.bf16.gmra.mxu1 %v7011_v53  ;;  %v7033_v53 = vld [vmem:[%s10104_s10 + $0xe4] ss:$8 sps:$4 sm:$0xff]  }
 0x662   : > { %4015 = vmatprep.subr.bf16.mxu1 %v7033_v53 }
 0x711   : > { %v2792_v51 = vpop.f32.mrf.mxu1 }
 0x712   : > { %v2867_v42 = vpack.c.bf16 %v2792_v51, %v2792_v51  ;;  %v7031_v51 = vld [vmem:[%s10104_s10 + $0xe0] ss:$8 sps:$4 sm:$0xff]  }
 0x713   : > { %v2794_v19 = vpop.f32.mrf.mxu1  ;;  %4016 = vmatpush1.bf16.xpose.msra.mxu1 %v7031_v51 }
 0x714   : > { %6638 = vmatprep.mubr.msk.bf16.mxu0 %vm1180_vm0, %v2867_v42 }
 0x715   : > { %v2795_v4 = vpop.f32.mrf.mxu1  ;;  %6639 = vmatmul.mubr.msk.bf16.vlgmr.msra.gmra.mxu0 %vm1180_vm0, %v2867_v42 }
 0x717   : > { %v2796_v7 = vpop.f32.mrf.mxu1 }
 0x719   : > { %v2852_v32 = vpop.f32.mrf.mxu1 }
 0x71a   : > { %3630 = vperm.xlu1 %6834, %v2852_v32   ;;  %3157 = vperm.xlu0 %6829, %v2852_v32  }
 0x71b   : > { %v2854_v38 = vpop.f32.mrf.mxu1 }
 0x71d   : > { %v2855_v62 = vpop.f32.mrf.mxu1 }
 0x71e   : > { %6835 = vset.pattern.permute.xlu1 %v10259_v25  ;;  %6830 = vset.pattern.permute.xlu0 %v10260_v58 }
 0x71f   : > { %3724 = vperm.xlu1 %6835, %v2852_v32   ;;  %3254 = vperm.xlu0 %6830, %v2852_v32   ;;  %v2857_v8 = vpop.f32.mrf.mxu1 }
 0x720   : > { %v7036_v8 = vld [vmem:[%s10104_s10 + $0xd4] ss:$8 sps:$4 sm:$0xff]  }
 0x721   : > { %v2860_v49 = vpop.f32.mrf.mxu1  ;;  %4017 = vmatprep.subr.bf16.mxu1 %v7036_v8  ;;  %v8790_v8 = vld [vmem:[%s10102_s8 + $0x38] sm:$0xff] }
 0x723   : > { %6839 = vset.pattern.permute.xlu1 %v10261_v20  ;;  %6831 = vset.pattern.permute.xlu0 %v10261_v20  ;;  %v2862_v1 = vpop.f32.mrf.mxu1 }
 0x724   : > { %3352 = vperm.xlu1 %6839, %v2855_v62   ;;  %3348 = vperm.xlu0 %6831, %v2852_v32  }
 0x725   : > { %v2863_v46 = vpop.f32.mrf.mxu1 }
 0x727   : > { %v2865_v57 = vpop.f32.mrf.mxu1 }
 0x728   : > { %6841 = vset.pattern.permute.xlu1 %v10262_v33  ;;  %6832 = vset.pattern.permute.xlu0 %v10263_v48 }
 0x729   : > { %3540 = vperm.xlu1 %6841, %v2855_v62   ;;  %3442 = vperm.xlu0 %6832, %v2852_v32  }
 0x72d   : > { %6843 = vset.pattern.permute.xlu1 %v10259_v25  ;;  %6833 = vset.pattern.permute.xlu0 %v10262_v33 }
 0x72e   : > { %3728 = vperm.xlu1 %6843, %v2855_v62   ;;  %3536 = vperm.xlu0 %6833, %v2852_v32  }
 0x732   : > { %6844 = vset.pattern.permute.xlu1 %v10264_v63  ;;  %6836 = vset.pattern.permute.xlu0 %v10264_v63 }
 0x733   : > { %3822 = vperm.xlu1 %6844, %v2855_v62   ;;  %3818 = vperm.xlu0 %6836, %v2852_v32  }
 0x737   : > { %6845 = vset.pattern.permute.xlu1 %v10265_v41  ;;  %6837 = vset.pattern.permute.xlu0 %v10265_v41 }
 0x738   : > { %3175 = vperm.xlu1 %6845, %v2860_v49   ;;  %3162 = vperm.xlu0 %6837, %v2855_v62  }
 0x73c   : > { %6846 = vset.pattern.permute.xlu1 %v10260_v58  ;;  %6838 = vset.pattern.permute.xlu0 %v10260_v58 }
 0x73d   : > { %3270 = vperm.xlu1 %6846, %v2860_v49   ;;  %3258 = vperm.xlu0 %6838, %v2855_v62  }
 0x741   : > { %6848 = vset.pattern.permute.xlu1 %v10263_v48  ;;  %6840 = vset.pattern.permute.xlu0 %v10263_v48 }
 0x742   : > { %3458 = vperm.xlu1 %6848, %v2860_v49   ;;  %3446 = vperm.xlu0 %6840, %v2855_v62  }
 0x746   : > { %6849 = vset.pattern.permute.xlu1 %v10262_v33  ;;  %6842 = vset.pattern.permute.xlu0 %v10266_v52 }
 0x747   : > { %3552 = vperm.xlu1 %6849, %v2860_v49   ;;  %3634 = vperm.xlu0 %6842, %v2855_v62  }
 0x74b   : > { %6851 = vset.pattern.permute.xlu1 %v10259_v25  ;;  %6847 = vset.pattern.permute.xlu0 %v10261_v20 }
 0x74c   : > { %3740 = vperm.xlu1 %6851, %v2860_v49   ;;  %3364 = vperm.xlu0 %6847, %v2860_v49  }
 0x750   : > { %6853 = vset.pattern.permute.xlu1 %v10260_v58  ;;  %6850 = vset.pattern.permute.xlu0 %v10266_v52 }
 0x751   : > { %3274 = vperm.xlu1 %6853, %v2863_v46   ;;  %3646 = vperm.xlu0 %6850, %v2860_v49  }
 0x755   : > { %6854 = vset.pattern.permute.xlu1 %v10261_v20  ;;  %6852 = vset.pattern.permute.xlu0 %v10265_v41 }
 0x756   : > { %3368 = vperm.xlu1 %6854, %v2863_v46   ;;  %3180 = vperm.xlu0 %6852, %v2863_v46  }
 0x75a   : > { %6856 = vset.pattern.permute.xlu1 %v10262_v33  ;;  %6855 = vset.pattern.permute.xlu0 %v10263_v48 }
 0x75b   : > { %3556 = vperm.xlu1 %6856, %v2863_v46   ;;  %3462 = vperm.xlu0 %6855, %v2863_v46  }
 0x75f   : > { %6857 = vset.pattern.permute.xlu1 %v10266_v52  ;;  %6858 = vset.pattern.permute.xlu0 %v10259_v25 }
 0x760   : > { %3650 = vperm.xlu1 %6857, %v2863_v46   ;;  %3744 = vperm.xlu0 %6858, %v2863_v46  }
 0x764   : > { %6859 = vset.pattern.permute.xlu1 %v10264_v63  ;;  %6864 = vset.pattern.permute.xlu0 %v10262_v33 }
 0x765   : > { %3834 = vperm.xlu1 %6859, %v2860_v49  }
 0x769   : > { %3838 = vperm.xlu1 %6859, %v2863_v46   ;;  %v7034_v46 = vld [vmem:[%s10104_s10 + $0xd0] ss:$8 sps:$4 sm:$0xff]  }
 0x76a   : > { %4018 = vmatpush1.bf16.xpose.msra.mxu1 %v7034_v46 }
 0x76d   : > { %6860 = vset.pattern.permute.xlu1 %v10265_v41 }
 0x795   : > { %v8695_v59 = vpop.permute.xlu0 %3157  ;;  %v8697_v13 = vpop.permute.xlu1 %3630 }
 0x79a   : > { %v8699_v47 = vpop.permute.xlu0 %3254  ;;  %v8701_v54 = vpop.permute.xlu1 %3724 }
 0x79f   : > { %v8709_v28 = vpop.permute.xlu0 %3348  ;;  %v8711_v17 = vpop.permute.xlu1 %3352 }
 0x7a4   : > { %v8719_v42 = vpop.permute.xlu0 %3442  ;;  %v8721_v19 = vpop.permute.xlu1 %3540 }
 0x7a9   : > { %v8723_v38 = vpop.permute.xlu0 %3536  ;;  %v8728_v49 = vpop.permute.xlu1 %3728 }
 0x7aa   : > { %10267 = vst [vmem:[#allocation16_spill] sm:$0xff] %v8728_v49 }
 0x7d5   : > { %v3079_v12 = vpop.f32.mrf.mxu0 }
 0x7d6   : > { %v3080_v37 = vadd.f32 %v3079_v12, %v2907_v55 }
 0x7d7   : > { %v3081_v2 = vpop.f32.mrf.mxu0 }
 0x7d8   : > { %v3086_v5 = vand.u32 2147483647, %v3080_v37  ;;  %v8692_v29 = vadd.f32 %v3081_v2, %v2911_v50  ;;  %v3112_v2 = vmax.f32 %v3080_v37, 0.0  ;;  %v7039_v37 = vld [vmem:[%s10104_s10 + $0xc4] ss:$8 sps:$4 sm:$0xff]  }
 0x7d9   : > { %v3083_v10 = vpop.f32.mrf.mxu0  ;;  %4019 = vmatprep.subr.bf16.mxu1 %v7039_v37 }
 0x7da   : > { %v3088_v6 = vsub.f32 0.0, %v3086_v5  ;;  %v3087_v0 = vand.u32 2147483647, %v8692_v29  ;;  %4020 = vmatpush1.bf16.xpose.msra.mxu1 %v7037_v60 }
 0x7db   : > { %v3084_v15 = vpop.f32.mrf.mxu0 }
 0x7dc   : > { %v3090_v56 = vmul.f32 1.442695, %v3088_v6  ;;  %v3089_v9 = vsub.f32 0.0, %v3087_v0  ;;  %v3113_v15 = vmax.f32 %v8692_v29, 0.0  ;;  %v8753_v29 = vld [vmem:[%s10102_s8 + $0x30] sm:$0xff] }
 0x7de   : > { %7240 = vpow2.f32 %v3090_v56  ;;  %v3092_v24 = vmul.f32 1.442695, %v3089_v9  ;;  %v3819_v56 = vpop.permute.xlu0 %3818 }
 0x7e0   : > { %7242 = vpow2.f32 %v3092_v24  ;;  %v8736_v24 = vpop.permute.xlu1 %3822 }
 0x7e1   : > { %10268 = vst [vmem:[#allocation18_spill] sm:$0xff] %v8736_v24 }
 0x7eb   : > { %v7241_v30 = vpop.eup %7240 }
 0x7ec   : > { %v3094_v31 = vadd.f32 1.0, %v7241_v30  ;;  %v3097_v4 = vmul.f32 -0.5, %v7241_v30  ;;  %v3100_v62 = vand.u32 2147483647, %v7241_v30 }
 0x7ed   : > { %v7243_v27 = vpop.eup %7242 }
 0x7ee   : > { %7244 = vlog2.f32 %v3094_v31  ;;  %v3103_v22 = vadd.f32 1.0, %v7243_v27  ;;  %v3106_v7 = vmul.f32 -0.5, %v7243_v27  ;;  %v3098_v32 = vadd.f32 1.0, %v3097_v4 }
 0x7ef   : > { %v3109_v11 = vand.u32 2147483647, %v7243_v27  ;;  %vm3101_vm7 = vcmp.lt.f32.partialorder %v3100_v62, 0.0004427343 }
 0x7f0   : > { %7246 = vlog2.f32 %v3103_v22  ;;  %v3107_v1 = vadd.f32 1.0, %v3106_v7  ;;  %v3099_v50 = vmul.f32 %v7241_v30, %v3098_v32  ;;  %v7042_v22 = vld [vmem:[%s10104_s10 + $0xb4] ss:$8 sps:$4 sm:$0xff]  }
 0x7f1   : > { %vm3110_vm8 = vcmp.lt.f32.partialorder %v3109_v11, 0.0004427343  ;;  %v8800_v11 = vld [vmem:[%s10102_s8 + $0x28] sm:$0xff]  ;;  %4021 = vmatprep.subr.bf16.mxu1 %v7042_v22 }
 0x7f2   : > { %v3108_v6 = vmul.f32 %v7243_v27, %v3107_v1  ;;  %v8760_v27 = vld [vmem:[%s10102_s8 + $0x20] sm:$0xff] }
 0x7fb   : > { %v7245_v57 = vpop.eup %7244 }
 0x7fc   : > { %v3096_v55 = vmul.f32 0.6931472, %v7245_v57 }
 0x7fd   : > { %v7247_v12 = vpop.eup %7246 }
 0x7fe   : > { %v3102_v5 = vsel %vm3101_vm7, %v3099_v50, %v3096_v55  ;;  %v3105_v10 = vmul.f32 0.6931472, %v7247_v12 }
 0x7ff   : > { %v8733_v0 = vadd.f32 %v3112_v2, %v3102_v5  ;;  %v3163_v5 = vpop.permute.xlu0 %3162 }
 0x800   : > { %v3111_v9 = vsel %vm3110_vm8, %v3108_v6, %v3105_v10 }
 0x801   : > { %v8746_v18 = vmul.f32 %v8733_v0, %v8634_v35  ;;  %v8748_v30 = vadd.f32 %v3113_v15, %v3111_v9  ;;  %v3126_v31 = vrot.slane %v8733_v0, %v10246_v40  ;;  %v3224_v53 = vrot.slane %v8733_v0, %v10247_v36 }
 0x802   : > { %v8769_v51 = vrot.slane %v8733_v0, %v10252_v26  ;;  %v8773_v4 = vrot.slane %v8733_v0, %v10251_v39  ;;  %v8805_v50 = vrot.slane %v8733_v0, %v10256_v44  ;;  %v8819_v6 = vrot.slane %v8733_v0, %v10254_v3 }
 0x803   : > { %v8777_v7 = vrot.slane %v8746_v18, %v7814_v16  ;;  %v8781_v32 = vmul.f32 %v8748_v30, %v8636_v61  ;;  %v8785_v62 = vrot.slane %v8746_v18, %v10240_v45  ;;  %v3130_v1 = vrot.slane %v8748_v30, %v10246_v40 }
 0x804   : > { %v3133_v46 = vmul.f32 %v8753_v29, %v3126_v31  ;;  %v3146_v57 = vrot.slane %v8746_v18, %v10246_v40  ;;  %v3131_v55 = vmul.f32 %v8760_v27, %v3126_v31  ;;  %v3228_v10 = vrot.slane %v8748_v30, %v10247_v36  ;;  %v8827_v31 = vpop.permute.xlu1 %3175 }
 0x805   : > { %10269 = vst [vmem:[#allocation25_spill] sm:$0xff] %v8785_v62  ;;  %v8809_v12 = vmul.f32 %v8728_v49, %v8777_v7  ;;  %v8813_v2 = vrot.slane %v8781_v32, %v10240_v45  ;;  %v8822_v15 = vmul.f32 %v3819_v56, %v8785_v62  ;;  %v3134_v9 = vmul.f32 %v8790_v8, %v3130_v1 }
 0x806   : > { %v3139_v60 = vmul.f32 1.442695, %v3133_v46  ;;  %v3150_v37 = vrot.slane %v8781_v32, %v10246_v40  ;;  %v8832_v41 = vmul.f32 %v3163_v5, %v3146_v57  ;;  %v3132_v63 = vmul.f32 %v8800_v11, %v3130_v1  ;;  %v7040_v46 = vld [vmem:[%s10104_s10 + $0xb0] ss:$8 sps:$4 sm:$0xff]   ;;  %v7045_v1 = vld [vmem:[%s10104_s10 + $0xa4] ss:$8 sps:$4 sm:$0xff]  }
 0x807   : > { %10270 = vst [vmem:[#allocation22_spill] sm:$0xff] %v8809_v12  ;;  %10271 = vst [vmem:[#allocation19_spill] sm:$0xff] %v8813_v2  ;;  %v8830_v33 = vmul.f32 %v3819_v56, %v8813_v2  ;;  %v3135_v25 = vmul.f32 1.442695, %v3131_v55  ;;  %v3141_v22 = vmul.f32 1.442695, %v3134_v9  ;;  %v8838_v52 = vmul.f32 %v8695_v59, %v3146_v57  ;;  %v3259_v9 = vpop.permute.xlu0 %3258  ;;  %4022 = vmatpush1.bf16.xpose.msra.mxu1 %v7040_v46 }
 0x808   : > { %10272 = vst [vmem:[#allocation20_spill] sm:$0xff] %v8822_v15  ;;  %7248 = vpow2.f32 %v3139_v60  ;;  %v8835_v48 = vmul.f32 %v3163_v5, %v3150_v37  ;;  %v3137_v20 = vmul.f32 1.442695, %v3132_v63  ;;  %v8844_v56 = vmul.f32 %v8695_v59, %v3150_v37  ;;  %v8864_v61 = vpop.permute.xlu1 %3270  ;;  %4023 = vmatprep.subr.bf16.mxu1 %v7045_v1 }
 0x809   : > { %10273 = vst [vmem:[#allocation30_spill] sm:$0xff] %v8830_v33  ;;  %7250 = vpow2.f32 %v3135_v25  ;;  %v3231_v58 = vmul.f32 %v8753_v29, %v3224_v53  ;;  %v3232_v55 = vmul.f32 %v8790_v8, %v3228_v10  ;;  %v3244_v57 = vrot.slane %v8746_v18, %v10247_v36 }
 0x80a   : > { %7252 = vpow2.f32 %v3141_v22  ;;  %v3248_v5 = vrot.slane %v8781_v32, %v10247_v36  ;;  %v3322_v63 = vrot.slane %v8748_v30, %v10252_v26  ;;  %v3325_v59 = vmul.f32 %v8753_v29, %v8769_v51 }
 0x80b   : > { %7254 = vpow2.f32 %v3137_v20  ;;  %v3237_v25 = vmul.f32 1.442695, %v3231_v58  ;;  %v3239_v60 = vmul.f32 1.442695, %v3232_v55  ;;  %v8859_v37 = vmul.f32 %v3259_v9, %v3244_v57 }
 0x80c   : > { %v8861_v22 = vmul.f32 %v3259_v9, %v3248_v5  ;;  %v3229_v34 = vmul.f32 %v8760_v27, %v3224_v53  ;;  %v3326_v58 = vmul.f32 %v8790_v8, %v3322_v63  ;;  %v3331_v20 = vmul.f32 1.442695, %v3325_v59  ;;  %v8897_v59 = vpop.permute.xlu1 %3458 }
 0x80d   : > { %7256 = vpow2.f32 %v3237_v25  ;;  %v3230_v35 = vmul.f32 %v8800_v11, %v3228_v10  ;;  %v8869_v55 = vmul.f32 %v8699_v47, %v3244_v57  ;;  %v8872_v9 = vmul.f32 %v8699_v47, %v3248_v5  ;;  %v7043_v47 = vld [vmem:[%s10104_s10 + $0xa0] ss:$8 sps:$4 sm:$0xff]  }
 0x80e   : > { %7258 = vpow2.f32 %v3239_v60  ;;  %v3233_v36 = vmul.f32 1.442695, %v3229_v34  ;;  %v3333_v53 = vmul.f32 1.442695, %v3326_v58  ;;  %v3323_v46 = vmul.f32 %v8760_v27, %v8769_v51  ;;  %v7048_v51 = vld [vmem:[%s10104_s10 + $0x94] ss:$8 sps:$4 sm:$0xff]  }
 0x80f   : > { %7260 = vpow2.f32 %v3331_v20  ;;  %v3235_v40 = vmul.f32 1.442695, %v3230_v35  ;;  %v3324_v25 = vmul.f32 %v8800_v11, %v3322_v63  ;;  %v3338_v10 = vrot.slane %v8746_v18, %v10252_v26  ;;  %4024 = vmatpush1.bf16.xpose.msra.mxu1 %v7043_v47 }
 0x810   : > { %7262 = vpow2.f32 %v3233_v36  ;;  %v3342_v34 = vrot.slane %v8781_v32, %v10252_v26  ;;  %v3327_v1 = vmul.f32 1.442695, %v3323_v46  ;;  %v3416_v35 = vrot.slane %v8748_v30, %v10251_v39  ;;  %4025 = vmatprep.subr.bf16.mxu1 %v7048_v51 }
 0x811   : > { %7264 = vpow2.f32 %v3333_v53  ;;  %v3419_v36 = vmul.f32 %v8753_v29, %v8773_v4  ;;  %v3329_v57 = vmul.f32 1.442695, %v3324_v25  ;;  %v8892_v5 = vmul.f32 %v8711_v17, %v3338_v10  ;;  %v3447_v53 = vpop.permute.xlu0 %3446 }
 0x812   : > { %7266 = vpow2.f32 %v3235_v40  ;;  %v8895_v63 = vmul.f32 %v8711_v17, %v3342_v34  ;;  %v3420_v60 = vmul.f32 %v8790_v8, %v3416_v35  ;;  %v3432_v20 = vrot.slane %v8746_v18, %v10251_v39 }
 0x813   : > { %7268 = vpow2.f32 %v3327_v1  ;;  %v3425_v58 = vmul.f32 1.442695, %v3419_v36  ;;  %v3436_v40 = vrot.slane %v8781_v32, %v10251_v39  ;;  %v8905_v46 = vmul.f32 %v8709_v28, %v3338_v10 }
 0x814   : > { %7270 = vpow2.f32 %v3329_v57  ;;  %v8908_v17 = vmul.f32 %v8709_v28, %v3342_v34  ;;  %v3427_v1 = vmul.f32 1.442695, %v3420_v60  ;;  %v8910_v26 = vmul.f32 %v3447_v53, %v3432_v20 }
 0x815   : > { %v7249_v25 = vpop.eup %7248  ;;  %7272 = vpow2.f32 %v3425_v58  ;;  %v3417_v36 = vmul.f32 %v8760_v27, %v8773_v4  ;;  %v8914_v24 = vmul.f32 %v3447_v53, %v3436_v40  ;;  %v3418_v10 = vmul.f32 %v8800_v11, %v3416_v35  ;;  %v8928_v35 = vpop.permute.xlu1 %3552 }
 0x816   : > { %v7251_v57 = vpop.eup %7250  ;;  %v3153_v2 = vmul.f32 0.0, %v7249_v25  ;;  %v8918_v39 = vmul.f32 %v8719_v42, %v3432_v20  ;;  %7274 = vpow2.f32 %v3427_v1  ;;  %v8921_v60 = vmul.f32 %v8719_v42, %v3436_v40  ;;  %v7046_v20 = vld [vmem:[%s10104_s10 + $0x90] ss:$8 sps:$4 sm:$0xff]   ;;  %v3635_v40 = vpop.permute.xlu0 %3634 }
 0x817   : > { %v7253_v28 = vpop.eup %7252  ;;  %v3151_v34 = vmul.f32 0.0, %v7251_v57  ;;  %v3421_v47 = vmul.f32 1.442695, %v3417_v36  ;;  %v3423_v51 = vmul.f32 1.442695, %v3418_v10  ;;  %v3620_v53 = vrot.slane %v8746_v18, %v10254_v3  ;;  %4026 = vmatpush1.bf16.xpose.msra.mxu1 %v7046_v20 }
 0x818   : > { %v7255_v58 = vpop.eup %7254  ;;  %v3154_v62 = vmul.f32 0.0, %v7253_v28  ;;  %v8924_v4 = vadd.f32 %v8832_v41, %v3153_v2  ;;  %v3624_v42 = vrot.slane %v8781_v32, %v10254_v3  ;;  %v7051_v41 = vld [vmem:[%s10104_s10 + $0x84] ss:$8 sps:$4 sm:$0xff]   ;;  %v9009_v45 = vrot.slane %v8733_v0, %v7814_v16 }
 0x819   : > { %v3152_v25 = vmul.f32 0.0, %v7255_v58  ;;  %v3169_v1 = vadd.f32 %v8838_v52, %v3151_v34  ;;  %7276 = vpow2.f32 %v3421_v47  ;;  %v8943_v57 = vmul.f32 %v8697_v13, %v3620_v53  ;;  %4027 = vmatprep.subr.bf16.mxu1 %v7051_v41  ;;  %v8979_v33 = vpop.permute.xlu1 %3740 }
 0x81a   : > { %v7257_v2 = vpop.eup %7256  ;;  %v8940_v36 = vadd.f32 %v8835_v48, %v3154_v62  ;;  %7278 = vpow2.f32 %v3423_v51  ;;  %v8945_v10 = vmul.f32 %v3635_v40, %v3620_v53  ;;  %v8953_v58 = vmul.f32 %v8697_v13, %v3624_v42 }
 0x81b   : > { %v7259_v52 = vpop.eup %7258  ;;  %v3170_v28 = vadd.f32 %v8844_v56, %v3152_v25  ;;  %v8949_v34 = vmul.f32 %v8827_v31, %v3169_v1  ;;  %v3251_v47 = vmul.f32 %v7257_v2, %v8924_v4  ;;  %v8956_v62 = vmul.f32 %v3635_v40, %v3624_v42 }
 0x81c   : > { %10274 = vst [vmem:[#allocation31_spill] sm:$0xff] %v8945_v10  ;;  %v7261_v14 = vpop.eup %7260  ;;  %v3252_v48 = vmul.f32 %v7259_v52, %v8940_v36  ;;  %v8960_v51 = vrot.slane %v8748_v30, %v10256_v44  ;;  %v3511_v56 = vmul.f32 %v8760_v27, %v8805_v50  ;;  %v8970_v2 = vrot.slane %v8746_v18, %v10256_v44 }
 0x81d   : > { %10275 = vst [vmem:[#allocation32_spill] sm:$0xff] %v8956_v62  ;;  %v7263_v53 = vpop.eup %7262  ;;  %v8965_v25 = vmul.f32 %v8827_v31, %v3170_v28  ;;  %v3267_v13 = vadd.f32 %v8859_v37, %v3251_v47  ;;  %v8974_v42 = vrot.slane %v8781_v32, %v10256_v44 }
 0x81e   : > { %v7265_v40 = vpop.eup %7264  ;;  %v3268_v52 = vadd.f32 %v8861_v22, %v3252_v48  ;;  %v3249_v43 = vmul.f32 %v7263_v53, %v3169_v1  ;;  %v3512_v20 = vmul.f32 %v8800_v11, %v8960_v51  ;;  %v3515_v31 = vmul.f32 1.442695, %v3511_v56 }
 0x81f   : > { %v7267_v37 = vpop.eup %7266  ;;  %v3345_v47 = vmul.f32 %v7261_v14, %v3267_v13  ;;  %v8983_v18 = vmul.f32 %v8723_v38, %v8970_v2  ;;  %v8987_v44 = vmul.f32 %v8723_v38, %v8974_v42  ;;  %v8991_v22 = vrot.slane %v8748_v30, %v10254_v3  ;;  %v7049_v14 = vld [vmem:[%s10104_s10 + $0x80] ss:$8 sps:$4 sm:$0xff]  }
 0x820   : > { %v7269_v1 = vpop.eup %7268  ;;  %v3346_v41 = vmul.f32 %v7265_v40, %v3268_v52  ;;  %v3250_v48 = vmul.f32 %v7267_v37, %v3170_v28  ;;  %v3265_v56 = vadd.f32 %v8869_v55, %v3249_v43  ;;  %7280 = vpow2.f32 %v3515_v31  ;;  %4028 = vmatpush1.bf16.xpose.msra.mxu1 %v7049_v14 }
 0x821   : > { %v7271_v53 = vpop.eup %7270  ;;  %v3361_v15 = vadd.f32 %v8892_v5, %v3345_v47  ;;  %v3517_v12 = vmul.f32 1.442695, %v3512_v20  ;;  %v3605_v38 = vmul.f32 %v8760_v27, %v8819_v6  ;;  %v3606_v3 = vmul.f32 %v8800_v11, %v8991_v22 }
 0x822   : > { %v7273_v49 = vpop.eup %7272  ;;  %v3266_v28 = vadd.f32 %v8872_v9, %v3250_v48  ;;  %v3343_v40 = vmul.f32 %v7269_v1, %v3265_v56  ;;  %v3277_v43 = vmul.f32 %v8864_v61, %v3265_v56  ;;  %v3362_v55 = vadd.f32 %v8895_v63, %v3346_v41  ;;  %v3275_v9 = vpop.permute.xlu1 %3274 }
 0x823   : > { %v3439_v31 = vmul.f32 %v7273_v49, %v3361_v15  ;;  %7282 = vpow2.f32 %v3517_v12  ;;  %v3609_v37 = vmul.f32 1.442695, %v3605_v38  ;;  %v3611_v62 = vmul.f32 1.442695, %v3606_v3  ;;  %v7275_v5 = vpop.eup %7274  ;;  %v3365_v38 = vpop.permute.xlu0 %3364 }
 0x824   : > { %v3344_v20 = vmul.f32 %v7271_v53, %v3266_v28  ;;  %v3278_v47 = vmul.f32 %v8864_v61, %v3266_v28  ;;  %v3359_v10 = vadd.f32 %v8905_v46, %v3343_v40  ;;  %v3440_v1 = vmul.f32 %v7275_v5, %v3362_v55 }
 0x825   : > { %v9012_v48 = vadd.f32 %v8910_v26, %v3439_v31  ;;  %7284 = vpow2.f32 %v3609_v37  ;;  %v9016_v3 = vrot.slane %v8748_v30, %v7814_v16  ;;  %v3699_v12 = vmul.f32 %v8760_v27, %v9009_v45 }
 0x826   : > { %v7277_v49 = vpop.eup %7276  ;;  %v3360_v61 = vadd.f32 %v8908_v17, %v3344_v20  ;;  %7286 = vpow2.f32 %v3611_v62  ;;  %v9023_v63 = vrot.slane %v8781_v32, %v7814_v16  ;;  %v9026_v26 = vadd.f32 %v8914_v24, %v3440_v1 }
 0x827   : > { %v7279_v46 = vpop.eup %7278  ;;  %v3437_v41 = vmul.f32 %v7277_v49, %v3359_v10  ;;  %v3700_v56 = vmul.f32 %v8800_v11, %v9016_v3  ;;  %v9032_v14 = vmul.f32 %v8701_v54, %v8777_v7  ;;  %v3703_v62 = vmul.f32 1.442695, %v3699_v12  ;;  %v3369_v7 = vpop.permute.xlu1 %3368 }
 0x828   : > { %v3438_v17 = vmul.f32 %v7279_v46, %v3360_v61  ;;  %v9036_v53 = vmul.f32 %v8701_v54, %v9023_v63  ;;  %v3279_v32 = vmul.f32 %v3275_v9, %v3267_v13  ;;  %v3280_v40 = vmul.f32 %v3275_v9, %v3268_v52 }
 0x829   : > { %v3453_v28 = vadd.f32 %v8918_v39, %v3437_v41  ;;  %v3705_v24 = vmul.f32 1.442695, %v3700_v56  ;;  %v3371_v31 = vmul.f32 %v3365_v38, %v3359_v10  ;;  %7288 = vpow2.f32 %v3703_v62 }
 0x82a   : > { %v3454_v37 = vadd.f32 %v8921_v60, %v3438_v17  ;;  %v3281_v5 = vadd.f32 %v3279_v32, %v3277_v43  ;;  %v3372_v20 = vmul.f32 %v3365_v38, %v3360_v61  ;;  %v3288_v49 = vadd.f32 %v3280_v40, %v3278_v47 }
 0x82b   : > { %v9041_v1 = vmul.f32 %v8897_v59, %v3453_v28  ;;  %7290 = vpow2.f32 %v3705_v24  ;;  %v3373_v54 = vmul.f32 %v3369_v7, %v3361_v15  ;;  %v3374_v39 = vmul.f32 %v3369_v7, %v3362_v55 }
 0x82c   : > { %v9044_v13 = vmul.f32 %v8897_v59, %v3454_v37  ;;  %v3282_v12 = vrot.slane %v3281_v5, 4  ;;  %v3513_v10 = vmul.f32 %v8753_v29, %v8805_v50  ;;  %v3289_v60 = vrot.slane %v3288_v49, 4 }
 0x82d   : > { %v7281_v52 = vpop.eup %7280  ;;  %v3375_v9 = vadd.f32 %v3373_v54, %v3371_v31  ;;  %v3514_v43 = vmul.f32 %v8790_v8, %v8960_v51  ;;  %v9052_v61 = vmul.f32 %v8721_v19, %v8970_v2  ;;  %v3382_v46 = vadd.f32 %v3374_v39, %v3372_v20  ;;  %v3647_v54 = vpop.permute.xlu0 %3646 }
 0x82e   : > { %v3531_v47 = vmul.f32 %v7281_v52, %v3453_v28  ;;  %v3283_v15 = vadd.f32 %v3282_v12, %v3281_v5  ;;  %v3519_v59 = vmul.f32 1.442695, %v3513_v10  ;;  %v3290_v41 = vadd.f32 %v3289_v60, %v3288_v49 }
 0x82f   : > { %v3376_v56 = vrot.slane %v3375_v9, 4  ;;  %v3521_v55 = vmul.f32 1.442695, %v3514_v43  ;;  %v9056_v50 = vmul.f32 %v8721_v19, %v8974_v42  ;;  %v3383_v51 = vrot.slane %v3382_v46, 4 }
 0x830   : > { %v7283_v17 = vpop.eup %7282  ;;  %v3547_v62 = vadd.f32 %v8983_v18, %v3531_v47  ;;  %v3284_v32 = vrot.slane %v3283_v15, 2  ;;  %7292 = vpow2.f32 %v3519_v59  ;;  %v3291_v2 = vrot.slane %v3290_v41, 2 }
 0x831   : > { %v3532_v38 = vmul.f32 %v7283_v17, %v3454_v37  ;;  %v3377_v24 = vadd.f32 %v3376_v56, %v3375_v9  ;;  %7294 = vpow2.f32 %v3521_v55  ;;  %v3384_v5 = vadd.f32 %v3383_v51, %v3382_v46 }
 0x832   : > { %v7285_v28 = vpop.eup %7284  ;;  %v9060_v40 = vmul.f32 %v8928_v35, %v3547_v62  ;;  %v3285_v31 = vadd.f32 %v3284_v32, %v3283_v15  ;;  %v3607_v19 = vmul.f32 %v8753_v29, %v8819_v6  ;;  %v3292_v7 = vadd.f32 %v3291_v2, %v3290_v41 }
 0x833   : > { %v7287_v42 = vpop.eup %7286  ;;  %v3548_v20 = vadd.f32 %v8987_v44, %v3532_v38  ;;  %v3625_v18 = vmul.f32 %v7285_v28, %v3547_v62  ;;  %v3378_v49 = vrot.slane %v3377_v24, 2  ;;  %v3385_v12 = vrot.slane %v3384_v5, 2  ;;  %v3181_v38 = vpop.permute.xlu0 %3180 }
 0x834   : > { %v3286_v37 = vrot.slane %v3285_v31, 1  ;;  %v3608_v39 = vmul.f32 %v8790_v8, %v8991_v22  ;;  %v3613_v10 = vmul.f32 1.442695, %v3607_v19  ;;  %v3293_v6 = vrot.slane %v3292_v7, 1 }
 0x835   : > { %v3626_v52 = vmul.f32 %v7287_v42, %v3548_v20  ;;  %v9068_v60 = vmul.f32 %v8928_v35, %v3548_v20  ;;  %v3641_v9 = vadd.f32 %v8943_v57, %v3625_v18  ;;  %v3379_v47 = vadd.f32 %v3378_v49, %v3377_v24 }
 0x836   : > { %v3287_v43 = vadd.f32 %v3286_v37, %v3285_v31  ;;  %v3386_v44 = vadd.f32 %v3385_v12, %v3384_v5  ;;  %7296 = vpow2.f32 %v3613_v10  ;;  %v7289_v15 = vpop.eup %7288  ;;  %v3294_v59 = vadd.f32 %v3293_v6, %v3292_v7 }
 0x837   : > { %v3642_v46 = vadd.f32 %v8953_v58, %v3626_v52  ;;  %v9072_v41 = vmul.f32 %v3647_v54, %v3641_v9  ;;  %v3615_v56 = vmul.f32 1.442695, %v3608_v39  ;;  %v3719_v55 = vmul.f32 %v7289_v15, %v3641_v9  ;;  %v10276_v39 = vld [vmem:[#allocation12_spill] sm:$0xff]  ;;  %v3463_v52 = vpop.permute.xlu0 %3462 }
 0x838   : > { %v7291_v22 = vpop.eup %7290  ;;  %v3380_v17 = vrot.slane %v3379_v47, 1  ;;  %v3387_v62 = vrot.slane %v3386_v44, 1  ;;  %v3701_v35 = vmul.f32 %v8753_v29, %v9009_v45  ;;  %v3297_v32 = vcombine.low %v3287_v43, %v3294_v59 }
 0x839   : > { %v3720_v57 = vmul.f32 %v7291_v22, %v3642_v46  ;;  %v9076_v51 = vmul.f32 %v3647_v54, %v3642_v46  ;;  %7298 = vpow2.f32 %v3615_v56  ;;  %v9079_v2 = vadd.f32 %v9032_v14, %v3719_v55 }
 0x83a   : > { %v3381_v58 = vadd.f32 %v3380_v17, %v3379_v47  ;;  %v3388_v24 = vadd.f32 %v3387_v62, %v3386_v44  ;;  %v3702_v28 = vmul.f32 %v8790_v8, %v9016_v3  ;;  %v3304_v5 = vrot.slane %v3297_v32, %v10238_v23  ;;  %v3557_v44 = vpop.permute.xlu1 %3556 }
 0x83b   : > { %v9084_v31 = vadd.f32 %v9036_v53, %v3720_v57  ;;  %v3707_v45 = vmul.f32 1.442695, %v3701_v35  ;;  %v3185_v19 = vmul.f32 %v3181_v38, %v8924_v4  ;;  %v9090_v42 = vmul.f32 %v8979_v33, %v9079_v2 }
 0x83c   : > { %v3391_v20 = vcombine.low %v3381_v58, %v3388_v24  ;;  %v3709_v14 = vmul.f32 1.442695, %v3702_v28  ;;  %v3186_v18 = vmul.f32 %v3181_v38, %v8940_v36  ;;  %v3311_v53 = vrot.slane %v3304_v5, %v10238_v23  ;;  %v10277_v24 = vld [vmem:[#allocation31_spill] sm:$0xff] }
 0x83d   : > { %v7293_v7 = vpop.eup %7292  ;;  %v9095_v3 = vmul.f32 %v8979_v33, %v9084_v31  ;;  %7300 = vpow2.f32 %v3707_v45  ;;  %v3187_v49 = vadd.f32 %v3185_v19, %v8949_v34  ;;  %v9107_v10 = vrot.slane %v8733_v0, %v10276_v39 }
 0x83e   : > { %v7295_v54 = vpop.eup %7294  ;;  %v3398_v4 = vrot.slane %v3391_v20, %v10238_v23  ;;  %v3533_v37 = vmul.f32 %v7293_v7, %v9012_v48  ;;  %7302 = vpow2.f32 %v3709_v14  ;;  %v3194_v12 = vadd.f32 %v3186_v18, %v8965_v25  ;;  %3313 = vst.msk [vmem:[#allocation2 + $0x1] ss:$8 sm:$0x3] %vm8316_vm6, %v3311_v53  ;;  %v3651_v19 = vpop.permute.xlu1 %3650 }
 0x83f   : > { %v3534_v36 = vmul.f32 %v7295_v54, %v9026_v26  ;;  %v3188_v33 = vrot.slane %v3187_v49, 4  ;;  %v9111_v34 = vrot.slane %v8748_v30, %v10276_v39  ;;  %v3467_v43 = vmul.f32 %v3463_v52, %v9012_v48 }
 0x840   : > { %v3405_v9 = vrot.slane %v3398_v4, %v10238_v23  ;;  %v3549_v6 = vadd.f32 %v9052_v61, %v3533_v37  ;;  %v3195_v25 = vrot.slane %v3194_v12, 4  ;;  %v3793_v0 = vmul.f32 %v8760_v27, %v9107_v10 }
 0x841   : > { %v3550_v47 = vadd.f32 %v9056_v50, %v3534_v36  ;;  %v3189_v15 = vadd.f32 %v3188_v33, %v3187_v49  ;;  %v3794_v46 = vmul.f32 %v8800_v11, %v9111_v34  ;;  %v3468_v61 = vmul.f32 %v3463_v52, %v9026_v26  ;;  %v10278_v49 = vld [vmem:[#allocation32_spill] sm:$0xff] }
 0x842   : > { %3407 = vst.msk [vmem:[#allocation2 + $0x2] ss:$8 sm:$0x3] %vm8316_vm6, %v3405_v9  ;;  %v3561_v30 = vmul.f32 %v3557_v44, %v3549_v6  ;;  %v3196_v59 = vadd.f32 %v3195_v25, %v3194_v12  ;;  %v3469_v56 = vadd.f32 %v3467_v43, %v9041_v1  ;;  %v3797_v55 = vmul.f32 1.442695, %v3793_v0 }
 0x843   : > { %v7297_v48 = vpop.eup %7296  ;;  %v3562_v22 = vmul.f32 %v3557_v44, %v3550_v47  ;;  %v3190_v50 = vrot.slane %v3189_v15, 2  ;;  %v3799_v17 = vmul.f32 1.442695, %v3794_v46  ;;  %v3476_v38 = vadd.f32 %v3468_v61, %v9044_v13 }
 0x844   : > { %v3563_v62 = vadd.f32 %v3561_v30, %v9060_v40  ;;  %v3627_v27 = vmul.f32 %v7297_v48, %v3549_v6  ;;  %v3197_v35 = vrot.slane %v3196_v59, 2  ;;  %v3470_v57 = vrot.slane %v3469_v56, 4 }
 0x845   : > { %v3570_v11 = vadd.f32 %v3562_v22, %v9068_v60  ;;  %v3191_v32 = vadd.f32 %v3190_v50, %v3189_v15  ;;  %7304 = vpow2.f32 %v3797_v55  ;;  %v3477_v53 = vrot.slane %v3476_v38, 4  ;;  %v10279_v50 = vld [vmem:[#allocation16_spill] sm:$0xff] }
 0x846   : > { %v7299_v58 = vpop.eup %7298  ;;  %v3564_v26 = vrot.slane %v3563_v62, 4  ;;  %v3643_v1 = vadd.f32 %v10277_v24, %v3627_v27  ;;  %v3198_v28 = vadd.f32 %v3197_v35, %v3196_v59  ;;  %7306 = vpow2.f32 %v3799_v17 }
 0x847   : > { %v3571_v5 = vrot.slane %v3570_v11, 4  ;;  %v3628_v45 = vmul.f32 %v7299_v58, %v3550_v47  ;;  %v3192_v20 = vrot.slane %v3191_v32, 1  ;;  %v3471_v40 = vadd.f32 %v3470_v57, %v3469_v56 }
 0x848   : > { %v3565_v14 = vadd.f32 %v3564_v26, %v3563_v62  ;;  %v3655_v18 = vmul.f32 %v3651_v19, %v3643_v1  ;;  %v3199_v7 = vrot.slane %v3198_v28, 1  ;;  %v3478_v52 = vadd.f32 %v3477_v53, %v3476_v38  ;;  %v10280_v38 = vld [vmem:[#allocation22_spill] sm:$0xff] }
 0x849   : > { %v3572_v60 = vadd.f32 %v3571_v5, %v3570_v11  ;;  %v3644_v54 = vadd.f32 %v10278_v49, %v3628_v45  ;;  %v3193_v4 = vadd.f32 %v3192_v20, %v3191_v32  ;;  %v3472_v13 = vrot.slane %v3471_v40, 2 }
 0x84a   : > { %v7301_v37 = vpop.eup %7300  ;;  %v3566_v12 = vrot.slane %v3565_v14, 2  ;;  %v3657_v36 = vadd.f32 %v3655_v18, %v9072_v41  ;;  %v3200_v33 = vadd.f32 %v3199_v7, %v3198_v28  ;;  %v3479_v56 = vrot.slane %v3478_v52, 2  ;;  %v3745_v28 = vpop.permute.xlu0 %3744 }
 0x84b   : > { %v7303_v9 = vpop.eup %7302  ;;  %v3573_v6 = vrot.slane %v3572_v60, 2  ;;  %v3721_v25 = vmul.f32 %v7301_v37, %v3643_v1  ;;  %v3656_v43 = vmul.f32 %v3651_v19, %v3644_v54  ;;  %v3473_v47 = vadd.f32 %v3472_v13, %v3471_v40 }
 0x84c   : > { %v3567_v44 = vadd.f32 %v3566_v12, %v3565_v14  ;;  %v3722_v15 = vmul.f32 %v7303_v9, %v3644_v54  ;;  %v3658_v0 = vrot.slane %v3657_v36, 4  ;;  %v3203_v46 = vcombine.low %v3193_v4, %v3200_v33  ;;  %v10281_v12 = vld [vmem:[#allocation20_spill] sm:$0xff] }
 0x84d   : > { %v3574_v30 = vadd.f32 %v3573_v6, %v3572_v60  ;;  %v3664_v59 = vadd.f32 %v3656_v43, %v9076_v51  ;;  %v3474_v61 = vrot.slane %v3473_v47, 1  ;;  %v3734_v55 = vmul.f32 %v10279_v50, %v9023_v63 }
 0x84e   : > { %v3568_v48 = vrot.slane %v3567_v44, 1  ;;  %v3659_v22 = vadd.f32 %v3658_v0, %v3657_v36  ;;  %v3210_v41 = vrot.slane %v3203_v46, %v10238_v23  ;;  %v3480_v35 = vadd.f32 %v3479_v56, %v3478_v52  ;;  %v10282_v36 = vld [vmem:[#allocation30_spill] sm:$0xff]  ;;  %v10284_v46 = vld [vmem:[#allocation29_spill] sm:$0xff] }
 0x84f   : > { %v3575_v17 = vrot.slane %v3574_v30, 1  ;;  %v3665_v62 = vrot.slane %v3664_v59, 4  ;;  %v3475_v27 = vadd.f32 %v3474_v61, %v3473_v47  ;;  %v3737_v58 = vadd.f32 %v10280_v38, %v3721_v25  ;;  %v10283_v47 = vld [vmem:[#allocation23_spill] sm:$0xff] }
 0x850   : > { %v3569_v57 = vadd.f32 %v3568_v48, %v3567_v44  ;;  %v3660_v11 = vrot.slane %v3659_v22, 2  ;;  %v3217_v32 = vrot.slane %v3210_v41, %v10238_v23  ;;  %v3481_v24 = vrot.slane %v3480_v35, 1 }
 0x851   : > { %v3576_v51 = vadd.f32 %v3575_v17, %v3574_v30  ;;  %v3666_v26 = vadd.f32 %v3665_v62, %v3664_v59  ;;  %v9137_v1 = vadd.f32 %v3734_v55, %v3722_v15  ;;  %v3795_v63 = vmul.f32 %v8753_v29, %v9107_v10  ;;  %v3835_v62 = vpop.permute.xlu1 %3834 }
 0x852   : > { %v7305_v5 = vpop.eup %7304  ;;  %v3661_v45 = vadd.f32 %v3660_v11, %v3659_v22  ;;  %3219 = vst.msk [vmem:[#allocation2] ss:$8 sm:$0x3] %vm8316_vm6, %v3217_v32  ;;  %v3796_v19 = vmul.f32 %v8790_v8, %v9111_v34  ;;  %v3749_v20 = vmul.f32 %v3745_v28, %v3737_v58  ;;  %v3482_v53 = vadd.f32 %v3481_v24, %v3480_v35  ;;  %v10285_v11 = vld [vmem:[#allocation25_spill] sm:$0xff]  ;;  %v10286_v32 = vld [vmem:[#allocation18_spill] sm:$0xff] }
 0x853   : > { %v7307_v40 = vpop.eup %7306  ;;  %v3579_v14 = vcombine.low %v3569_v57, %v3576_v51  ;;  %v3667_v18 = vrot.slane %v3666_v26, 2  ;;  %v3813_v7 = vmul.f32 %v7305_v5, %v9079_v2  ;;  %v3801_v54 = vmul.f32 1.442695, %v3795_v63  ;;  %v10287_v5 = vld [vmem:[#allocation19_spill] sm:$0xff] }
 0x854   : > { %v3662_v60 = vrot.slane %v3661_v45, 1  ;;  %v3814_v49 = vmul.f32 %v7307_v40, %v9084_v31  ;;  %v3803_v4 = vmul.f32 1.442695, %v3796_v19  ;;  %v3485_v10 = vcombine.low %v3475_v27, %v3482_v53 }
 0x855   : > { %v3586_v13 = vrot.slane %v3579_v14, %v10238_v23  ;;  %v3668_v37 = vadd.f32 %v3667_v18, %v3666_v26  ;;  %v3829_v29 = vadd.f32 %v10281_v12, %v3813_v7  ;;  %7308 = vpow2.f32 %v3801_v54  ;;  %v3839_v14 = vpop.permute.xlu1 %3838 }
 0x856   : > { %v3830_v8 = vadd.f32 %v10282_v36, %v3814_v49  ;;  %v3750_v34 = vmul.f32 %v3745_v28, %v9137_v1  ;;  %v3492_v52 = vrot.slane %v3485_v10, %v10238_v23  ;;  %7310 = vpow2.f32 %v3803_v4 }
 0x857   : > { %v3593_v33 = vrot.slane %v3586_v13, %v10238_v23  ;;  %v3669_v2 = vrot.slane %v3668_v37, 1  ;;  %v3751_v31 = vadd.f32 %v3749_v20, %v9090_v42  ;;  %v3663_v6 = vadd.f32 %v3662_v60, %v3661_v45 }
 0x858   : > { %v3758_v9 = vadd.f32 %v3750_v34, %v9095_v3  ;;  %v3499_v43 = vrot.slane %v3492_v52, %v10238_v23  ;;  %v3898_v44 = vsub.f32 0.0, %v10283_v47  ;;  %v3899_v30 = vsub.f32 0.0, %v10284_v46 }
 0x859   : > { %3595 = vst.msk [vmem:[#allocation2 + $0x4] ss:$8 sm:$0x3] %vm8316_vm6, %v3593_v33  ;;  %v3670_v25 = vadd.f32 %v3669_v2, %v3668_v37  ;;  %v3752_v15 = vrot.slane %v3751_v31, 4  ;;  %v3827_v38 = vmul.f32 %v10286_v32, %v10285_v11  ;;  %v3828_v45 = vmul.f32 %v10286_v32, %v10287_v5  ;;  %v7057_v5 = vld [vmem:[%s10096_s2 + $0x2f0] sm:$0xff]  }
 0x85a   : > { %v3759_v0 = vrot.slane %v3758_v9, 4  ;;  %3501 = vst.msk [vmem:[#allocation2 + $0x3] ss:$8 sm:$0x3] %vm8316_vm6, %v3499_v43  ;;  %v3900_v56 = vmul.f32 1.442695, %v3898_v44  ;;  %v3841_v63 = vmul.f32 %v3835_v62, %v3829_v29  ;;  %v3842_v18 = vmul.f32 %v3835_v62, %v3830_v8 }
 0x85b   : > { %v3673_v59 = vcombine.low %v3663_v6, %v3670_v25  ;;  %v3753_v42 = vadd.f32 %v3752_v15, %v3751_v31  ;;  %v3902_v41 = vmul.f32 1.442695, %v3899_v30  ;;  %v10288_v30 = vld [vmem:[#allocation13_spill] sm:$0xff] }
 0x85c   : > { %v3760_v61 = vadd.f32 %v3759_v0, %v3758_v9  ;;  %7312 = vpow2.f32 %v3900_v56  ;;  %v6288_v0 = vld [vmem:[%s10103_s9 + $0x2] sm:$0x3] }
 0x85d   : > { %v3680_v3 = vrot.slane %v3673_v59, %v10238_v23  ;;  %v3754_v48 = vrot.slane %v3753_v42, 2  ;;  %7314 = vpow2.f32 %v3902_v41  ;;  %v3887_v59 = vrot.slane %v6288_v0, %v10288_v30  ;;  %v10291_v41 = vld [vmem:[#allocation21_spill] sm:$0xff] }
 0x85e   : > { %v3761_v22 = vrot.slane %v3760_v61, 2 }
 0x85f   : > { %v3687_v50 = vrot.slane %v3680_v3, %v10238_v23  ;;  %v3755_v55 = vadd.f32 %v3754_v48, %v3753_v42  ;;  %v10289_v42 = vld [vmem:[#allocation14_spill] sm:$0xff]  ;;  %v10290_v48 = vld [vmem:[#allocation24_spill] sm:$0xff] }
 0x860   : > { %v3762_v17 = vadd.f32 %v3761_v22, %v3760_v61  ;;  %v3891_v61 = vrot.slane %v6288_v0, %v10289_v42  ;;  %v3894_v22 = vmul.f32 %v3887_v59, %v10290_v48 }
 0x861   : > { %3689 = vst.msk [vmem:[#allocation2 + $0x5] ss:$8 sm:$0x3] %vm8316_vm6, %v3687_v50  ;;  %v3756_v27 = vrot.slane %v3755_v55, 1 }
 0x862   : > { %v3763_v35 = vrot.slane %v3762_v17, 1  ;;  %v7309_v57 = vpop.eup %7308  ;;  %v3895_v50 = vmul.f32 %v3891_v61, %v10291_v41 }
 0x863   : > { %v3815_v51 = vmul.f32 %v7309_v57, %v3737_v58  ;;  %v3757_v26 = vadd.f32 %v3756_v27, %v3755_v55  ;;  %v7311_v28 = vpop.eup %7310 }
 0x864   : > { %v3764_v24 = vadd.f32 %v3763_v35, %v3762_v17  ;;  %v3816_v19 = vmul.f32 %v7311_v28, %v9137_v1  ;;  %v7056_v28 = vld [vmem:[%s10096_s2 + $0x270] sm:$0xff]  }
 0x865   : > { %v3831_v20 = vadd.f32 %v3827_v38, %v3815_v51 }
 0x866   : > { %v3767_v40 = vcombine.low %v3757_v26, %v3764_v24  ;;  %v3832_v7 = vadd.f32 %v3828_v45, %v3816_v19  ;;  %v7052_v26 = vld [vmem:[%s10096_s2 + $0x278] sm:$0xff]   ;;  %v7058_v45 = vld [vmem:[%s10096_s2 + $0x230] sm:$0xff]   ;;  %v7060_v19 = vld [vmem:[%s10096_s2 + $0x268] sm:$0xff]  }
 0x867   : > { %v3843_v53 = vmul.f32 %v3839_v14, %v3831_v20  ;;  %v7053_v24 = vld [vmem:[%s10096_s2 + $0x2f8] sm:$0xff]   ;;  %6640 = vmatprep.subr.bf16.mxu0 %v7052_v26  ;;  %v7061_v20 = vld [vmem:[%s10096_s2 + $0x2e8] sm:$0xff]  }
 0x868   : > { %v3774_v60 = vrot.slane %v3767_v40, %v10238_v23  ;;  %v3844_v49 = vmul.f32 %v3839_v14, %v3832_v7  ;;  %6658 = vmatprep.subr.bf16.mxu1 %v7053_v24  ;;  %v7062_v40 = vld [vmem:[%s10096_s2 + $0x228] sm:$0xff]   ;;  %v7065_v7 = vld [vmem:[%s10096_s2 + $0x2e0] sm:$0xff]  }
 0x869   : > { %v3845_v54 = vadd.f32 %v3843_v53, %v3841_v63  ;;  %v7313_v1 = vpop.eup %7312  ;;  %v7059_v63 = vld [vmem:[%s10096_s2 + $0x2b0] sm:$0xff]   ;;  %v7063_v14 = vld [vmem:[%s10096_s2 + $0x2a8] sm:$0xff]   ;;  %v7066_v53 = vld [vmem:[%s10096_s2 + $0x220] sm:$0xff]  }
 0x86a   : > { %v3781_v58 = vrot.slane %v3774_v60, %v10238_v23  ;;  %v3852_v13 = vadd.f32 %v3844_v49, %v3842_v18  ;;  %v7315_v29 = vpop.eup %7314  ;;  %v3904_v33 = vadd.f32 1.0, %v7313_v1  ;;  %v7064_v18 = vld [vmem:[%s10096_s2 + $0x260] sm:$0xff]   ;;  %v7068_v49 = vld [vmem:[%s10096_s2 + $0x258] sm:$0xff]  }
 0x86b   : > { %v3846_v4 = vrot.slane %v3845_v54, 4  ;;  %v3905_v2 = vadd.f32 1.0, %v7315_v29  ;;  %v7067_v60 = vld [vmem:[%s10096_s2 + $0x2a0] sm:$0xff]  }
 0x86c   : > { %3783 = vst.msk [vmem:[#allocation2 + $0x6] ss:$8 sm:$0x3] %vm8316_vm6, %v3781_v58  ;;  %v3853_v12 = vrot.slane %v3852_v13, 4  ;;  %7316 = vrcp.f32 %v3904_v33  ;;  %v7070_v58 = vld [vmem:[%s10096_s2 + $0x218] sm:$0xff]   ;;  %v7074_v33 = vld [vmem:[%s10096_s2 + $0x210] sm:$0xff]  }
 0x86d   : > { %v3847_v37 = vadd.f32 %v3846_v4, %v3845_v54  ;;  %7318 = vrcp.f32 %v3905_v2  ;;  %v7069_v54 = vld [vmem:[%s10096_s2 + $0x2d8] sm:$0xff]   ;;  %v7075_v2 = vld [vmem:[%s10096_s2 + $0x290] sm:$0xff]   ;;  %v7098_v24 = vld [vmem:[%s10100_s6 + $0x160] sm:$0xff]  }
 0x86e   : > { %v3854_v36 = vadd.f32 %v3853_v12, %v3852_v13  ;;  %v7071_v4 = vld [vmem:[%s10096_s2 + $0x298] sm:$0xff]  }
 0x86f   : > { %v3848_v10 = vrot.slane %v3847_v37, 2 }
 0x870   : > { %v3855_v34 = vrot.slane %v3854_v36, 2 }
 0x871   : > { %v3849_v8 = vadd.f32 %v3848_v10, %v3847_v37  ;;  %v10292_v37 = vld [vmem:[#allocation27_spill] sm:$0xff] }
 0x872   : > { %v3856_v31 = vadd.f32 %v3855_v34, %v3854_v36  ;;  %v7073_v34 = vld [vmem:[%s10096_s2 + $0x2d0] sm:$0xff]  }
 0x873   : > { %v3850_v52 = vrot.slane %v3849_v8, 1 }
 0x874   : > { %v3857_v9 = vrot.slane %v3856_v31, 1 }
 0x875   : > { %v3851_v6 = vadd.f32 %v3850_v52, %v3849_v8  ;;  %v7072_v8 = vld [vmem:[%s10096_s2 + $0x250] sm:$0xff]   ;;  %v7076_v52 = vld [vmem:[%s10096_s2 + $0x248] sm:$0xff]  }
 0x876   : > { %v3858_v25 = vadd.f32 %v3857_v9, %v3856_v31  ;;  %v7077_v31 = vld [vmem:[%s10096_s2 + $0x2c8] sm:$0xff]  }
 0x877   : > { %v7078_v9 = vld [vmem:[%s10096_s2 + $0x208] sm:$0xff]  }
 0x878   : > { %v3861_v43 = vcombine.low %v3851_v6, %v3858_v25  ;;  %v7079_v6 = vld [vmem:[%s10096_s2 + $0x288] sm:$0xff]   ;;  %v7080_v25 = vld [vmem:[%s10096_s2 + $0x240] sm:$0xff]  }
 0x879   : > { %v7317_v3 = vpop.eup %7316 }
 0x87a   : > { %v3868_v44 = vrot.slane %v3861_v43, %v10238_v23  ;;  %v7319_v56 = vpop.eup %7318  ;;  %v3910_v62 = vmul.f32 %v7317_v3, %v10283_v47  ;;  %v7054_v47 = vld [vmem:[%s10096_s2 + $0x238] sm:$0xff]   ;;  %v7081_v43 = vld [vmem:[%s10096_s2 + $0x2c0] sm:$0xff]  }
 0x87b   : > { %v3911_v27 = vmul.f32 %v7319_v56, %v10284_v46  ;;  %v7055_v46 = vld [vmem:[%s10096_s2 + $0x2b8] sm:$0xff]   ;;  %6641 = vmatpush3.bf16.xpose.msra.mxu0 %v7054_v47  ;;  %v6322_v56 = vld [vmem:[%s10095_s1 + $0x2] ss:$0 sm:$0xff] }
 0x87c   : > { %v3875_v15 = vrot.slane %v3868_v44, %v10238_v23  ;;  %6642 = vmatprep.subr.bf16.mxu0 %v7056_v28  ;;  %v7082_v44 = vld [vmem:[%s10096_s2 + $0x200] sm:$0xff]   ;;  %v7100_v28 = vld [vmem:[%s10100_s6 + $0x158] sm:$0xff]  }
 0x87d   : > { %v7099_v47 = vld [vmem:[%s10100_s6 + $0x120] sm:$0xff]  }
 0x87e   : > { %3877 = vst.msk [vmem:[#allocation2 + $0x7] ss:$8 sm:$0x3] %vm8316_vm6, %v3875_v15  ;;  %v7083_v15 = vld [vmem:[%s10096_s2 + $0x280] sm:$0xff]  }
 0x883   : > { %6643 = vmatpush3.bf16.xpose.msra.mxu0 %v7058_v45 }
 0x884   : > { %6644 = vmatprep.subr.bf16.mxu0 %v7060_v19  ;;  %v7103_v19 = vld [vmem:[%s10100_s6 + $0x110] sm:$0xff]  }
 0x885   : > { %v3880_v55 = vld [vmem:[#allocation2 + $0x8] sm:$0xff]  ;;  %v3879_v17 = vld [vmem:[#allocation2] sm:$0xff] }
 0x886   : > { %v3897_v35 = vadd.f32 %v3895_v50, %v3880_v55  ;;  %v3896_v57 = vadd.f32 %v3894_v22, %v3879_v17  ;;  %v6421_v50 = vld [vmem:[%s10099_s5 + $0x50] sm:$0xff] }
 0x887   : > { %v6426_v55 = vcombine.low %v6421_v50, %v6421_v50  ;;  %v6427_v17 = vcombine.high %v6421_v50, %v6421_v50 }
 0x888   : > { %v3913_v11 = vmul.f32 %v3911_v27, %v3897_v35  ;;  %v3912_v32 = vmul.f32 %v3910_v62, %v3896_v57  ;;  %v7092_v62 = vld [vmem:[%s10100_s6 + $0x178] sm:$0xff]   ;;  %v7094_v35 = vld [vmem:[%s10100_s6 + $0x170] sm:$0xff]  }
 0x889   : > { %v7093_v27 = vld [vmem:[%s10100_s6 + $0x138] sm:$0xff]  }
 0x88a   : > { %v3915_v38 = vpack.c.bf16 %v3913_v11, %v3913_v11  ;;  %v3914_v51 = vpack.c.bf16 %v3912_v32, %v3912_v32  ;;  %v4824_v57 = vsel %vm1180_vm0, %v7093_v27, 0  ;;  %v7095_v11 = vld [vmem:[%s10100_s6 + $0x130] sm:$0xff]  }
 0x88b   : > { %6645 = vmatpush3.bf16.xpose.msra.mxu0 %v7062_v40  ;;  %v4821_v32 = vsel %vm1180_vm0, %v7095_v11, 0  ;;  %v7104_v40 = vld [vmem:[%s10100_s6 + $0x148] sm:$0xff]  }
 0x88c   : > { %4045 = vmatprep.mubr.bf16.mxu1 %v3915_v38  ;;  %6646 = vmatprep.subr.bf16.mxu0 %v7064_v18  ;;  %v7096_v38 = vld [vmem:[%s10100_s6 + $0x168] sm:$0xff]   ;;  %v6419_v18 = vld [vmem:[%s10097_s3 + $0x10] sm:$0xff] }
 0x88d   : > { %4046 = vmatmul.mubr.bf16.vlgmr.msra.gmra.mxu1 %v3914_v51  ;;  %v7097_v51 = vld [vmem:[%s10100_s6 + $0x128] sm:$0xff]  }
 0x88e   : > { %6659 = vmatpush3.bf16.xpose.msra.mxu1 %v7055_v46  ;;  %v4818_v26 = vsel %vm1180_vm0, %v7097_v51, 0  ;;  %v4815_v46 = vsel %vm1180_vm0, %v7099_v47, 0 }
 0x88f   : > { %6660 = vmatprep.subr.bf16.mxu1 %v7057_v5  ;;  %v7101_v5 = vld [vmem:[%s10100_s6 + $0x118] sm:$0xff]  }
 0x890   : > { %v4812_v45 = vsel %vm1180_vm0, %v7101_v5, 0 }
 0x893   : > { %6647 = vmatpush3.bf16.xpose.msra.mxu0 %v7066_v53  ;;  %v7106_v53 = vld [vmem:[%s10100_s6 + $0x140] sm:$0xff]  }
 0x894   : > { %6648 = vmatprep.subr.bf16.mxu0 %v7068_v49 }
 0x896   : > { %6661 = vmatpush3.bf16.xpose.msra.mxu1 %v7059_v63  ;;  %v7102_v63 = vld [vmem:[%s10100_s6 + $0x150] sm:$0xff]  }
 0x897   : > { %6662 = vmatprep.subr.bf16.mxu1 %v7061_v20  ;;  %v4809_v20 = vsel %vm1180_vm0, %v7103_v19, 0 }
 0x89b   : > { %6649 = vmatpush3.bf16.xpose.msra.mxu0 %v7070_v58  ;;  %v6420_v58 = vld [vmem:[%s10098_s4 + $0x4] sm:$0x3] }
 0x89c   : > { %6650 = vmatprep.subr.bf16.mxu0 %v7072_v8 }
 0x89e   : > { %6663 = vmatpush3.bf16.xpose.msra.mxu1 %v7063_v14  ;;  %v7105_v14 = vld [vmem:[%s10100_s6 + $0x108] sm:$0xff]  }
 0x89f   : > { %6664 = vmatprep.subr.bf16.mxu1 %v7065_v7  ;;  %v4806_v7 = vsel %vm1180_vm0, %v7105_v14, 0 }
 0x8a3   : > { %6651 = vmatpush3.bf16.xpose.msra.mxu0 %v7074_v33 }
 0x8a4   : > { %6652 = vmatprep.subr.bf16.mxu0 %v7076_v52 }
 0x8a6   : > { %6665 = vmatpush3.bf16.xpose.msra.mxu1 %v7067_v60  ;;  %v10294_v60 = vld [vmem:[#allocation10_spill] sm:$0xff] }
 0x8a7   : > { %6666 = vmatprep.subr.bf16.mxu1 %v7069_v54  ;;  %v4416_v49 = vrot.slane %v6419_v18, %v10294_v60  ;;  %v7107_v54 = vld [vmem:[%s10100_s6 + $0x100] sm:$0xff]  }
 0x8a8   : > { %v4803_v8 = vsel %vm1180_vm0, %v7107_v54, 0 }
 0x8ab   : > { %6653 = vmatpush3.bf16.xpose.msra.mxu0 %v7078_v9 }
 0x8ac   : > { %6654 = vmatprep.subr.bf16.mxu0 %v7080_v25 }
 0x8ae   : > { %6667 = vmatpush3.bf16.xpose.msra.mxu1 %v7071_v4  ;;  %v10295_v4 = vld [vmem:[#allocation11_spill] sm:$0xff] }
 0x8af   : > { %6668 = vmatprep.subr.bf16.mxu1 %v7073_v34 }
 0x8b3   : > { %6655 = vmatpush3.bf16.xpose.msra.mxu0 %v7082_v44 }
 0x8b4   : > { %6739 = vmatprep.subr.msk.bf16.mxu0 %vm1180_vm0, %v7092_v62  ;;  %v10299_v62 = vld [vmem:[#allocation17_spill] sm:$0xff] }
 0x8b5   : > { %v4519_v27 = vrot.slane %v6419_v18, %v10299_v62 }
 0x8b6   : > { %6669 = vmatpush3.bf16.xpose.msra.mxu1 %v7075_v2 }
 0x8b7   : > { %6670 = vmatprep.subr.bf16.mxu1 %v7077_v31  ;;  %v4463_v31 = vrot.slane %v6419_v18, %v7814_v16  ;;  %v4529_v14 = vrot.slane %v4519_v27, %v10288_v30 }
 0x8be   : > { %6671 = vmatpush3.bf16.xpose.msra.mxu1 %v7079_v6 }
 0x8bf   : > { %6672 = vmatprep.subr.bf16.mxu1 %v7081_v43 }
 0x8c6   : > { %6673 = vmatpush3.bf16.xpose.msra.mxu1 %v7083_v15 }
 0x8c7   : > { %4577 = vmatprep.subr.bf16.mxu1 %v6427_v17  ;;  %v4473_v17 = vrot.slane %v4463_v31, %v10295_v4 }
 0x94d   : > { %v4047_v13 = vpop.f32.mrf.mxu1 }
 0x94e   : > { %v9249_v12 = vadd.f32 %v4047_v13, %v10292_v37  ;;  %v4459_v13 = vrot.slane %v6419_v18, %v10295_v4  ;;  %v4420_v37 = vrot.slane %v6419_v18, %v10276_v39 }
 0x94f   : > { %v4049_v1 = vpop.f32.mrf.mxu1 }
 0x950   : > { %10293 = vst [vmem:[#allocation31_spill] sm:$0xff] %v9249_v12  ;;  %v4054_v29 = vmul.f32 %v9249_v12, %v9249_v12  ;;  %v4426_v1 = vrot.slane %v4416_v49, %v10294_v60  ;;  %v4469_v33 = vrot.slane %v4459_v13, %v10295_v4  ;;  %v4430_v52 = vrot.slane %v4420_v37, %v10294_v60 }
 0x951   : > { %v4050_v10 = vpop.f32.mrf.mxu1 }
 0x952   : > { %4055 = vadd.xlane.f32.xlu0 %v4054_v29  ;;  %v4487_v29 = vrot.slane %v6419_v18, %v10289_v42  ;;  %v4515_v10 = vrot.slane %v6419_v18, %v10288_v30 }
 0x953   : > { %v4051_v36 = vpop.f32.mrf.mxu1 }
 0x954   : > { %v4439_v36 = vrot.slane %v6420_v58, %v10288_v30  ;;  %v4497_v44 = vrot.slane %v4487_v29, %v10289_v42  ;;  %v4525_v15 = vrot.slane %v4515_v10, %v10288_v30 }
 0x9db   : > { %v4056_v0 = vpop.xlane.xlu0 %4055 }
 0x9dc   : > { %v4057_v59 = vmul.f32 0.0078125, %v4056_v0 }
 0x9de   : > { %v4058_v61 = vadd.f32 1e-05, %v4057_v59  ;;  %v10297_v59 = vld [vmem:[#allocation15_spill] sm:$0xff] }
 0x9e0   : > { %7320 = vrsqrt.f32 %v4058_v61  ;;  %v4491_v61 = vrot.slane %v6419_v18, %v10297_v59 }
 0x9e2   : > { %v4501_v47 = vrot.slane %v4491_v61, %v10289_v42  ;;  %v7091_v61 = vld [vmem:[%s10099_s5 + $0x68] ss:$8 sps:$4 sm:$0xff]  }
 0x9ed   : > { %v7321_v3 = vpop.eup %7320 }
 0x9ee   : > { %v4060_v48 = vmul.f32 %v7321_v3, %v9249_v12 }
 0x9f0   : > { %v4069_v22 = vmul.f32 %v6322_v56, %v4060_v48 }
 0x9f2   : > { %v4070_v41 = vpack.c.bf16 %v4069_v22, %v4069_v22 }
 0x9f4   : > { %6656 = vmatprep.mubr.bf16.mxu0 %v4070_v41  ;;  %6674 = vmatprep.mubr.bf16.mxu1 %v4070_v41 }
 0x9f5   : > { %6657 = vmatmul.mubr.bf16.vlgmr.msra.gmra.mxu0 %v4070_v41  ;;  %6675 = vmatmul.mubr.bf16.vlgmr.msra.gmra.mxu1 %v4070_v41  ;;  %v4443_v41 = vrot.slane %v6420_v58, %v10289_v42 }
 0x9f6   : > { %4578 = vmatpush1.bf16.xpose.msra.mxu1 %v6426_v55  ;;  %6677 = vmatpush3.bf16.xpose.msra.mxu0 %v4824_v57 }
 0x9f7   : > { %6740 = vmatprep.subr.msk.bf16.mxu0 %vm1180_vm0, %v7094_v35 }
 0x9fe   : > { %6679 = vmatpush3.bf16.xpose.msra.mxu0 %v4821_v32 }
 0x9ff   : > { %6741 = vmatprep.subr.msk.bf16.mxu0 %vm1180_vm0, %v7096_v38 }
 0xa06   : > { %6681 = vmatpush3.bf16.xpose.msra.mxu0 %v4818_v26 }
 0xa07   : > { %6742 = vmatprep.subr.msk.bf16.mxu0 %vm1180_vm0, %v7098_v24 }
 0xa0e   : > { %6683 = vmatpush3.bf16.xpose.msra.mxu0 %v4815_v46 }
 0xa0f   : > { %6743 = vmatprep.subr.msk.bf16.mxu0 %vm1180_vm0, %v7100_v28 }
 0xa16   : > { %6685 = vmatpush3.bf16.xpose.msra.mxu0 %v4812_v45 }
 0xa17   : > { %6744 = vmatprep.subr.msk.bf16.mxu0 %vm1180_vm0, %v7102_v63 }
 0xa1e   : > { %6687 = vmatpush3.bf16.xpose.msra.mxu0 %v4809_v20 }
 0xa1f   : > { %6745 = vmatprep.subr.msk.bf16.mxu0 %vm1180_vm0, %v7104_v40 }
 0xa26   : > { %6689 = vmatpush3.bf16.xpose.msra.mxu0 %v4806_v7 }
 0xa27   : > { %6746 = vmatprep.subr.msk.bf16.mxu0 %vm1180_vm0, %v7106_v53 }
 0xa2e   : > { %6691 = vmatpush3.bf16.xpose.msra.mxu0 %v4803_v8 }
 0xab5   : > { %v4362_v34 = vpop.f32.mrf.mxu0  ;;  %v9374_v2 = vpop.f32.mrf.mxu1 }
 0xab6   : > { %10296 = vst [vmem:[#allocation32_spill] sm:$0xff] %v9374_v2  ;;  %v4431_v9 = vmul.f32 %v4426_v1, %v4362_v34  ;;  %v4450_v6 = vrot.slane %v4362_v34, 7  ;;  %v4478_v25 = vrot.slane %v4362_v34, 6  ;;  %v4506_v43 = vrot.slane %v4362_v34, 5 }
 0xab7   : > { %v4364_v0 = vpop.f32.mrf.mxu0  ;;  %v9381_v3 = vpop.f32.mrf.mxu1 }
 0xab8   : > { %10298 = vst [vmem:[#allocation16_spill] sm:$0xff] %v9381_v3  ;;  %v4446_v56 = vadd.f32 %v4439_v36, %v4431_v9  ;;  %v4454_v48 = vsel %vm835_vm1, 0.0, %v4450_v6  ;;  %v4482_v22 = vsel %vm864_vm2, 0.0, %v4478_v25  ;;  %v4510_v55 = vsel %vm893_vm3, 0.0, %v4506_v43  ;;  %v7088_v43 = vld [vmem:[%s10099_s5 + $0x5c] ss:$8 sps:$4 sm:$0xff]  }
 0xab9   : > { %v4474_v50 = vmul.f32 %v4469_v33, %v4454_v48  ;;  %v4366_v35 = vpop.f32.mrf.mxu0  ;;  %v4407_v57 = vpop.f32.mrf.mxu1  ;;  %v4432_v11 = vmul.f32 %v4430_v52, %v4364_v0  ;;  %v4451_v32 = vrot.slane %v4364_v0, 7  ;;  %v4479_v38 = vrot.slane %v4364_v0, 6 }
 0xaba   : > { %v4507_v51 = vrot.slane %v4364_v0, 5  ;;  %v4502_v24 = vmul.f32 %v4497_v44, %v4482_v22  ;;  %v4530_v20 = vmul.f32 %v4525_v15, %v4510_v55  ;;  %v7086_v15 = vld [vmem:[%s10099_s5 + $0x58] ss:$8 sps:$4 sm:$0xff]   ;;  %v7089_v0 = vld [vmem:[%s10099_s5 + $0x6c] ss:$8 sps:$4 sm:$0xff]   ;;  %v10302_v35 = vmov 1  }
 0xabb   : > { %v4476_v26 = vadd.f32 %v4474_v50, %v4446_v56  ;;  %v4367_v46 = vpop.f32.mrf.mxu0  ;;  %v4408_v28 = vpop.f32.mrf.mxu1  ;;  %v4447_v5 = vadd.f32 %v4443_v41, %v4432_v11  ;;  %v4455_v45 = vsel %vm835_vm1, 0.0, %v4451_v32  ;;  %v4483_v63 = vsel %vm864_vm2, 0.0, %v4479_v38 }
 0xabc   : > { %v4475_v40 = vmul.f32 %v4473_v17, %v4455_v45  ;;  %v4511_v18 = vsel %vm893_vm3, 0.0, %v4507_v51  ;;  %v4503_v49 = vmul.f32 %v4501_v47, %v4483_v63  ;;  %v10303_v57 = vmov 2  }
 0xabd   : > { %v4504_v19 = vadd.f32 %v4502_v24, %v4476_v26  ;;  %v4531_v13 = vmul.f32 %v4529_v14, %v4511_v18  ;;  %v10304_v26 = vmov 5   ;;  %v10305_v47 = vmov 3  }
 0xabe   : > { %v4477_v53 = vadd.f32 %v4475_v40, %v4447_v5  ;;  %v10306_v46 = vmov 6   ;;  %v10307_v28 = vmov 7   ;;  %v10308_v5 = vmov 0  }
 0xabf   : > { %v4532_v7 = vadd.f32 %v4530_v20, %v4504_v19  ;;  %v10309_v45 = vmov 4  }
 0xac0   : > { %v4505_v58 = vadd.f32 %v4503_v49, %v4477_v53 }
 0xac1   : > { %v4534_v54 = vsub.f32 0.0, %v4532_v7 }
 0xac2   : > { %v4533_v1 = vadd.f32 %v4531_v13, %v4505_v58 }
 0xac3   : > { %v4536_v37 = vmul.f32 1.442695, %v4534_v54 }
 0xac4   : > { %v4535_v29 = vsub.f32 0.0, %v4533_v1 }
 0xac5   : > { %7322 = vpow2.f32 %v4536_v37 }
 0xac6   : > { %v4538_v10 = vmul.f32 1.442695, %v4535_v29 }
 0xac8   : > { %7324 = vpow2.f32 %v4538_v10 }
 0xad2   : > { %v7323_v36 = vpop.eup %7322 }
 0xad3   : > { %v4540_v8 = vadd.f32 1.0, %v7323_v36 }
 0xad5   : > { %v7325_v34 = vpop.eup %7324  ;;  %7326 = vrcp.f32 %v4540_v8 }
 0xad6   : > { %v4541_v33 = vadd.f32 1.0, %v7325_v34 }
 0xad8   : > { %7328 = vrcp.f32 %v4541_v33 }
 0xae2   : > { %v7327_v52 = vpop.eup %7326 }
 0xae3   : > { %v9394_v9 = vmul.f32 %v7327_v52, %v4532_v7  ;;  %v6464_v7 = vld [vmem:[%s10101_s7 + $0x4] sm:$0x3] }
 0xae4   : > { %v4712_v53 = vrot.slane %v6464_v7, %v10288_v30  ;;  %v4716_v54 = vrot.slane %v6464_v7, %v10289_v42 }
 0xae5   : > { %v7329_v31 = vpop.eup %7328  ;;  %10300 = vst [vmem:[#allocation22_spill] sm:$0xff] %v9394_v9  ;;  %v4548_v44 = vpack.c.bf16 %v9394_v9, %v9394_v9 }
 0xae6   : > { %v9396_v6 = vmul.f32 %v7329_v31, %v4533_v1 }
 0xae8   : > { %10301 = vst [vmem:[#allocation20_spill] sm:$0xff] %v9396_v6  ;;  %v4549_v25 = vpack.c.bf16 %v9396_v6, %v9396_v6 }
 0xaea   : > { %4595 = vmatprep.mubr.bf16.mxu1 %v4549_v25  ;;  %4637 = vmatprep.subr.bf16.mxu1 %v4549_v25 }
 0xaeb   : > { %4596 = vmatmul.mubr.bf16.vlgmr.msra.gmra.mxu1 %v4548_v44 }
 0xaec   : > { %4638 = vmatpush1.bf16.xpose.msra.mxu1 %v4548_v44  ;;  %4655 = vmatprep.mubr.bf16.mxu1 %v7088_v43 }
 0xaf3   : > { %4656 = vmatmul.mubr.bf16.vlgmr.msra.gmra.mxu1 %v7086_v15 }
 0xaf4   : > { %4663 = vmatprep.mubr.bf16.mxu1 %v7089_v0 }
 0xafb   : > { %4664 = vmatmul.mubr.bf16.gmra.mxu1 %v7091_v61 }
 0xbab   : > { %v4597_v56 = vpop.f32.mrf.mxu1 }
 0xbac   : > { %v4672_v48 = vpack.c.bf16 %v4597_v56, %v4597_v56 }
 0xbad   : > { %v4599_v22 = vpop.f32.mrf.mxu1 }
 0xbae   : > { %6692 = vmatprep.mubr.msk.bf16.mxu0 %vm1180_vm0, %v4672_v48  ;;  %v7110_v22 = vld [vmem:[%s10104_s10 + $0x174] ss:$8 sps:$4 sm:$0xff]  }
 0xbaf   : > { %v4600_v41 = vpop.f32.mrf.mxu1  ;;  %6693 = vmatmul.mubr.msk.bf16.vlgmr.msra.gmra.mxu0 %vm1180_vm0, %v4672_v48  ;;  %5818 = vmatprep.subr.bf16.mxu1 %v7110_v22 }
 0xbb0   : > { %v7108_v41 = vld [vmem:[%s10104_s10 + $0x170] ss:$8 sps:$4 sm:$0xff]  }
 0xbb1   : > { %v4601_v50 = vpop.f32.mrf.mxu1  ;;  %5819 = vmatpush1.bf16.xpose.msra.mxu1 %v7108_v41 }
 0xbb3   : > { %v4657_v55 = vpop.f32.mrf.mxu1 }
 0xbb4   : > { %4962 = vperm.xlu1 %6860, %v4657_v55   ;;  %5341 = vperm.xlu0 %6864, %v4657_v55  }
 0xbb5   : > { %v4659_v17 = vpop.f32.mrf.mxu1 }
 0xbb7   : > { %v4660_v27 = vpop.f32.mrf.mxu1 }
 0xbb8   : > { %6861 = vset.pattern.permute.xlu1 %v10302_v35  ;;  %6878 = vset.pattern.permute.xlu0 %v10303_v57 }
 0xbb9   : > { %5059 = vperm.xlu1 %6861, %v4657_v55   ;;  %v4662_v11 = vpop.f32.mrf.mxu1 }
 0xbbb   : > { %v4665_v32 = vpop.f32.mrf.mxu1 }
 0xbbc   : > { %5169 = vperm.xlu0 %6878, %v4665_v32  }
 0xbbd   : > { %6862 = vset.pattern.permute.xlu1 %v10303_v57  ;;  %v4667_v38 = vpop.f32.mrf.mxu1 }
 0xbbe   : > { %5153 = vperm.xlu1 %6862, %v4657_v55  }
 0xbbf   : > { %v4668_v51 = vpop.f32.mrf.mxu1 }
 0xbc0   : > { %6881 = vset.pattern.permute.xlu0 %v10304_v26 }
 0xbc1   : > { %5451 = vperm.xlu0 %6881, %v4665_v32   ;;  %v4670_v24 = vpop.f32.mrf.mxu1 }
 0xbc2   : > { %6863 = vset.pattern.permute.xlu1 %v10305_v47 }
 0xbc3   : > { %5247 = vperm.xlu1 %6863, %v4657_v55  }
 0xbc5   : > { %6886 = vset.pattern.permute.xlu0 %v10305_v47 }
 0xbc6   : > { %5267 = vperm.xlu0 %6886, %v4668_v51  }
 0xbc7   : > { %6865 = vset.pattern.permute.xlu1 %v10304_v26 }
 0xbc8   : > { %5435 = vperm.xlu1 %6865, %v4657_v55  }
 0xbca   : > { %6889 = vset.pattern.permute.xlu0 %v10306_v46 }
 0xbcb   : > { %5549 = vperm.xlu0 %6889, %v4668_v51  }
 0xbcc   : > { %6866 = vset.pattern.permute.xlu1 %v10306_v46 }
 0xbcd   : > { %5529 = vperm.xlu1 %6866, %v4657_v55  }
 0xbcf   : > { %6891 = vset.pattern.permute.xlu0 %v10307_v28 }
 0xbd1   : > { %6867 = vset.pattern.permute.xlu1 %v10307_v28 }
 0xbd2   : > { %5623 = vperm.xlu1 %6867, %v4657_v55  }
 0xbd6   : > { %6868 = vset.pattern.permute.xlu1 %v10308_v5 }
 0xbd7   : > { %4967 = vperm.xlu1 %6868, %v4660_v27  }
 0xbdb   : > { %6869 = vset.pattern.permute.xlu1 %v10302_v35 }
 0xbdc   : > { %5063 = vperm.xlu1 %6869, %v4660_v27  }
 0xbe0   : > { %6870 = vset.pattern.permute.xlu1 %v10303_v57 }
 0xbe1   : > { %5157 = vperm.xlu1 %6870, %v4660_v27  }
 0xbe5   : > { %6871 = vset.pattern.permute.xlu1 %v10305_v47 }
 0xbe6   : > { %5251 = vperm.xlu1 %6871, %v4660_v27  }
 0xbea   : > { %6872 = vset.pattern.permute.xlu1 %v10309_v45 }
 0xbeb   : > { %5345 = vperm.xlu1 %6872, %v4660_v27  }
 0xbef   : > { %6873 = vset.pattern.permute.xlu1 %v10304_v26 }
 0xbf0   : > { %5439 = vperm.xlu1 %6873, %v4660_v27  }
 0xbf4   : > { %6874 = vset.pattern.permute.xlu1 %v10306_v46 }
 0xbf5   : > { %5533 = vperm.xlu1 %6874, %v4660_v27  }
 0xbf9   : > { %6875 = vset.pattern.permute.xlu1 %v10307_v28 }
 0xbfa   : > { %5627 = vperm.xlu1 %6875, %v4660_v27  }
 0xbfe   : > { %6876 = vset.pattern.permute.xlu1 %v10308_v5 }
 0xbff   : > { %4980 = vperm.xlu1 %6876, %v4665_v32  }
 0xc03   : > { %6877 = vset.pattern.permute.xlu1 %v10302_v35 }
 0xc04   : > { %5075 = vperm.xlu1 %6877, %v4665_v32  }
 0xc08   : > { %6879 = vset.pattern.permute.xlu1 %v10305_v47 }
 0xc09   : > { %5263 = vperm.xlu1 %6879, %v4665_v32  }
 0xc0d   : > { %6880 = vset.pattern.permute.xlu1 %v10309_v45 }
 0xc0e   : > { %5357 = vperm.xlu1 %6880, %v4665_v32  }
 0xc12   : > { %6882 = vset.pattern.permute.xlu1 %v10306_v46 }
 0xc13   : > { %5545 = vperm.xlu1 %6882, %v4665_v32  }
 0xc17   : > { %6883 = vset.pattern.permute.xlu1 %v10308_v5 }
 0xc18   : > { %4985 = vperm.xlu1 %6883, %v4668_v51  }
 0xc1c   : > { %6884 = vset.pattern.permute.xlu1 %v10302_v35 }
 0xc1d   : > { %5079 = vperm.xlu1 %6884, %v4668_v51  }
 0xc21   : > { %6885 = vset.pattern.permute.xlu1 %v10303_v57  ;;  %v7113_v57 = vld [vmem:[%s10104_s10 + $0x164] ss:$8 sps:$4 sm:$0xff]  }
 0xc22   : > { %5173 = vperm.xlu1 %6885, %v4668_v51   ;;  %5820 = vmatprep.subr.bf16.mxu1 %v7113_v57 }
 0xc26   : > { %6887 = vset.pattern.permute.xlu1 %v10309_v45 }
 0xc27   : > { %5361 = vperm.xlu1 %6887, %v4668_v51  }
 0xc2b   : > { %6888 = vset.pattern.permute.xlu1 %v10304_v26 }
 0xc2c   : > { %5455 = vperm.xlu1 %6888, %v4668_v51  }
 0xc2f   : > { %v9446_v63 = vpop.permute.xlu1 %4962 }
 0xc30   : > { %6890 = vset.pattern.permute.xlu1 %v10307_v28 }
 0xc31   : > { %5639 = vperm.xlu1 %6890, %v4665_v32   ;;  %v7111_v32 = vld [vmem:[%s10104_s10 + $0x160] ss:$8 sps:$4 sm:$0xff]  }
 0xc32   : > { %5821 = vmatpush1.bf16.xpose.msra.mxu1 %v7111_v32 }
 0xc34   : > { %v9448_v19 = vpop.permute.xlu1 %5059 }
 0xc35   : > { %5643 = vperm.xlu1 %6890, %v4668_v51  }
 0xc39   : > { %v9450_v20 = vpop.permute.xlu1 %5153 }
 0xc3e   : > { %v9452_v40 = vpop.permute.xlu1 %5247 }
 0xc43   : > { %v9454_v14 = vpop.permute.xlu1 %5435 }
 0xc48   : > { %v9456_v18 = vpop.permute.xlu1 %5529 }
 0xc4d   : > { %v9462_v49 = vpop.permute.xlu1 %5623 }
 0xc4e   : > { %10310 = vst [vmem:[#allocation30_spill] sm:$0xff] %v9462_v49 }
 0xc52   : > { %v9465_v36 = vpop.permute.xlu1 %4967 }
 0xc57   : > { %v9467_v43 = vpop.permute.xlu1 %5063 }
 0xc5c   : > { %v9469_v44 = vpop.permute.xlu1 %5157 }
 0xc61   : > { %v9471_v0 = vpop.permute.xlu1 %5251 }
 0xc66   : > { %v9479_v50 = vpop.permute.xlu1 %5345 }
 0xc6b   : > { %v9481_v27 = vpop.permute.xlu1 %5439 }
 0xc6f   : > { %v4884_v58 = vpop.f32.mrf.mxu0 }
 0xc70   : > { %v4885_v13 = vadd.f32 %v4884_v58, %v4712_v53  ;;  %v9489_v45 = vpop.permute.xlu1 %5533 }
 0xc71   : > { %v4886_v37 = vpop.f32.mrf.mxu0  ;;  %10311 = vst [vmem:[#allocation23_spill] sm:$0xff] %v9489_v45 }
 0xc72   : > { %v4891_v1 = vand.u32 2147483647, %v4885_v13  ;;  %v4887_v29 = vadd.f32 %v4886_v37, %v4716_v54  ;;  %v4917_v28 = vmax.f32 %v4885_v13, 0.0  ;;  %v9505_v13 = vld [vmem:[%s10102_s8 + $0x40] sm:$0xff] }
 0xc73   : > { %v4888_v10 = vpop.f32.mrf.mxu0  ;;  %10314 = vst [vmem:[#allocation18_spill] sm:$0xff] %v9505_v13 }
 0xc74   : > { %v4893_v8 = vsub.f32 0.0, %v4891_v1  ;;  %v4892_v34 = vand.u32 2147483647, %v4887_v29  ;;  %v4918_v58 = vmax.f32 %v4887_v29, 0.0  ;;  %v7116_v1 = vld [vmem:[%s10104_s10 + $0x154] ss:$8 sps:$4 sm:$0xff]  }
 0xc75   : > { %v4889_v33 = vpop.f32.mrf.mxu0  ;;  %5822 = vmatprep.subr.bf16.mxu1 %v7116_v1  ;;  %v7117_v1 = vld [vmem:[%s10104_s10 + $0x140] ss:$8 sps:$4 sm:$0xff]  }
 0xc76   : > { %v4895_v52 = vmul.f32 1.442695, %v4893_v8  ;;  %v4894_v31 = vsub.f32 0.0, %v4892_v34  ;;  %v7114_v33 = vld [vmem:[%s10104_s10 + $0x150] ss:$8 sps:$4 sm:$0xff]  }
 0xc77   : > { %5823 = vmatpush1.bf16.xpose.msra.mxu1 %v7114_v33 }
 0xc78   : > { %7330 = vpow2.f32 %v4895_v52  ;;  %v4897_v25 = vmul.f32 1.442695, %v4894_v31  ;;  %v9521_v52 = vld [vmem:[%s10102_s8 + $0x48] sm:$0xff] }
 0xc79   : > { %10315 = vst [vmem:[#allocation19_spill] sm:$0xff] %v9521_v52 }
 0xc7a   : > { %7332 = vpow2.f32 %v4897_v25 }
 0xc85   : > { %v7331_v15 = vpop.eup %7330 }
 0xc86   : > { %v4899_v61 = vadd.f32 1.0, %v7331_v15  ;;  %v4902_v55 = vmul.f32 -0.5, %v7331_v15  ;;  %v4905_v11 = vand.u32 2147483647, %v7331_v15 }
 0xc87   : > { %v7333_v56 = vpop.eup %7332 }
 0xc88   : > { %7334 = vlog2.f32 %v4899_v61  ;;  %v4908_v48 = vadd.f32 1.0, %v7333_v56  ;;  %v4911_v17 = vmul.f32 -0.5, %v7333_v56  ;;  %v4903_v35 = vadd.f32 1.0, %v4902_v55  ;;  %v5628_v55 = vpop.permute.xlu1 %5627 }
 0xc89   : > { %v4914_v26 = vand.u32 2147483647, %v7333_v56  ;;  %vm4906_vm9 = vcmp.lt.f32.partialorder %v4905_v11, 0.0004427343 }
 0xc8a   : > { %7336 = vlog2.f32 %v4908_v48  ;;  %v4912_v38 = vadd.f32 1.0, %v4911_v17  ;;  %v4904_v47 = vmul.f32 %v7331_v15, %v4903_v35 }
 0xc8b   : > { %vm4915_vm10 = vcmp.lt.f32.partialorder %v4914_v26, 0.0004427343 }
 0xc8c   : > { %v4913_v53 = vmul.f32 %v7333_v56, %v4912_v38 }
 0xc95   : > { %v7335_v51 = vpop.eup %7334 }
 0xc96   : > { %v4901_v24 = vmul.f32 0.6931472, %v7335_v51 }
 0xc97   : > { %v7337_v46 = vpop.eup %7336 }
 0xc98   : > { %v4907_v5 = vsel %vm4906_vm9, %v4904_v47, %v4901_v24  ;;  %v4910_v7 = vmul.f32 0.6931472, %v7337_v46 }
 0xc99   : > { %v9491_v54 = vadd.f32 %v4917_v28, %v4907_v5  ;;  %v7119_v5 = vld [vmem:[%s10104_s10 + $0x144] ss:$8 sps:$4 sm:$0xff]  }
 0xc9a   : > { %v4916_v37 = vsel %vm4915_vm10, %v4913_v53, %v4910_v7  ;;  %5824 = vmatprep.subr.bf16.mxu1 %v7119_v5 }
 0xc9b   : > { %10312 = vst [vmem:[#allocation29_spill] sm:$0xff] %v9491_v54  ;;  %v9498_v10 = vmul.f32 %v9491_v54, %v9394_v9  ;;  %v9500_v8 = vadd.f32 %v4918_v58, %v4916_v37  ;;  %v9509_v34 = vrot.slane %v9491_v54, %v10288_v30  ;;  %v9513_v29 = vrot.slane %v9491_v54, %v10289_v42 }
 0xc9c   : > { %v9525_v31 = vrot.slane %v9491_v54, %v10295_v4  ;;  %v9529_v25 = vrot.slane %v9491_v54, %v10294_v60  ;;  %v9533_v15 = vrot.slane %v9491_v54, %v10299_v62  ;;  %v9537_v61 = vrot.slane %v9491_v54, %v10297_v59  ;;  %5825 = vmatpush1.bf16.xpose.msra.mxu1 %v7117_v1 }
 0xc9d   : > { %10313 = vst [vmem:[#allocation25_spill] sm:$0xff] %v9500_v8  ;;  %v9541_v56 = vrot.slane %v9498_v10, %v7814_v16  ;;  %v9545_v48 = vmul.f32 %v9500_v8, %v9396_v6  ;;  %v9549_v22 = vrot.slane %v9498_v10, %v10276_v39  ;;  %v9553_v41 = vrot.slane %v9500_v8, %v10288_v30 }
 0xc9e   : > { %v4936_v17 = vmul.f32 %v9505_v13, %v9509_v34  ;;  %v9559_v35 = vrot.slane %v9498_v10, %v10288_v30  ;;  %v9563_v57 = vrot.slane %v9500_v8, %v10289_v42  ;;  %v5034_v11 = vmul.f32 %v9505_v13, %v9513_v29 }
 0xc9f   : > { %10316 = vst [vmem:[#allocation24_spill] sm:$0xff] %v9549_v22  ;;  %v9569_v32 = vmul.f32 %v9489_v45, %v9541_v56  ;;  %v9573_v38 = vrot.slane %v9545_v48, %v10276_v39  ;;  %v9576_v51 = vmul.f32 %v5628_v55, %v9549_v22  ;;  %v4937_v26 = vmul.f32 %v9521_v52, %v9553_v41 }
 0xca0   : > { %v4940_v24 = vmul.f32 1.442695, %v4936_v17  ;;  %v9582_v47 = vrot.slane %v9545_v48, %v10288_v30  ;;  %v9586_v46 = vmul.f32 %v9446_v63, %v9559_v35  ;;  %v5035_v28 = vmul.f32 %v9521_v52, %v9563_v57 }
 0xca1   : > { %10317 = vst [vmem:[#allocation21_spill] sm:$0xff] %v9569_v32  ;;  %10318 = vst [vmem:[#allocation27_spill] sm:$0xff] %v9573_v38  ;;  %v9594_v7 = vmul.f32 %v5628_v55, %v9573_v38  ;;  %v4942_v53 = vmul.f32 1.442695, %v4937_v26  ;;  %v5038_v58 = vmul.f32 1.442695, %v5034_v11  ;;  %v9598_v37 = vrot.slane %v9498_v10, %v10289_v42  ;;  %v5342_v38 = vpop.permute.xlu0 %5341 }
 0xca2   : > { %10319 = vst [vmem:[#allocation10_spill] sm:$0xff] %v9576_v51  ;;  %7338 = vpow2.f32 %v4940_v24  ;;  %v9605_v33 = vmul.f32 %v9446_v63, %v9582_v47  ;;  %v5040_v17 = vmul.f32 1.442695, %v5035_v28  ;;  %v9609_v55 = vrot.slane %v9545_v48, %v10289_v42  ;;  %v7122_v11 = vld [vmem:[%s10104_s10 + $0x134] ss:$8 sps:$4 sm:$0xff]  }
 0xca3   : > { %10320 = vst [vmem:[#allocation11_spill] sm:$0xff] %v9594_v7  ;;  %7340 = vpow2.f32 %v4942_v53  ;;  %v9616_v26 = vmul.f32 %v9448_v19, %v9598_v37  ;;  %v9620_v24 = vrot.slane %v9500_v8, %v10295_v4  ;;  %v5128_v63 = vmul.f32 %v9505_v13, %v9525_v31  ;;  %5826 = vmatprep.subr.bf16.mxu1 %v7122_v11 }
 0xca4   : > { %7342 = vpow2.f32 %v5038_v58  ;;  %v9626_v28 = vmul.f32 %v9448_v19, %v9609_v55  ;;  %v9630_v5 = vrot.slane %v9498_v10, %v10295_v4  ;;  %v9634_v53 = vrot.slane %v9545_v48, %v10295_v4  ;;  %v9642_v19 = vpop.permute.xlu1 %4980 }
 0xca5   : > { %7344 = vpow2.f32 %v5040_v17  ;;  %v5129_v12 = vmul.f32 %v9521_v52, %v9620_v24  ;;  %v5132_v6 = vmul.f32 1.442695, %v5128_v63  ;;  %v9640_v58 = vrot.slane %v9500_v8, %v10294_v60 }
 0xca6   : > { %v9646_v9 = vmul.f32 %v9450_v20, %v9630_v5  ;;  %v9650_v4 = vmul.f32 %v9450_v20, %v9634_v53  ;;  %v5222_v17 = vmul.f32 %v9505_v13, %v9529_v25  ;;  %v9656_v63 = vrot.slane %v9498_v10, %v10294_v60 }
 0xca7   : > { %7346 = vpow2.f32 %v5132_v6  ;;  %v5134_v1 = vmul.f32 1.442695, %v5129_v12  ;;  %v5223_v42 = vmul.f32 %v9521_v52, %v9640_v58  ;;  %v9662_v30 = vrot.slane %v9545_v48, %v10294_v60 }
 0xca8   : > { %v5226_v7 = vmul.f32 1.442695, %v5222_v17  ;;  %v9666_v20 = vmul.f32 %v9452_v40, %v9656_v63  ;;  %v9670_v51 = vrot.slane %v9500_v8, %v10299_v62  ;;  %v5316_v6 = vmul.f32 %v9505_v13, %v9533_v15  ;;  %v7120_v17 = vld [vmem:[%s10104_s10 + $0x130] ss:$8 sps:$4 sm:$0xff]  }
 0xca9   : > { %7348 = vpow2.f32 %v5134_v1  ;;  %v5228_v12 = vmul.f32 1.442695, %v5223_v42  ;;  %v9676_v11 = vmul.f32 %v9452_v40, %v9662_v30  ;;  %v9680_v60 = vrot.slane %v9498_v10, %v10299_v62  ;;  %v7125_v40 = vld [vmem:[%s10104_s10 + $0x124] ss:$8 sps:$4 sm:$0xff]   ;;  %5827 = vmatpush1.bf16.xpose.msra.mxu1 %v7120_v17 }
 0xcaa   : > { %7350 = vpow2.f32 %v5226_v7  ;;  %v5317_v49 = vmul.f32 %v9521_v52, %v9670_v51  ;;  %v5320_v22 = vmul.f32 1.442695, %v5316_v6  ;;  %v9689_v42 = vrot.slane %v9545_v48, %v10299_v62  ;;  %v9703_v6 = vpop.permute.xlu1 %5075  ;;  %5828 = vmatprep.subr.bf16.mxu1 %v7125_v40 }
 0xcab   : > { %7352 = vpow2.f32 %v5228_v12  ;;  %v9695_v1 = vmul.f32 %v5342_v38, %v9680_v60  ;;  %v9699_v3 = vrot.slane %v9500_v8, %v10297_v59  ;;  %v5410_v7 = vmul.f32 %v9505_v13, %v9537_v61 }
 0xcac   : > { %7354 = vpow2.f32 %v5320_v22  ;;  %v5322_v62 = vmul.f32 1.442695, %v5317_v49  ;;  %v9706_v2 = vmul.f32 %v5342_v38, %v9689_v42  ;;  %v9710_v12 = vrot.slane %v9498_v10, %v10297_v59 }
 0xcad   : > { %v5411_v39 = vmul.f32 %v9521_v52, %v9699_v3  ;;  %v5414_v32 = vmul.f32 1.442695, %v5410_v7  ;;  %v9716_v21 = vrot.slane %v9545_v48, %v10297_v59  ;;  %v9720_v23 = vrot.slane %v9491_v54, %v7814_v16  ;;  %v9737_v59 = vld [vmem:[%s10102_s8 + $0x50] sm:$0xff] }
 0xcae   : > { %7356 = vpow2.f32 %v5322_v62  ;;  %v9724_v49 = vmul.f32 %v9454_v14, %v9710_v12  ;;  %v9728_v10 = vrot.slane %v9500_v8, %v7814_v16  ;;  %v9732_v22 = vrot.slane %v9545_v48, %v7814_v16  ;;  %v9748_v16 = vld [vmem:[%s10102_s8 + $0x58] sm:$0xff] }
 0xcaf   : > { %10321 = vst [vmem:[#allocation15_spill] sm:$0xff] %v9720_v23  ;;  %v7339_v38 = vpop.eup %7338  ;;  %7358 = vpow2.f32 %v5414_v32  ;;  %v5416_v17 = vmul.f32 1.442695, %v5411_v39  ;;  %v9741_v7 = vmul.f32 %v9454_v14, %v9716_v21  ;;  %v5504_v62 = vmul.f32 %v9505_v13, %v9720_v23 }
 0xcb0   : > { %10322 = vst [vmem:[#allocation17_spill] sm:$0xff] %v9728_v10  ;;  %10323 = vst [vmem:[#allocation33_spill] sm:$0xff] %v9732_v22  ;;  %v7341_v48 = vpop.eup %7340  ;;  %v4956_v8 = vmul.f32 0.0, %v7339_v38  ;;  %v5505_v40 = vmul.f32 %v9521_v52, %v9728_v10  ;;  %v9754_v39 = vmul.f32 %v9456_v18, %v9541_v56  ;;  %v9758_v14 = vmul.f32 %v9456_v18, %v9732_v22  ;;  %v7123_v38 = vld [vmem:[%s10104_s10 + $0x120] ss:$8 sps:$4 sm:$0xff]   ;;  %v9766_v56 = vpop.permute.xlu1 %5263 }
 0xcb1   : > { %v7343_v32 = vpop.eup %7342  ;;  %v4957_v13 = vmul.f32 0.0, %v7341_v48  ;;  %7360 = vpow2.f32 %v5416_v17  ;;  %v5508_v54 = vmul.f32 1.442695, %v5504_v62  ;;  %v4938_v45 = vmul.f32 %v9737_v59, %v9509_v34  ;;  %v7128_v34 = vld [vmem:[%s10104_s10 + $0x114] ss:$8 sps:$4 sm:$0xff]   ;;  %5829 = vmatpush1.bf16.xpose.msra.mxu1 %v7123_v38 }
 0xcb2   : > { %10324 = vst [vmem:[#allocation34_spill] sm:$0xff] %v9758_v14  ;;  %v7345_v52 = vpop.eup %7344  ;;  %v4974_v10 = vadd.f32 %v9586_v46, %v4956_v8  ;;  %v5510_v23 = vmul.f32 1.442695, %v5505_v40  ;;  %v4939_v18 = vmul.f32 %v9748_v16, %v9553_v41  ;;  %v9772_v17 = vmul.f32 %v9465_v36, %v9559_v35  ;;  %5830 = vmatprep.subr.bf16.mxu1 %v7128_v34 }
 0xcb3   : > { %v4975_v62 = vadd.f32 %v9605_v33, %v4957_v13  ;;  %7362 = vpow2.f32 %v5508_v54  ;;  %v4944_v48 = vmul.f32 1.442695, %v4938_v45  ;;  %v9780_v8 = vmul.f32 %v9465_v36, %v9582_v47 }
 0xcb4   : > { %v7347_v46 = vpop.eup %7346  ;;  %v9783_v40 = vmul.f32 %v9642_v19, %v4974_v10  ;;  %v5054_v41 = vmul.f32 %v7343_v32, %v4974_v10  ;;  %7364 = vpow2.f32 %v5510_v23  ;;  %v4946_v35 = vmul.f32 1.442695, %v4939_v18  ;;  %v9807_v32 = vpop.permute.xlu1 %5357 }
 0xcb5   : > { %v9786_v22 = vmul.f32 %v9642_v19, %v4975_v62  ;;  %v5055_v14 = vmul.f32 %v7345_v52, %v4975_v62  ;;  %7366 = vpow2.f32 %v4944_v48  ;;  %v5036_v54 = vmul.f32 %v9737_v59, %v9513_v29 }
 0xcb6   : > { %v7349_v45 = vpop.eup %7348  ;;  %v5070_v36 = vadd.f32 %v9616_v26, %v5054_v41  ;;  %7368 = vpow2.f32 %v4946_v35  ;;  %v5037_v13 = vmul.f32 %v9748_v16, %v9563_v57  ;;  %v9795_v23 = vmul.f32 %v9467_v43, %v9598_v37 }
 0xcb7   : > { %v7351_v47 = vpop.eup %7350  ;;  %v5071_v52 = vadd.f32 %v9626_v28, %v5055_v14  ;;  %v5042_v33 = vmul.f32 1.442695, %v5036_v54  ;;  %v9800_v29 = vmul.f32 %v9467_v43, %v9609_v55  ;;  %v5130_v26 = vmul.f32 %v9737_v59, %v9525_v31  ;;  %v7126_v31 = vld [vmem:[%s10104_s10 + $0x110] ss:$8 sps:$4 sm:$0xff]  }
 0xcb8   : > { %v7353_v19 = vpop.eup %7352  ;;  %v5148_v10 = vmul.f32 %v7347_v46, %v5070_v36  ;;  %v9805_v57 = vmul.f32 %v9703_v6, %v5070_v36  ;;  %v5044_v37 = vmul.f32 1.442695, %v5037_v13  ;;  %v5131_v38 = vmul.f32 %v9748_v16, %v9620_v24  ;;  %v7131_v24 = vld [vmem:[%s10104_s10 + $0x104] ss:$8 sps:$4 sm:$0xff]   ;;  %v5170_v46 = vpop.permute.xlu0 %5169 }
 0xcb9   : > { %v7355_v28 = vpop.eup %7354  ;;  %v5149_v14 = vmul.f32 %v7349_v45, %v5071_v52  ;;  %v9812_v18 = vmul.f32 %v9703_v6, %v5071_v52  ;;  %7370 = vpow2.f32 %v5042_v33  ;;  %v5136_v43 = vmul.f32 1.442695, %v5130_v26  ;;  %5831 = vmatpush1.bf16.xpose.msra.mxu1 %v7126_v31 }
 0xcba   : > { %v5164_v55 = vadd.f32 %v9646_v9, %v5148_v10  ;;  %7372 = vpow2.f32 %v5044_v37  ;;  %v5138_v34 = vmul.f32 1.442695, %v5131_v38  ;;  %v9820_v62 = vmul.f32 %v9469_v44, %v9630_v5  ;;  %5832 = vmatprep.subr.bf16.mxu1 %v7131_v24 }
 0xcbb   : > { %v7357_v6 = vpop.eup %7356  ;;  %v5165_v48 = vadd.f32 %v9650_v4, %v5149_v14  ;;  %7374 = vpow2.f32 %v5136_v43  ;;  %v9828_v41 = vmul.f32 %v9469_v44, %v9634_v53  ;;  %v5224_v9 = vmul.f32 %v9737_v59, %v9529_v25  ;;  %v9843_v53 = vpop.permute.xlu1 %5545 }
 0xcbc   : > { %v7359_v35 = vpop.eup %7358  ;;  %v5242_v54 = vmul.f32 %v7351_v47, %v5164_v55  ;;  %v9832_v5 = vmul.f32 %v5170_v46, %v5164_v55  ;;  %7376 = vpow2.f32 %v5138_v34  ;;  %v5225_v45 = vmul.f32 %v9748_v16, %v9640_v58 }
 0xcbd   : > { %v5243_v36 = vmul.f32 %v7353_v19, %v5165_v48  ;;  %v9836_v13 = vmul.f32 %v5170_v46, %v5165_v48  ;;  %v5230_v4 = vmul.f32 1.442695, %v5224_v9  ;;  %v9840_v52 = vmul.f32 %v9471_v0, %v9656_v63 }
 0xcbe   : > { %v7361_v44 = vpop.eup %7360  ;;  %v5258_v25 = vadd.f32 %v9666_v20, %v5242_v54  ;;  %v5232_v47 = vmul.f32 1.442695, %v5225_v45  ;;  %v9847_v33 = vmul.f32 %v9471_v0, %v9662_v30  ;;  %v5318_v58 = vmul.f32 %v9737_v59, %v9533_v15 }
 0xcbf   : > { %v5259_v26 = vadd.f32 %v9676_v11, %v5243_v36  ;;  %7378 = vpow2.f32 %v5230_v4  ;;  %v5319_v63 = vmul.f32 %v9748_v16, %v9670_v51  ;;  %v9856_v20 = vmul.f32 %v9479_v50, %v9680_v60  ;;  %v7129_v60 = vld [vmem:[%s10104_s10 + $0x100] ss:$8 sps:$4 sm:$0xff]   ;;  %v5452_v4 = vpop.permute.xlu0 %5451 }
 0xcc0   : > { %v7363_v19 = vpop.eup %7362  ;;  %v9859_v10 = vmul.f32 %v9766_v56, %v5258_v25  ;;  %v5336_v30 = vmul.f32 %v7355_v28, %v5258_v25  ;;  %7380 = vpow2.f32 %v5232_v47  ;;  %v5324_v0 = vmul.f32 1.442695, %v5318_v58 }
 0xcc1   : > { %v7365_v37 = vpop.eup %7364  ;;  %v9862_v15 = vmul.f32 %v9766_v56, %v5259_v26  ;;  %v5337_v11 = vmul.f32 %v7357_v6, %v5259_v26  ;;  %v5326_v38 = vmul.f32 1.442695, %v5319_v63  ;;  %v9866_v51 = vmul.f32 %v9479_v50, %v9689_v42  ;;  %v4986_v6 = vpop.permute.xlu1 %4985  ;;  %5833 = vmatpush1.bf16.xpose.msra.mxu1 %v7129_v60  ;;  %v10326_v60 = vld [vmem:[#allocation34_spill] sm:$0xff] }
 0xcc2   : > { %v7367_v14 = vpop.eup %7366  ;;  %v5352_v43 = vadd.f32 %v9695_v1, %v5336_v30  ;;  %7382 = vpow2.f32 %v5324_v0  ;;  %v5412_v28 = vmul.f32 %v9737_v59, %v9537_v61  ;;  %v5413_v56 = vmul.f32 %v9748_v16, %v9699_v3 }
 0xcc3   : > { %v7369_v31 = vpop.eup %7368  ;;  %v5353_v55 = vadd.f32 %v9706_v2, %v5337_v11  ;;  %v4958_v34 = vmul.f32 0.0, %v7367_v14  ;;  %7384 = vpow2.f32 %v5326_v38  ;;  %v9879_v50 = vmul.f32 %v9481_v27, %v9710_v12  ;;  %v10325_v11 = vld [vmem:[#allocation15_spill] sm:$0xff] }
 0xcc4   : > { %v5430_v42 = vmul.f32 %v7359_v35, %v5352_v43  ;;  %v9882_v24 = vmul.f32 %v9807_v32, %v5352_v43  ;;  %v4959_v1 = vmul.f32 0.0, %v7369_v31  ;;  %v5418_v48 = vmul.f32 1.442695, %v5412_v28 }
 0xcc5   : > { %v5431_v61 = vmul.f32 %v7361_v44, %v5353_v55  ;;  %v9885_v46 = vmul.f32 %v9807_v32, %v5353_v55  ;;  %v4976_v3 = vadd.f32 %v9772_v17, %v4958_v34  ;;  %v5420_v2 = vmul.f32 1.442695, %v5413_v56 }
 0xcc6   : > { %v7371_v9 = vpop.eup %7370  ;;  %v5446_v54 = vadd.f32 %v9724_v49, %v5430_v42  ;;  %v4977_v12 = vadd.f32 %v9780_v8, %v4959_v1  ;;  %7386 = vpow2.f32 %v5418_v48  ;;  %v9892_v35 = vmul.f32 %v9481_v27, %v9716_v21 }
 0xcc7   : > { %v7373_v45 = vpop.eup %7372  ;;  %v5447_v36 = vadd.f32 %v9741_v7, %v5431_v61  ;;  %v5056_v32 = vmul.f32 %v7371_v9, %v4976_v3  ;;  %v4990_v44 = vmul.f32 %v4986_v6, %v4976_v3  ;;  %7388 = vpow2.f32 %v5420_v2  ;;  %v10327_v61 = vld [vmem:[#allocation17_spill] sm:$0xff] }
 0xcc8   : > { %v7375_v17 = vpop.eup %7374  ;;  %v5524_v25 = vmul.f32 %v7363_v19, %v5446_v54  ;;  %v9895_v47 = vmul.f32 %v5452_v4, %v5446_v54  ;;  %v5057_v58 = vmul.f32 %v7373_v45, %v4977_v12  ;;  %v4991_v49 = vmul.f32 %v4986_v6, %v4977_v12  ;;  %v5080_v19 = vpop.permute.xlu1 %5079 }
 0xcc9   : > { %v7377_v26 = vpop.eup %7376  ;;  %v5525_v8 = vmul.f32 %v7365_v37, %v5447_v36  ;;  %v9897_v63 = vmul.f32 %v5452_v4, %v5447_v36  ;;  %v5072_v21 = vadd.f32 %v9795_v23, %v5056_v32  ;;  %v4992_v27 = vadd.f32 %v4990_v44, %v9783_v40 }
 0xcca   : > { %v9902_v7 = vadd.f32 %v9754_v39, %v5524_v25  ;;  %v5073_v30 = vadd.f32 %v9800_v29, %v5057_v58  ;;  %v4999_v0 = vadd.f32 %v4991_v49, %v9786_v22  ;;  %v5506_v38 = vmul.f32 %v9737_v59, %v10325_v11  ;;  %v5268_v58 = vpop.permute.xlu0 %5267 }
 0xccb   : > { %v9909_v14 = vadd.f32 %v10326_v60, %v5525_v8  ;;  %v4993_v37 = vrot.slane %v4992_v27, 4  ;;  %v5150_v43 = vmul.f32 %v7375_v17, %v5072_v21  ;;  %v5084_v28 = vmul.f32 %v5080_v19, %v5072_v21 }
 0xccc   : > { %v7379_v23 = vpop.eup %7378  ;;  %v9913_v40 = vmul.f32 %v9843_v53, %v9902_v7  ;;  %v5000_v39 = vrot.slane %v4999_v0, 4  ;;  %v5151_v56 = vmul.f32 %v7377_v26, %v5073_v30  ;;  %v5085_v29 = vmul.f32 %v5080_v19, %v5073_v30 }
 0xccd   : > { %v7381_v31 = vpop.eup %7380  ;;  %v9917_v22 = vmul.f32 %v9843_v53, %v9909_v14  ;;  %v4994_v55 = vadd.f32 %v4993_v37, %v4992_v27  ;;  %v5166_v34 = vadd.f32 %v9820_v62, %v5150_v43  ;;  %v5086_v42 = vadd.f32 %v5084_v28, %v9805_v57 }
 0xcce   : > { %v5001_v1 = vadd.f32 %v5000_v39, %v4999_v0  ;;  %v5167_v6 = vadd.f32 %v9828_v41, %v5151_v56  ;;  %v5093_v48 = vadd.f32 %v5085_v29, %v9812_v18  ;;  %v5507_v3 = vmul.f32 %v9748_v16, %v10327_v61  ;;  %v5174_v41 = vpop.permute.xlu1 %5173 }
 0xccf   : > { %v7383_v2 = vpop.eup %7382  ;;  %v4995_v9 = vrot.slane %v4994_v55, 2  ;;  %v5244_v54 = vmul.f32 %v7379_v23, %v5166_v34  ;;  %v5087_v12 = vrot.slane %v5086_v42, 4  ;;  %v5512_v45 = vmul.f32 1.442695, %v5506_v38 }
 0xcd0   : > { %v7385_v53 = vpop.eup %7384  ;;  %v5002_v36 = vrot.slane %v5001_v1, 2  ;;  %v5245_v4 = vmul.f32 %v7381_v31, %v5167_v6  ;;  %v5094_v32 = vrot.slane %v5093_v48, 4  ;;  %v5514_v62 = vmul.f32 1.442695, %v5507_v3 }
 0xcd1   : > { %v4996_v44 = vadd.f32 %v4995_v9, %v4994_v55  ;;  %v5260_v57 = vadd.f32 %v9840_v52, %v5244_v54  ;;  %v5088_v17 = vadd.f32 %v5087_v12, %v5086_v42  ;;  %7390 = vpow2.f32 %v5512_v45  ;;  %v10328_v42 = vld [vmem:[#allocation33_spill] sm:$0xff] }
 0xcd2   : > { %v5003_v18 = vadd.f32 %v5002_v36, %v5001_v1  ;;  %v5261_v25 = vadd.f32 %v9847_v33, %v5245_v4  ;;  %v5095_v49 = vadd.f32 %v5094_v32, %v5093_v48  ;;  %7392 = vpow2.f32 %v5514_v62  ;;  %v10329_v1 = vld [vmem:[#allocation23_spill] sm:$0xff]  ;;  %v5362_v61 = vpop.permute.xlu1 %5361 }
 0xcd3   : > { %v7387_v26 = vpop.eup %7386  ;;  %v4997_v8 = vrot.slane %v4996_v44, 1  ;;  %v5338_v21 = vmul.f32 %v7383_v2, %v5260_v57  ;;  %v5272_v27 = vmul.f32 %v5268_v58, %v5260_v57  ;;  %v5089_v30 = vrot.slane %v5088_v17, 2 }
 0xcd4   : > { %v7389_v0 = vpop.eup %7388  ;;  %v5004_v19 = vrot.slane %v5003_v18, 1  ;;  %v5339_v11 = vmul.f32 %v7385_v53, %v5261_v25  ;;  %v5273_v38 = vmul.f32 %v5268_v58, %v5261_v25  ;;  %v5096_v60 = vrot.slane %v5095_v49, 2 }
 0xcd5   : > { %v4998_v52 = vadd.f32 %v4997_v8, %v4996_v44  ;;  %v5354_v37 = vadd.f32 %v9856_v20, %v5338_v21  ;;  %v5274_v43 = vadd.f32 %v5272_v27, %v9859_v10  ;;  %v5090_v28 = vadd.f32 %v5089_v30, %v5088_v17 }
 0xcd6   : > { %v5005_v33 = vadd.f32 %v5004_v19, %v5003_v18  ;;  %v5355_v23 = vadd.f32 %v9866_v51, %v5339_v11  ;;  %v5281_v39 = vadd.f32 %v5273_v38, %v9862_v15  ;;  %v5097_v56 = vadd.f32 %v5096_v60, %v5095_v49  ;;  %v10330_v51 = vld [vmem:[#allocation26_spill] sm:$0xff]  ;;  %v5456_v8 = vpop.permute.xlu1 %5455 }
 0xcd7   : > { %v5275_v29 = vrot.slane %v5274_v43, 4  ;;  %v5091_v31 = vrot.slane %v5090_v28, 1  ;;  %v5432_v55 = vmul.f32 %v7387_v26, %v5354_v37  ;;  %v5539_v48 = vmul.f32 %v10329_v1, %v10328_v42 }
 0xcd8   : > { %v5008_v3 = vcombine.low %v4998_v52, %v5005_v33  ;;  %v5282_v2 = vrot.slane %v5281_v39, 4  ;;  %v5098_v9 = vrot.slane %v5097_v56, 1  ;;  %v5433_v20 = vmul.f32 %v7389_v0, %v5355_v23 }
 0xcd9   : > { %v5276_v54 = vadd.f32 %v5275_v29, %v5274_v43  ;;  %v5092_v10 = vadd.f32 %v5091_v31, %v5090_v28  ;;  %v5448_v12 = vadd.f32 %v9879_v50, %v5432_v55  ;;  %v5178_v45 = vmul.f32 %v5174_v41, %v5166_v34  ;;  %v10332_v43 = vld [vmem:[#allocation21_spill] sm:$0xff] }
 0xcda   : > { %v5015_v53 = vrot.slane %v5008_v3, %v10330_v51  ;;  %v5283_v15 = vadd.f32 %v5282_v2, %v5281_v39  ;;  %v5099_v36 = vadd.f32 %v5098_v9, %v5097_v56  ;;  %v5449_v4 = vadd.f32 %v9892_v35, %v5433_v20  ;;  %v5550_v56 = vpop.permute.xlu0 %5549 }
 0xcdb   : > { %v5277_v32 = vrot.slane %v5276_v54, 2  ;;  %v5179_v62 = vmul.f32 %v5174_v41, %v5167_v6  ;;  %v5180_v44 = vadd.f32 %v5178_v45, %v9832_v5  ;;  %v5366_v57 = vmul.f32 %v5362_v61, %v5354_v37 }
 0xcdc   : > { %v5022_v17 = vrot.slane %v5015_v53, %v10330_v51  ;;  %v5284_v18 = vrot.slane %v5283_v15, 2  ;;  %v5102_v25 = vcombine.low %v5092_v10, %v5099_v36  ;;  %v5367_v58 = vmul.f32 %v5362_v61, %v5355_v23 }
 0xcdd   : > { %v5278_v49 = vadd.f32 %v5277_v32, %v5276_v54  ;;  %v5181_v26 = vrot.slane %v5180_v44, 4  ;;  %v5187_v50 = vadd.f32 %v5179_v62, %v9836_v13  ;;  %v5368_v34 = vadd.f32 %v5366_v57, %v9882_v24 }
 0xcde   : > { %v7391_v21 = vpop.eup %7390  ;;  %5024 = vst.msk [vmem:[#allocation2] ss:$8 sm:$0x3] %vm8316_vm6, %v5022_v17  ;;  %v5285_v35 = vadd.f32 %v5284_v18, %v5283_v15  ;;  %v5109_v5 = vrot.slane %v5102_v25, %v10330_v51  ;;  %v5375_v6 = vadd.f32 %v5367_v58, %v9885_v46  ;;  %v5460_v41 = vmul.f32 %v5456_v8, %v5448_v12 }
 0xcdf   : > { %v7393_v30 = vpop.eup %7392  ;;  %v5279_v0 = vrot.slane %v5278_v49, 1  ;;  %v5526_v19 = vmul.f32 %v7391_v21, %v5448_v12  ;;  %v5182_v11 = vadd.f32 %v5181_v26, %v5180_v44  ;;  %v5188_v38 = vrot.slane %v5187_v50, 4 }
 0xce0   : > { %v5286_v60 = vrot.slane %v5285_v35, 1  ;;  %v5116_v13 = vrot.slane %v5109_v5, %v10330_v51  ;;  %v5527_v24 = vmul.f32 %v7393_v30, %v5449_v4  ;;  %v5369_v52 = vrot.slane %v5368_v34, 4 }
 0xce1   : > { %v5280_v37 = vadd.f32 %v5279_v0, %v5278_v49  ;;  %v9946_v28 = vadd.f32 %v10332_v43, %v5526_v19  ;;  %v5183_v33 = vrot.slane %v5182_v11, 2  ;;  %v5189_v23 = vadd.f32 %v5188_v38, %v5187_v50  ;;  %v10335_v19 = vld [vmem:[#allocation25_spill] sm:$0xff]  ;;  %v10336_v38 = vld [vmem:[#allocation18_spill] sm:$0xff] }
 0xce2   : > { %v5287_v39 = vadd.f32 %v5286_v60, %v5285_v35  ;;  %5118 = vst.msk [vmem:[#allocation2 + $0x1] ss:$8 sm:$0x3] %vm8316_vm6, %v5116_v13  ;;  %v9950_v46 = vadd.f32 %v5539_v48, %v5527_v24  ;;  %v5370_v29 = vadd.f32 %v5369_v52, %v5368_v34  ;;  %v5376_v31 = vrot.slane %v5375_v6, 4  ;;  %v10333_v34 = vld [vmem:[#allocation12_spill] sm:$0xff] }
 0xce3   : > { %v5554_v55 = vmul.f32 %v5550_v56, %v9946_v28  ;;  %v5184_v42 = vadd.f32 %v5183_v33, %v5182_v11  ;;  %v5190_v1 = vrot.slane %v5189_v23, 2  ;;  %v5461_v61 = vmul.f32 %v5456_v8, %v5449_v4  ;;  %v10334_v8 = vld [vmem:[#allocation29_spill] sm:$0xff]  ;;  %v10337_v33 = vld [vmem:[#allocation19_spill] sm:$0xff] }
 0xce4   : > { %v5290_v3 = vcombine.low %v5280_v37, %v5287_v39  ;;  %v5555_v2 = vmul.f32 %v5550_v56, %v9950_v46  ;;  %v5371_v9 = vrot.slane %v5370_v29, 2  ;;  %v5377_v20 = vadd.f32 %v5376_v31, %v5375_v6 }
 0xce5   : > { %v5556_v54 = vadd.f32 %v5554_v55, %v9913_v40  ;;  %v5185_v10 = vrot.slane %v5184_v42, 1  ;;  %v5191_v12 = vadd.f32 %v5190_v1, %v5189_v23  ;;  %v5462_v48 = vadd.f32 %v5460_v41, %v9895_v47 }
 0xce6   : > { %v5297_v45 = vrot.slane %v5290_v3, %v10330_v51  ;;  %v5563_v53 = vadd.f32 %v5555_v2, %v9917_v22  ;;  %v5372_v15 = vadd.f32 %v5371_v9, %v5370_v29  ;;  %v5378_v36 = vrot.slane %v5377_v20, 2  ;;  %v7132_v2 = vld [vmem:[%s10105_s11 + $0x38] sm:$0xff]  }
 0xce7   : > { %v5557_v32 = vrot.slane %v5556_v54, 4  ;;  %v5186_v62 = vadd.f32 %v5185_v10, %v5184_v42  ;;  %v5192_v4 = vrot.slane %v5191_v12, 1  ;;  %v5463_v44 = vrot.slane %v5462_v48, 4 }
 0xce8   : > { %v5304_v57 = vrot.slane %v5297_v45, %v10330_v51  ;;  %v5564_v17 = vrot.slane %v5563_v53, 4  ;;  %v5373_v18 = vrot.slane %v5372_v15, 1  ;;  %v5379_v25 = vadd.f32 %v5378_v36, %v5377_v20 }
 0xce9   : > { %v5558_v40 = vadd.f32 %v5557_v32, %v5556_v54  ;;  %v5193_v58 = vadd.f32 %v5192_v4, %v5191_v12  ;;  %v5464_v49 = vadd.f32 %v5463_v44, %v5462_v48  ;;  %v5469_v47 = vadd.f32 %v5461_v61, %v9897_v63 }
 0xcea   : > { %5306 = vst.msk [vmem:[#allocation2 + $0x3] ss:$8 sm:$0x3] %vm8316_vm6, %v5304_v57  ;;  %v5565_v22 = vadd.f32 %v5564_v17, %v5563_v53  ;;  %v5374_v26 = vadd.f32 %v5373_v18, %v5372_v15  ;;  %v5380_v50 = vrot.slane %v5379_v25, 1  ;;  %v5593_v21 = vrot.slane %v10334_v8, %v10333_v34  ;;  %v7133_v57 = vld [vmem:[%s10105_s11 + $0x30] sm:$0xff]  }
 0xceb   : > { %v5559_v35 = vrot.slane %v5558_v40, 2  ;;  %v5196_v5 = vcombine.low %v5186_v62, %v5193_v58  ;;  %v5465_v6 = vrot.slane %v5464_v49, 2  ;;  %v5470_v41 = vrot.slane %v5469_v47, 4  ;;  %v10338_v17 = vld [vmem:[#allocation32_spill] sm:$0xff] }
 0xcec   : > { %v5566_v30 = vrot.slane %v5565_v22, 2  ;;  %v5381_v0 = vadd.f32 %v5380_v50, %v5379_v25  ;;  %v5597_v11 = vrot.slane %v10335_v19, %v10333_v34  ;;  %v5598_v63 = vmul.f32 %v10336_v38, %v5593_v21  ;;  %v10340_v8 = vld [vmem:[#allocation24_spill] sm:$0xff] }
 0xced   : > { %v5560_v60 = vadd.f32 %v5559_v35, %v5558_v40  ;;  %v5203_v13 = vrot.slane %v5196_v5, %v10330_v51  ;;  %v5466_v24 = vadd.f32 %v5465_v6, %v5464_v49  ;;  %v5471_v52 = vadd.f32 %v5470_v41, %v5469_v47  ;;  %v10339_v40 = vld [vmem:[#allocation16_spill] sm:$0xff]  ;;  %v7134_v5 = vld [vmem:[%s10105_s11 + $0x28] sm:$0xff]  }
 0xcee   : > { %v5567_v37 = vadd.f32 %v5566_v30, %v5565_v22  ;;  %v5384_v43 = vcombine.low %v5374_v26, %v5381_v0  ;;  %v5599_v23 = vmul.f32 %v10337_v33, %v5597_v11  ;;  %v5602_v39 = vmul.f32 1.442695, %v5598_v63  ;;  %v10342_v6 = vld [vmem:[#allocation27_spill] sm:$0xff]  ;;  %v5640_v30 = vpop.permute.xlu1 %5639 }
 0xcef   : > { %v5561_v56 = vrot.slane %v5560_v60, 1  ;;  %v5210_v29 = vrot.slane %v5203_v13, %v10330_v51  ;;  %v5472_v31 = vrot.slane %v5471_v52, 2  ;;  %v5467_v61 = vrot.slane %v5466_v24, 1 }
 0xcf0   : > { %v5568_v55 = vrot.slane %v5567_v37, 1  ;;  %v5391_v42 = vrot.slane %v5384_v43, %v10330_v51  ;;  %v5604_v1 = vmul.f32 1.442695, %v5599_v23  ;;  %7394 = vpow2.f32 %v5602_v39  ;;  %v7135_v23 = vld [vmem:[%s10105_s11 + $0x20] sm:$0xff]  }
 0xcf1   : > { %5212 = vst.msk [vmem:[#allocation2 + $0x2] ss:$8 sm:$0x3] %vm8316_vm6, %v5210_v29  ;;  %v5473_v3 = vadd.f32 %v5472_v31, %v5471_v52  ;;  %v5562_v9 = vadd.f32 %v5561_v56, %v5560_v60  ;;  %v5600_v12 = vmul.f32 %v9737_v59, %v5593_v21  ;;  %v5601_v48 = vmul.f32 %v9748_v16, %v5597_v11  ;;  %v10341_v21 = vld [vmem:[#allocation30_spill] sm:$0xff]  ;;  %v10344_v52 = vld [vmem:[#allocation11_spill] sm:$0xff] }
 0xcf2   : > { %v5569_v20 = vadd.f32 %v5568_v55, %v5567_v37  ;;  %v5398_v54 = vrot.slane %v5391_v42, %v10330_v51  ;;  %7396 = vpow2.f32 %v5604_v1  ;;  %v7482_v53 = vmov 0.0   ;;  %v10343_v60 = vld [vmem:[#allocation10_spill] sm:$0xff]  ;;  %v5644_v43 = vpop.permute.xlu1 %5643 }
 0xcf3   : > { %v5474_v10 = vrot.slane %v5473_v3, 1  ;;  %6703 = vmatprep.subr.bf16.mxu0 %v7482_v53  ;;  %v5468_v15 = vadd.f32 %v5467_v61, %v5466_v24  ;;  %v5606_v32 = vmul.f32 1.442695, %v5600_v12  ;;  %v5608_v62 = vmul.f32 1.442695, %v5601_v48  ;;  %6719 = vmatprep.mubr.msk.bf16.mxu0 %vm7483_vm11, %v7482_v53 }
 0xcf4   : > { %v5572_v45 = vcombine.low %v5562_v9, %v5569_v20  ;;  %5400 = vst.msk [vmem:[#allocation2 + $0x4] ss:$8 sm:$0x3] %vm8316_vm6, %v5398_v54  ;;  %6704 = vmatpush3.bf16.xpose.msra.mxu0 %v7132_v2  ;;  %v5703_v18 = vsub.f32 0.0, %v10338_v17  ;;  %v5704_v58 = vsub.f32 0.0, %v10339_v40  ;;  %v5630_v35 = vmul.f32 %v10341_v21, %v10340_v8 }
 0xcf5   : > { %v5475_v36 = vadd.f32 %v5474_v10, %v5473_v3  ;;  %6705 = vmatprep.subr.bf16.mxu0 %v7482_v53  ;;  %7398 = vpow2.f32 %v5606_v32  ;;  %v5631_v41 = vmul.f32 %v10341_v21, %v10342_v6  ;;  %v7136_v3 = vld [vmem:[%s10105_s11 + $0x18] sm:$0xff]  }
 0xcf6   : > { %v5579_v4 = vrot.slane %v5572_v45, %v10330_v51  ;;  %7400 = vpow2.f32 %v5608_v62  ;;  %v5705_v22 = vmul.f32 1.442695, %v5703_v18  ;;  %v5707_v50 = vmul.f32 1.442695, %v5704_v58  ;;  %v10346_v18 = vld [vmem:[#allocation14_spill] sm:$0xff] }
 0xcf7   : > { %v5478_v44 = vcombine.low %v5468_v15, %v5475_v36  ;;  %v7137_v36 = vld [vmem:[%s10105_s11 + $0x10] sm:$0xff]  }
 0xcf8   : > { %v5586_v59 = vrot.slane %v5579_v4, %v10330_v51  ;;  %7402 = vpow2.f32 %v5705_v22  ;;  %v10348_v22 = vld [vmem:[#allocation20_spill] sm:$0xff] }
 0xcf9   : > { %v5485_v16 = vrot.slane %v5478_v44, %v10330_v51  ;;  %7404 = vpow2.f32 %v5707_v50  ;;  %v6486_v44 = vld [vmem:[%s10103_s9 + $0x4] sm:$0x3] }
 0xcfa   : > { %5588 = vst.msk [vmem:[#allocation2 + $0x6] ss:$8 sm:$0x3] %vm8316_vm6, %v5586_v59  ;;  %v7138_v59 = vld [vmem:[%s10105_s11 + $0x8] sm:$0xff]  }
 0xcfb   : > { %v5492_v25 = vrot.slane %v5485_v16, %v10330_v51  ;;  %v10345_v16 = vld [vmem:[#allocation13_spill] sm:$0xff] }
 0xcfc   : > { %6706 = vmatpush3.bf16.xpose.msra.mxu0 %v7133_v57  ;;  %v5692_v57 = vrot.slane %v6486_v44, %v10345_v16 }
 0xcfd   : > { %5494 = vst.msk [vmem:[#allocation2 + $0x5] ss:$8 sm:$0x3] %vm8316_vm6, %v5492_v25  ;;  %v7395_v49 = vpop.eup %7394  ;;  %6707 = vmatprep.subr.bf16.mxu0 %v7482_v53  ;;  %v5696_v25 = vrot.slane %v6486_v44, %v10346_v18 }
 0xcfe   : > { %v5618_v26 = vmul.f32 %v7395_v49, %v9902_v7 }
 0xcff   : > { %v7397_v47 = vpop.eup %7396 }
 0xd00   : > { %v5619_v34 = vmul.f32 %v7397_v47, %v9909_v14  ;;  %v5634_v0 = vadd.f32 %v5630_v35, %v5618_v26  ;;  %v5700_v26 = vmul.f32 %v5696_v25, %v10348_v22 }
 0xd02   : > { %v7399_v19 = vpop.eup %7398  ;;  %v5635_v11 = vadd.f32 %v5631_v41, %v5619_v34  ;;  %v5646_v63 = vmul.f32 %v5640_v30, %v5634_v0 }
 0xd03   : > { %v7401_v7 = vpop.eup %7400  ;;  %v5620_v38 = vmul.f32 %v7399_v19, %v9946_v28 }
 0xd04   : > { %6708 = vmatpush3.bf16.xpose.msra.mxu0 %v7134_v5  ;;  %v5621_v14 = vmul.f32 %v7401_v7, %v9950_v46  ;;  %v5647_v24 = vmul.f32 %v5640_v30, %v5635_v11  ;;  %v7139_v5 = vld [vmem:[%s10105_s11] sm:$0xff]  }
 0xd05   : > { %6709 = vmatprep.subr.bf16.mxu0 %v7482_v53  ;;  %v5636_v13 = vadd.f32 %v10343_v60, %v5620_v38  ;;  %v7403_v55 = vpop.eup %7402 }
 0xd06   : > { %v5637_v37 = vadd.f32 %v10344_v52, %v5621_v14  ;;  %v7405_v1 = vpop.eup %7404  ;;  %v5709_v9 = vadd.f32 1.0, %v7403_v55 }
 0xd07   : > { %v5648_v33 = vmul.f32 %v5644_v43, %v5636_v13  ;;  %v5710_v54 = vadd.f32 1.0, %v7405_v1 }
 0xd08   : > { %v5649_v39 = vmul.f32 %v5644_v43, %v5637_v37  ;;  %7406 = vrcp.f32 %v5709_v9 }
 0xd09   : > { %v5650_v56 = vadd.f32 %v5648_v33, %v5646_v63  ;;  %7408 = vrcp.f32 %v5710_v54  ;;  %v6519_v63 = vld [vmem:[%s10106_s12] ss:$0 sm:$0xff] }
 0xd0a   : > { %v5657_v28 = vadd.f32 %v5649_v39, %v5647_v24 }
 0xd0b   : > { %v5651_v29 = vrot.slane %v5650_v56, 4 }
 0xd0c   : > { %6710 = vmatpush3.bf16.xpose.msra.mxu0 %v7135_v23  ;;  %v5658_v46 = vrot.slane %v5657_v28, 4 }
 0xd0d   : > { %6711 = vmatprep.subr.bf16.mxu0 %v7482_v53  ;;  %v5652_v31 = vadd.f32 %v5651_v29, %v5650_v56 }
 0xd0e   : > { %v5659_v42 = vadd.f32 %v5658_v46, %v5657_v28 }
 0xd0f   : > { %v5653_v61 = vrot.slane %v5652_v31, 2 }
 0xd10   : > { %v5660_v2 = vrot.slane %v5659_v42, 2 }
 0xd11   : > { %v5654_v20 = vadd.f32 %v5653_v61, %v5652_v31 }
 0xd12   : > { %v5661_v10 = vadd.f32 %v5660_v2, %v5659_v42 }
 0xd13   : > { %v5655_v12 = vrot.slane %v5654_v20, 1 }
 0xd14   : > { %6712 = vmatpush3.bf16.xpose.msra.mxu0 %v7136_v3  ;;  %v5662_v48 = vrot.slane %v5661_v10, 1 }
 0xd15   : > { %6713 = vmatprep.subr.bf16.mxu0 %v7482_v53  ;;  %v5656_v45 = vadd.f32 %v5655_v12, %v5654_v20  ;;  %v7407_v58 = vpop.eup %7406 }
 0xd16   : > { %v5663_v15 = vadd.f32 %v5662_v48, %v5661_v10  ;;  %v7409_v49 = vpop.eup %7408  ;;  %v5715_v34 = vmul.f32 %v7407_v58, %v10338_v17 }
 0xd17   : > { %v5716_v8 = vmul.f32 %v7409_v49, %v10339_v40  ;;  %v10349_v40 = vld [vmem:[#allocation31_spill] sm:$0xff] }
 0xd18   : > { %v5666_v32 = vcombine.low %v5656_v45, %v5663_v15 }
 0xd1a   : > { %v5673_v62 = vrot.slane %v5666_v32, %v10330_v51 }
 0xd1c   : > { %6714 = vmatpush3.bf16.xpose.msra.mxu0 %v7137_v36  ;;  %v5680_v4 = vrot.slane %v5673_v62, %v10330_v51  ;;  %v10347_v51 = vld [vmem:[#allocation22_spill] sm:$0xff] }
 0xd1d   : > { %6715 = vmatprep.subr.bf16.mxu0 %v7482_v53  ;;  %v5699_v47 = vmul.f32 %v5692_v57, %v10347_v51 }
 0xd1e   : > { %5682 = vst.msk [vmem:[#allocation2 + $0x7] ss:$8 sm:$0x3] %vm8316_vm6, %v5680_v4 }
 0xd24   : > { %6716 = vmatpush3.bf16.xpose.msra.mxu0 %v7138_v59 }
 0xd25   : > { %6717 = vmatprep.subr.bf16.mxu0 %v7482_v53  ;;  %v5685_v50 = vld [vmem:[#allocation2 + $0x8] sm:$0xff]  ;;  %v5684_v27 = vld [vmem:[#allocation2] sm:$0xff] }
 0xd26   : > { %v5702_v21 = vadd.f32 %v5700_v26, %v5685_v50  ;;  %v5701_v35 = vadd.f32 %v5699_v47, %v5684_v27 }
 0xd28   : > { %v5718_v6 = vmul.f32 %v5716_v8, %v5702_v21  ;;  %v5717_v41 = vmul.f32 %v5715_v34, %v5701_v35 }
 0xd2a   : > { %v5720_v30 = vpack.c.bf16 %v5718_v6, %v5718_v6  ;;  %v5719_v0 = vpack.c.bf16 %v5717_v41, %v5717_v41 }
 0xd2c   : > { %6718 = vmatpush3.bf16.xpose.msra.mxu0 %v7139_v5  ;;  %5850 = vmatprep.mubr.bf16.mxu1 %v5720_v30 }
 0xd2d   : > { %5851 = vmatmul.mubr.bf16.vlgmr.msra.gmra.mxu1 %v5719_v0 }
 0xded   : > { %v5852_v17 = vpop.f32.mrf.mxu1 }
 0xdee   : > { %v5858_v19 = vadd.f32 %v5852_v17, %v10349_v40 }
 0xdef   : > { %v5854_v11 = vpop.f32.mrf.mxu1 }
 0xdf0   : > { %v5859_v7 = vpack.c.bf16 %v5858_v19, %v5858_v19 }
 0xdf1   : > { %v5855_v38 = vpop.f32.mrf.mxu1 }
 0xdf2   : > { %6720 = vmatmul.mubr.bf16.vlgmr.msra.gmra.mxu0 %v5859_v7 }
 0xdf3   : > { %v5856_v14 = vpop.f32.mrf.mxu1 }
 0xeb2   : > { %v5965_v60 = vpop.f32.mrf.mxu0 }
 0xeb3   : > { %v5966_v53 = vadd.f32 %v6519_v63, %v5965_v60 }
 0xeb4   : > { %v6721_v13 = vpop.f32.mrf.mxu0 }
 0xeb5   : > { %5971 = vst [vmem:[%s431_s24] sm:$0xff] %v5966_v53 }
 0xeb6   : > { %v5968_v24 = vpop.f32.mrf.mxu0 }
 0xeb7   : > { %7424 = shalt.err (!%p7421_p3)
}
 0xeb8   : > { %s7425_s14 = scalar_lea.hbm %s10053_s21, 128  ;;  %s7429_s23 = scalar_lea.hbm %s10107_s13, 256 }
 0xeb9   : > { %p7426_p4 = scmp.ne.s32.totalorder %s10053_s21, %s7425_s14  ;;  %p7430_p9 = scmp.lt.s32.totalorder %s10053_s21, %s10107_s13 }
 0xeba   : > { %p7431_p10 = scmp.lt.s32.totalorder %s7429_s23, %s7425_s14 }
 0xebb   : > { %p7427_p7 = pnand %p7426_p4, %p7593_p5 }
 0xebc   : > { %p7432_p11 = por %p7431_p10, %p7430_p9 }
 0xebd   : > { %p7428_p8 = pneg %p7427_p7 }
 0xebf   : > { %p7433_p12 = pnand %p7432_p11, %p7428_p8 }
 0xec1   : > { %7436 = shalt.err (!%p7433_p12)
}
 0xec2   : > { %6747 = dma.vmem_to_hbm [thread:$0]  (%p7593_p5), %s10055_s27, 128, %s10053_s21, %s5973_s22   ;;  %v6722_v52 = vpop.f32.mrf.mxu0 }
 0xec3 PF: > { %p6753_p13 = scmp.ge.s32.totalorder %s7471_s28, 2  ;;  %s5998_s30 = sand.u32 1, %s7459_s25  }
 0xec4   : > { %s5999_s29 = scalar_lea.sflag [#allocation4], %s5998_s30 }
 0xec5   : > { %p6750_p0 = pnand %p6753_p13, %p7597_p6 }
 0xec7   : > { %p6751_p1 = pneg %p6750_p0 }
 0xec9   : > { %7454 = dma.done.wait (%p6751_p1), %s5999_s29, 128  }
 0xeca   : > { %7456 = vsyncadd (%p6751_p1), %s5999_s29, 4294967168  ;;  %s10351_s28 = sld [smem:[#allocation7_spill]]  ;;  %s10354_s25 = smov %s7463_s26 }
 0xecb   : > { %s10352_s15 = sld [smem:[#allocation6_spill]] }
 0xecc   : > { %s10353_s27 = sld [smem:[#allocation8_spill]] }
 0xed0   : > { %p23_p2 = scmp.ge.s32.totalorder %s10351_s28, 4  }
 0xed1   : > { %s10355_s26 = smov %s10352_s15 }
 0xed2   :  { %25 = sbr.rel (!%p23_p2) target bundleno = 5 (0x5), region = 134 }
 0xed7   :  { %6004 = vsyncpa [#allocation4], 1 }
 0xed8   :  { %6006 = vsyncpa [#allocation4 + $0x1], 1 }

</bundles_post_ra>
